<compile_context>
chip_gen: v6e
topology: v6e:2x2x1
jax: 0.10.0
libtpu: 0.0.40
codegen_flags: <defaults>
</compile_context>

<pallas_src>
import math
import numpy as np
import jax
import jax.numpy as jnp
from jax.experimental import pallas as pl
from jax.experimental.pallas import tpu as pltpu

WINDOW_SIZE = 11
SIGMA = 1.5
C1 = 0.01 ** 2
C2 = 0.03 ** 2


def _gaussian_1d(window_size, sigma):
    g = np.array(
        [math.exp(-((x - window_size // 2) ** 2) / float(2 * sigma ** 2))
         for x in range(window_size)],
        dtype=np.float64,
    )
    g = g / g.sum()
    return g.astype(np.float32)


# Same construction as create_window(); the 2D Gaussian window is the outer
# product of this 1D kernel, so the conv is done separably (exact).
_G1D = _gaussian_1d(WINDOW_SIZE, SIGMA)


def _banded_h(W, win):
    """(Wp, W) matrix M s.t. (x_pad @ M)[:, j] = sum_k g[k] * x_pad[:, j + k]."""
    Wp = W + (win - 1)
    m = np.zeros((Wp, W), np.float32)
    for j in range(W):
        m[j:j + win, j] = _G1D
    return m


def _banded_v(H, win):
    """(H, Hp) matrix M s.t. (M @ y)[i, :] = sum_k g[k] * y[i + k, :]."""
    Hp = H + (win - 1)
    m = np.zeros((H, Hp), np.float32)
    for i in range(H):
        m[i, i:i + win] = _G1D
    return m


def _make_ssim_kernel():
    prec = jax.lax.Precision.HIGHEST  # keep f32-accurate MXU passes

    def kernel(gw_ref, gh_ref, x1_ref, x2_ref, out_ref):
        gw = gw_ref[...]   # (L*Wp, L*W) block-diagonal horizontal blur matrix
        gh = gh_ref[...]   # (H, Hp)     vertical blur matrix
        x1 = x1_ref[0]     # (Hp, L*Wp)  L zero-padded images packed along lanes
        x2 = x2_ref[0]

        def blur(x):
            # horizontal then vertical separable Gaussian, both on the MXU
            yh = jnp.dot(x, gw, preferred_element_type=jnp.float32, precision=prec)
            return jnp.dot(gh, yh, preferred_element_type=jnp.float32, precision=prec)

        mu1 = blur(x1)
        mu2 = blur(x2)
        mu1_sq = mu1 * mu1
        mu2_sq = mu2 * mu2
        mu1_mu2 = mu1 * mu2
        # squaring/multiplying the zero-padded images == zero-padding the
        # squared/multiplied images, so this matches F.conv2d(img*img, ...).
        sigma1_sq = blur(x1 * x1) - mu1_sq
        sigma2_sq = blur(x2 * x2) - mu2_sq
        sigma12 = blur(x1 * x2) - mu1_mu2

        num = (2.0 * mu1_mu2 + C1) * (2.0 * sigma12 + C2)
        den = (mu1_sq + mu2_sq + C1) * (sigma1_sq + sigma2_sq + C2)
        ssim_map = num * pl.reciprocal(den)          # exact reciprocal on EUP

        # Only a sublane reduction in-kernel; cross-lane sum + mean in wrapper.
        out_ref[0] = jnp.sum(ssim_map, axis=0, keepdims=True)

    return kernel


def ssim_pallas(img1, img2, window_size=WINDOW_SIZE, size_average=True):
    """SSIM with size_average=True (scalar mean), matching the PyTorch module."""
    assert size_average, "only size_average=True is implemented"
    N, C, H, W = img1.shape
    pad = window_size // 2
    Hp, Wp = H + 2 * pad, W + 2 * pad
    B = N * C

    # Lane packing factor: put L images side-by-side along the lane axis so the
    # elementwise SSIM math and the blur outputs are lane-dense (~128 lanes).
    L = max(1, min(128 // W, B)) if W < 128 else 1
    G = -(-B // L)            # number of grid steps (groups)
    B_pad = G * L             # batch padded with zero images (masked out below)

    x1 = img1.reshape(B, H, W).astype(jnp.float32)
    x2 = img2.reshape(B, H, W).astype(jnp.float32)

    # TODO(synk): spatial zero-padding could be done in-kernel (zero-init VMEM
    # scratch + interior DMA) to cut HBM traffic; done in the wrapper for now.
    def pack(x):
        xp = jnp.pad(x, ((0, B_pad - B), (pad, pad), (pad, pad)))
        # (G, L, Hp, Wp) -> (G, Hp, L, Wp) -> (G, Hp, L*Wp): image l of a group
        # occupies lane columns [l*Wp, (l+1)*Wp).
        return xp.reshape(G, L, Hp, Wp).transpose(0, 2, 1, 3).reshape(G, Hp, L * Wp)

    x1p = pack(x1)
    x2p = pack(x2)

    # Constant banded blur matrices (baked on host, passed as VMEM-resident
    # inputs whose block never changes across the grid).
    gw1 = _banded_h(W, window_size)                       # (Wp, W)
    gw_bd = np.zeros((L * Wp, L * W), np.float32)         # block-diagonal
    for l in range(L):
        gw_bd[l * Wp:(l + 1) * Wp, l * W:(l + 1) * W] = gw1
    gw = jnp.asarray(gw_bd)
    gh = jnp.asarray(_banded_v(H, window_size))           # (H, Hp)

    kernel = _make_ssim_kernel()

    out = pl.pallas_call(
        kernel,
        out_shape=jax.ShapeDtypeStruct((G, 1, L * W), jnp.float32),
        grid=(G,),
        in_specs=[
            pl.BlockSpec((L * Wp, L * W), lambda g: (0, 0)),
            pl.BlockSpec((H, Hp), lambda g: (0, 0)),
            pl.BlockSpec((1, Hp, L * Wp), lambda g: (g, 0, 0)),
            pl.BlockSpec((1, Hp, L * Wp), lambda g: (g, 0, 0)),
        ],
        out_specs=pl.BlockSpec((1, 1, L * W), lambda g: (g, 0, 0)),
        compiler_params=pltpu.CompilerParams(dimension_semantics=("parallel",)),
    )(gw, gh, x1p, x2p)

    # Final reduction in the wrapper; drop lanes belonging to batch padding.
    colsums = out.reshape(G, L * W)
    n_valid_last = B - (G - 1) * L
    total = jnp.sum(colsums[:G - 1]) + jnp.sum(colsums[G - 1, : n_valid_last * W])
    return total / float(B * H * W)


def _ssim_reference(img1, img2, window_size=WINDOW_SIZE):
    # Pure-JAX reference mirroring the PyTorch _ssim (depthwise conv, zero pad).
    N, C, H, W = img1.shape
    pad = window_size // 2
    w2d = jnp.asarray(np.outer(_G1D, _G1D), jnp.float32)
    window = jnp.broadcast_to(w2d, (C, 1, window_size, window_size))

    def conv(x):
        return jax.lax.conv_general_dilated(
            x, window, window_strides=(1, 1), padding=((pad, pad), (pad, pad)),
            dimension_numbers=("NCHW", "OIHW", "NCHW"), feature_group_count=C,
            precision=jax.lax.Precision.HIGHEST)

    mu1, mu2 = conv(img1), conv(img2)
    mu1_sq, mu2_sq, mu1_mu2 = mu1 * mu1, mu2 * mu2, mu1 * mu2
    s1 = conv(img1 * img1) - mu1_sq
    s2 = conv(img2 * img2) - mu2_sq
    s12 = conv(img1 * img2) - mu1_mu2
    ssim_map = ((2 * mu1_mu2 + C1) * (2 * s12 + C2)) / ((mu1_sq + mu2_sq + C1) * (s1 + s2 + C2))
    return ssim_map.mean()


if __name__ == "__main__":
    key = jax.random.PRNGKey(0)
    k1, k2 = jax.random.split(key)
    img1 = jax.random.uniform(k1, (2, 4, 16, 16), dtype=jnp.float32)
    img2 = jax.random.uniform(k2, (2, 4, 16, 16), dtype=jnp.float32)

    out = ssim_pallas(img1, img2)
    out = jax.block_until_ready(out)

    ref = jax.block_until_ready(_ssim_reference(img1, img2))
    np.testing.assert_allclose(np.asarray(out), np.asarray(ref), rtol=1e-5, atol=1e-5)

    print("KERNEL_OK")
</pallas_src>

<mosaic_0001>
module attributes {stable_mosaic.version = 11 : i64} {
  func.func @kernel(%arg0: i32, %arg1: memref<208x128xf32, #tpu.memory_space<vmem>>, %arg2: memref<16x26xf32, #tpu.memory_space<vmem>>, %arg3: memref<1x26x208xf32, #tpu.memory_space<vmem>>, %arg4: memref<1x26x208xf32, #tpu.memory_space<vmem>>, %arg5: memref<1x1x128xf32, #tpu.memory_space<vmem>>) attributes {dimension_semantics = [#tpu.dimension_semantics<parallel>], iteration_bounds = array<i64: 1>, scalar_prefetch = 0 : i64, scratch_operands = 0 : i64, tpu.core_type = #tpu.core_type<tc>, window_params = [{pipeline_mode = #tpu.pipeline_mode<synchronous>, transform_indices = @transform_0, window_bounds = array<i64: 208, 128>}, {pipeline_mode = #tpu.pipeline_mode<synchronous>, transform_indices = @transform_1, window_bounds = array<i64: 16, 26>}, {transform_indices = @transform_2, window_bounds = array<i64: 1, 26, 208>}, {transform_indices = @transform_3, window_bounds = array<i64: 1, 26, 208>}, {transform_indices = @transform_4, window_bounds = array<i64: 1, 1, 128>}]} {
    %c0 = arith.constant 0 : index
    %c0_0 = arith.constant 0 : index
    %0 = vector.load %arg1[%c0, %c0_0] : memref<208x128xf32, #tpu.memory_space<vmem>>, vector<208x128xf32>
    %c0_1 = arith.constant 0 : index
    %c0_2 = arith.constant 0 : index
    %1 = vector.load %arg2[%c0_1, %c0_2] : memref<16x26xf32, #tpu.memory_space<vmem>>, vector<16x26xf32>
    %c0_3 = arith.constant 0 : index
    %c0_4 = arith.constant 0 : index
    %c0_5 = arith.constant 0 : index
    %2 = vector.load %arg3[%c0_3, %c0_4, %c0_5] : memref<1x26x208xf32, #tpu.memory_space<vmem>>, vector<1x26x208xf32>
    %3 = vector.shape_cast %2 : vector<1x26x208xf32> to vector<26x208xf32>
    %c0_6 = arith.constant 0 : index
    %c0_7 = arith.constant 0 : index
    %c0_8 = arith.constant 0 : index
    %4 = vector.load %arg4[%c0_6, %c0_7, %c0_8] : memref<1x26x208xf32, #tpu.memory_space<vmem>>, vector<1x26x208xf32>
    %5 = vector.shape_cast %4 : vector<1x26x208xf32> to vector<26x208xf32>
    %cst = arith.constant dense<0.000000e+00> : vector<26x128xf32>
    %6 = tpu.matmul %3, %0, %cst {dimension_numbers = #tpu.dot_dimension_numbers<[1], [0], [0], [1], [0, 0, 1, 1], [], []>, precision = #tpu.contract_precision<fp32>} : vector<26x208xf32>, vector<208x128xf32>, vector<26x128xf32> -> vector<26x128xf32>
    %cst_9 = arith.constant dense<0.000000e+00> : vector<16x128xf32>
    %7 = tpu.matmul %1, %6, %cst_9 {dimension_numbers = #tpu.dot_dimension_numbers<[1], [0], [0], [1], [0, 0, 1, 1], [], []>, precision = #tpu.contract_precision<fp32>} : vector<16x26xf32>, vector<26x128xf32>, vector<16x128xf32> -> vector<16x128xf32>
    %cst_10 = arith.constant dense<0.000000e+00> : vector<26x128xf32>
    %8 = tpu.matmul %5, %0, %cst_10 {dimension_numbers = #tpu.dot_dimension_numbers<[1], [0], [0], [1], [0, 0, 1, 1], [], []>, precision = #tpu.contract_precision<fp32>} : vector<26x208xf32>, vector<208x128xf32>, vector<26x128xf32> -> vector<26x128xf32>
    %cst_11 = arith.constant dense<0.000000e+00> : vector<16x128xf32>
    %9 = tpu.matmul %1, %8, %cst_11 {dimension_numbers = #tpu.dot_dimension_numbers<[1], [0], [0], [1], [0, 0, 1, 1], [], []>, precision = #tpu.contract_precision<fp32>} : vector<16x26xf32>, vector<26x128xf32>, vector<16x128xf32> -> vector<16x128xf32>
    %10 = arith.mulf %7, %7 : vector<16x128xf32>
    %11 = arith.mulf %9, %9 : vector<16x128xf32>
    %12 = arith.mulf %7, %9 : vector<16x128xf32>
    %13 = arith.mulf %3, %3 : vector<26x208xf32>
    %cst_12 = arith.constant dense<0.000000e+00> : vector<26x128xf32>
    %14 = tpu.matmul %13, %0, %cst_12 {dimension_numbers = #tpu.dot_dimension_numbers<[1], [0], [0], [1], [0, 0, 1, 1], [], []>, precision = #tpu.contract_precision<fp32>} : vector<26x208xf32>, vector<208x128xf32>, vector<26x128xf32> -> vector<26x128xf32>
    %cst_13 = arith.constant dense<0.000000e+00> : vector<16x128xf32>
    %15 = tpu.matmul %1, %14, %cst_13 {dimension_numbers = #tpu.dot_dimension_numbers<[1], [0], [0], [1], [0, 0, 1, 1], [], []>, precision = #tpu.contract_precision<fp32>} : vector<16x26xf32>, vector<26x128xf32>, vector<16x128xf32> -> vector<16x128xf32>
    %16 = arith.subf %15, %10 : vector<16x128xf32>
    %17 = arith.mulf %5, %5 : vector<26x208xf32>
    %cst_14 = arith.constant dense<0.000000e+00> : vector<26x128xf32>
    %18 = tpu.matmul %17, %0, %cst_14 {dimension_numbers = #tpu.dot_dimension_numbers<[1], [0], [0], [1], [0, 0, 1, 1], [], []>, precision = #tpu.contract_precision<fp32>} : vector<26x208xf32>, vector<208x128xf32>, vector<26x128xf32> -> vector<26x128xf32>
    %cst_15 = arith.constant dense<0.000000e+00> : vector<16x128xf32>
    %19 = tpu.matmul %1, %18, %cst_15 {dimension_numbers = #tpu.dot_dimension_numbers<[1], [0], [0], [1], [0, 0, 1, 1], [], []>, precision = #tpu.contract_precision<fp32>} : vector<16x26xf32>, vector<26x128xf32>, vector<16x128xf32> -> vector<16x128xf32>
    %20 = arith.subf %19, %11 : vector<16x128xf32>
    %21 = arith.mulf %3, %5 : vector<26x208xf32>
    %cst_16 = arith.constant dense<0.000000e+00> : vector<26x128xf32>
    %22 = tpu.matmul %21, %0, %cst_16 {dimension_numbers = #tpu.dot_dimension_numbers<[1], [0], [0], [1], [0, 0, 1, 1], [], []>, precision = #tpu.contract_precision<fp32>} : vector<26x208xf32>, vector<208x128xf32>, vector<26x128xf32> -> vector<26x128xf32>
    %cst_17 = arith.constant dense<0.000000e+00> : vector<16x128xf32>
    %23 = tpu.matmul %1, %22, %cst_17 {dimension_numbers = #tpu.dot_dimension_numbers<[1], [0], [0], [1], [0, 0, 1, 1], [], []>, precision = #tpu.contract_precision<fp32>} : vector<16x26xf32>, vector<26x128xf32>, vector<16x128xf32> -> vector<16x128xf32>
    %24 = arith.subf %23, %12 : vector<16x128xf32>
    %cst_18 = arith.constant 2.000000e+00 : f32
    %25 = vector.broadcast %cst_18 : f32 to vector<16x128xf32>
    %26 = arith.mulf %25, %12 : vector<16x128xf32>
    %cst_19 = arith.constant 9.99999974E-5 : f32
    %27 = vector.broadcast %cst_19 : f32 to vector<16x128xf32>
    %28 = arith.addf %26, %27 : vector<16x128xf32>
    %cst_20 = arith.constant 2.000000e+00 : f32
    %29 = vector.broadcast %cst_20 : f32 to vector<16x128xf32>
    %30 = arith.mulf %29, %24 : vector<16x128xf32>
    %cst_21 = arith.constant 8.99999984E-4 : f32
    %31 = vector.broadcast %cst_21 : f32 to vector<16x128xf32>
    %32 = arith.addf %30, %31 : vector<16x128xf32>
    %33 = arith.mulf %28, %32 : vector<16x128xf32>
    %34 = arith.addf %10, %11 : vector<16x128xf32>
    %cst_22 = arith.constant 9.99999974E-5 : f32
    %35 = vector.broadcast %cst_22 : f32 to vector<16x128xf32>
    %36 = arith.addf %34, %35 : vector<16x128xf32>
    %37 = arith.addf %16, %20 : vector<16x128xf32>
    %cst_23 = arith.constant 8.99999984E-4 : f32
    %38 = vector.broadcast %cst_23 : f32 to vector<16x128xf32>
    %39 = arith.addf %37, %38 : vector<16x128xf32>
    %40 = arith.mulf %36, %39 : vector<16x128xf32>
    %41 = tpu.reciprocal %40 : vector<16x128xf32> -> vector<16x128xf32>
    %42 = arith.mulf %33, %41 : vector<16x128xf32>
    %cst_24 = arith.constant dense<0.000000e+00> : vector<128xf32>
    %43 = vector.multi_reduction <add>, %42, %cst_24 [0] : vector<16x128xf32> to vector<128xf32>
    %44 = vector.shape_cast %43 : vector<128xf32> to vector<1x128xf32>
    %c0_25 = arith.constant 0 : index
    %c0_26 = arith.constant 0 : index
    %c0_27 = arith.constant 0 : index
    %45 = vector.load %arg5[%c0_25, %c0_26, %c0_27] : memref<1x1x128xf32, #tpu.memory_space<vmem>>, vector<1x1x128xf32>
    %46 = vector.shape_cast %45 : vector<1x1x128xf32> to vector<1x128xf32>
    %47 = vector.shape_cast %44 : vector<1x128xf32> to vector<1x1x128xf32>
    tpu.vector_store %arg5[%c0_25, %c0_26, %c0_27], %47 {strides = array<i32>} : memref<1x1x128xf32, #tpu.memory_space<vmem>>, vector<1x1x128xf32>,
    return
  }
  func.func @transform_0(%arg0: i32) -> (i32, i32) {
    %c0_i32 = arith.constant 0 : i32
    %c0_i32_0 = arith.constant 0 : i32
    %c0_i32_1 = arith.constant 0 : i32
    return %c0_i32, %c0_i32_0 : i32, i32
  }
  func.func @transform_1(%arg0: i32) -> (i32, i32) {
    %c0_i32 = arith.constant 0 : i32
    %c0_i32_0 = arith.constant 0 : i32
    %c0_i32_1 = arith.constant 0 : i32
    return %c0_i32, %c0_i32_0 : i32, i32
  }
  func.func @transform_2(%arg0: i32) -> (i32, i32, i32) {
    %c0_i32 = arith.constant 0 : i32
    %c0_i32_0 = arith.constant 0 : i32
    %c0_i32_1 = arith.constant 0 : i32
    return %arg0, %c0_i32, %c0_i32_0 : i32, i32, i32
  }
  func.func @transform_3(%arg0: i32) -> (i32, i32, i32) {
    %c0_i32 = arith.constant 0 : i32
    %c0_i32_0 = arith.constant 0 : i32
    %c0_i32_1 = arith.constant 0 : i32
    return %arg0, %c0_i32, %c0_i32_0 : i32, i32, i32
  }
  func.func @transform_4(%arg0: i32) -> (i32, i32, i32) {
    %c0_i32 = arith.constant 0 : i32
    %c0_i32_0 = arith.constant 0 : i32
    %c0_i32_1 = arith.constant 0 : i32
    return %arg0, %c0_i32, %c0_i32_0 : i32, i32, i32
  }
}

</mosaic_0001>

<bundles_post_ra>
// kernel: tpu_custom_call.1
= control target key start
LH: loop header
LB: loop body
LE: loop exit
PB: predicated region body
PF: predicated region fallthrough
CT: control target
= control target key end

     0   :  { %v11280_v3 = vmov 0.0   ;;  %s11273_s0 = inlined_call_operand.vmem [shape: f32[208,128], index: 0, kind: input, shape index: {}]   ;;  %s11274_s1 = inlined_call_operand.vmem [shape: f32[16,26], index: 1, kind: input, shape index: {}]   ;;  %s11275_s2 = inlined_call_operand.vmem [shape: f32[1,26,208], index: 2, kind: input, shape index: {}]   ;;  %s11276_s3 = inlined_call_operand.vmem [shape: f32[1,26,208], index: 3, kind: input, shape index: {}]   ;;  %s11277_s4 = inlined_call_operand.hbm [shape: f32[1,1,128], index: 4, kind: output, shape index: {}]  }
   0x1   :  { %v33_v0 = vld [vmem:[%s11273_s0 + $0x78] sm:$0xff]  ;;  %v32_v1 = vld [vmem:[%s11273_s0 + $0x70] sm:$0xff]  ;;  %v31_v2 = vld [vmem:[%s11273_s0 + $0x68] sm:$0xff]  ;;  %75 = vmatprep.subr.mxu0 %v11280_v3  ;;  %226 = vmatprep.subr.mxu1 %v11280_v3 }
   0x2   :  { %v8235_v4 = vand.u32 4294901760, %v33_v0  ;;  %v8237_v5 = vand.u32 4294901760, %v32_v1  ;;  %v8239_v6 = vand.u32 4294901760, %v31_v2  ;;  %v30_v7 = vld [vmem:[%s11273_s0 + $0x60] sm:$0xff]  ;;  %v29_v8 = vld [vmem:[%s11273_s0 + $0x58] sm:$0xff]  ;;  %v28_v9 = vld [vmem:[%s11273_s0 + $0x50] sm:$0xff] }
   0x3   :  { %v8251_v10 = vand.u32 4294901760, %v30_v7  ;;  %v8253_v11 = vand.u32 4294901760, %v29_v8  ;;  %v8255_v12 = vand.u32 4294901760, %v28_v9  ;;  %v27_v13 = vld [vmem:[%s11273_s0 + $0x48] sm:$0xff]  ;;  %v26_v14 = vld [vmem:[%s11273_s0 + $0x40] sm:$0xff]  ;;  %v25_v19 = vld [vmem:[%s11273_s0 + $0x38] sm:$0xff] }
   0x4   :  { %77 = vmatpush1.msra.mxu0 %v8235_v4  ;;  %v8265_v15 = vsub.f32 %v33_v0, %v8235_v4  ;;  %v8268_v16 = vsub.f32 %v32_v1, %v8237_v5  ;;  %v8270_v17 = vand.u32 4294901760, %v27_v13  ;;  %v8273_v18 = vsub.f32 %v31_v2, %v8239_v6  ;;  %v24_v26 = vld [vmem:[%s11273_s0 + $0x30] sm:$0xff]  ;;  %v23_v36 = vld [vmem:[%s11273_s0 + $0x28] sm:$0xff]  ;;  %v22_v41 = vld [vmem:[%s11273_s0 + $0x20] sm:$0xff] }
   0x5   :  { %78 = vmatprep.subr.mxu0 %v11280_v3  ;;  %v8280_v20 = vsub.f32 %v30_v7, %v8251_v10  ;;  %v8283_v21 = vsub.f32 %v29_v8, %v8253_v11  ;;  %v8295_v25 = vand.u32 4294901760, %v26_v14  ;;  %v8304_v28 = vand.u32 4294901760, %v25_v19  ;;  %v21_v49 = vld [vmem:[%s11273_s0 + $0x18] sm:$0xff]  ;;  %v20_v53 = vld [vmem:[%s11273_s0 + $0x10] sm:$0xff] }
   0x6   :  { %11489 = vst [vmem:[#allocation5_spill] sm:$0xff] %v8265_v15  ;;  %11490 = vst [vmem:[#allocation6_spill] sm:$0xff] %v8268_v16  ;;  %80 = vmatpush1.msra.mxu0 %v8237_v5  ;;  %v8287_v22 = vand.u32 4294901760, %v8265_v15  ;;  %v8290_v23 = vand.u32 4294901760, %v8268_v16  ;;  %v8293_v24 = vand.u32 4294901760, %v8273_v18  ;;  %v8310_v30 = vsub.f32 %v28_v9, %v8255_v12 }
   0x7   :  { %11491 = vst [vmem:[#allocation7_spill] sm:$0xff] %v8273_v18  ;;  %11492 = vst [vmem:[#allocation8_spill] sm:$0xff] %v8280_v20  ;;  %81 = vmatprep.subr.mxu0 %v11280_v3  ;;  %v8302_v27 = vand.u32 4294901760, %v8280_v20  ;;  %v8307_v29 = vand.u32 4294901760, %v8283_v21  ;;  %v8320_v34 = vsub.f32 %v27_v13, %v8270_v17  ;;  %v8323_v35 = vand.u32 4294901760, %v24_v26 }
   0x8   :  { %11493 = vst [vmem:[#allocation9_spill] sm:$0xff] %v8283_v21  ;;  %11494 = vst [vmem:[#allocation10_spill] sm:$0xff] %v8287_v22  ;;  %83 = vmatpush1.msra.mxu0 %v8239_v6  ;;  %v230_v31 = vsub.f32 %v8265_v15, %v8287_v22  ;;  %v237_v32 = vsub.f32 %v8268_v16, %v8290_v23  ;;  %v244_v33 = vsub.f32 %v8273_v18, %v8293_v24 }
   0x9   :  { %11495 = vst [vmem:[#allocation11_spill] sm:$0xff] %v8290_v23  ;;  %11496 = vst [vmem:[#allocation12_spill] sm:$0xff] %v8293_v24  ;;  %84 = vmatprep.subr.mxu0 %v11280_v3  ;;  %v251_v39 = vsub.f32 %v8280_v20, %v8302_v27  ;;  %v8336_v40 = vand.u32 4294901760, %v8310_v30  ;;  %v258_v42 = vsub.f32 %v8283_v21, %v8307_v29  ;;  %v8351_v45 = vand.u32 4294901760, %v23_v36 }
   0xa   :  { %11497 = vst [vmem:[#allocation13_spill] sm:$0xff] %v8302_v27  ;;  %11498 = vst [vmem:[#allocation14_spill] sm:$0xff] %v8307_v29  ;;  %86 = vmatpush1.msra.mxu0 %v8251_v10  ;;  %v8329_v37 = vand.u32 4294901760, %v230_v31  ;;  %v8331_v38 = vand.u32 4294901760, %v237_v32  ;;  %v8345_v43 = vsub.f32 %v26_v14, %v8295_v25  ;;  %v8349_v44 = vand.u32 4294901760, %v244_v33 }
   0xb   :  { %11499 = vst [vmem:[#allocation15_spill] sm:$0xff] %v8310_v30  ;;  %11500 = vst [vmem:[#allocation16_spill] sm:$0xff] %v8320_v34  ;;  %87 = vmatprep.subr.mxu0 %v11280_v3  ;;  %v8354_v46 = vand.u32 4294901760, %v8320_v34  ;;  %v8357_v47 = vsub.f32 %v25_v19, %v8304_v28  ;;  %v8361_v48 = vand.u32 4294901760, %v22_v41  ;;  %v8368_v50 = vand.u32 4294901760, %v251_v39 }
   0xc   :  { %11501 = vst [vmem:[#allocation17_spill] sm:$0xff] %v8329_v37  ;;  %11502 = vst [vmem:[#allocation18_spill] sm:$0xff] %v8331_v38  ;;  %89 = vmatpush1.msra.mxu0 %v8253_v11  ;;  %232 = vmatpush1.msra.mxu1 %v8329_v37  ;;  %v265_v51 = vsub.f32 %v8310_v30, %v8336_v40  ;;  %v8373_v52 = vand.u32 4294901760, %v8345_v43  ;;  %v8379_v54 = vsub.f32 %v24_v26, %v8323_v35 }
   0xd   :  { %11503 = vst [vmem:[#allocation19_spill] sm:$0xff] %v8336_v40  ;;  %11504 = vst [vmem:[#allocation20_spill] sm:$0xff] %v8345_v43  ;;  %90 = vmatprep.subr.mxu0 %v11280_v3  ;;  %233 = vmatprep.subr.mxu1 %v11280_v3 }
   0xe   :  { %11505 = vst [vmem:[#allocation21_spill] sm:$0xff] %v8349_v44  ;;  %11506 = vst [vmem:[#allocation22_spill] sm:$0xff] %v8354_v46  ;;  %92 = vmatpush1.msra.mxu0 %v8255_v12  ;;  %239 = vmatpush1.msra.mxu1 %v8331_v38 }
   0xf   :  { %11507 = vst [vmem:[#allocation23_spill] sm:$0xff] %v8357_v47  ;;  %11508 = vst [vmem:[#allocation24_spill] sm:$0xff] %v8368_v50 }
  0x10   :  { %11509 = vst [vmem:[#allocation25_spill] sm:$0xff] %v8373_v52  ;;  %11510 = vst [vmem:[#allocation26_spill] sm:$0xff] %v8379_v54 }
  0x11   :  { %9 = vsyncpa [#allocation3], 0  ;;  %93 = vmatprep.subr.mxu0 %v11280_v3  ;;  %240 = vmatprep.subr.mxu1 %v11280_v3  ;;  %v8383_v55 = vand.u32 4294901760, %v258_v42  ;;  %v272_v56 = vsub.f32 %v8320_v34, %v8354_v46  ;;  %v8389_v57 = vand.u32 4294901760, %v21_v49  ;;  %v8392_v58 = vand.u32 4294901760, %v8357_v47  ;;  %v19_v59 = vld [vmem:[%s11273_s0 + $0x8] sm:$0xff] }
  0x12   :  { %95 = vmatpush1.msra.mxu0 %v8270_v17  ;;  %246 = vmatpush1.msra.mxu1 %v8349_v44  ;;  %v8398_v60 = vsub.f32 %v23_v36, %v8351_v45  ;;  %v8402_v61 = vand.u32 4294901760, %v20_v53  ;;  %v8406_v62 = vand.u32 4294901760, %v265_v51  ;;  %v279_v63 = vsub.f32 %v8345_v43, %v8373_v52  ;;  %v18_v1 = vld [vmem:[%s11273_s0] sm:$0xff]  ;;  %v43_v26 = vld [vmem:[%s11273_s0 + $0xc8] sm:$0xff]  ;;  %v37_v52 = vld [vmem:[%s11273_s0 + $0x98] sm:$0xff] }
  0x13   :  { %11511 = vst [vmem:[#allocation27_spill] sm:$0xff] %v8383_v55  ;;  %11512 = vst [vmem:[#allocation28_spill] sm:$0xff] %v8392_v58  ;;  %96 = vmatprep.subr.mxu0 %v11280_v3  ;;  %247 = vmatprep.subr.mxu1 %v11280_v3  ;;  %v8411_v0 = vand.u32 4294901760, %v8379_v54  ;;  %v8417_v2 = vsub.f32 %v22_v41, %v8361_v48  ;;  %v8421_v7 = vand.u32 4294901760, %v19_v59  ;;  %v8425_v8 = vand.u32 4294901760, %v272_v56  ;;  %v42_v36 = vld [vmem:[%s11273_s0 + $0xc0] sm:$0xff] }
  0x14   :  { %11513 = vst [vmem:[#allocation29_spill] sm:$0xff] %v8398_v60  ;;  %98 = vmatpush1.msra.mxu0 %v8295_v25  ;;  %253 = vmatpush1.msra.mxu1 %v8368_v50  ;;  %11514 = vst [vmem:[#allocation30_spill] sm:$0xff] %v8406_v62  ;;  %v286_v9 = vsub.f32 %v8357_v47, %v8392_v58  ;;  %v8430_v13 = vand.u32 4294901760, %v8398_v60  ;;  %v8433_v14 = vsub.f32 %v21_v49, %v8389_v57  ;;  %vm62_vm0 = vcmask 654336   ;;  %v35_v24 = vld [vmem:[%s11273_s0 + $0x88] sm:$0xff] }
  0x15   :  { %11515 = vst [vmem:[#allocation31_spill] sm:$0xff] %v8411_v0  ;;  %11516 = vst [vmem:[#allocation32_spill] sm:$0xff] %v8417_v2  ;;  %99 = vmatprep.subr.mxu0 %v11280_v3  ;;  %254 = vmatprep.subr.mxu1 %v11280_v3  ;;  %v8437_v19 = vand.u32 4294901760, %v18_v1  ;;  %v8444_v31 = vand.u32 4294901760, %v279_v63  ;;  %v293_v32 = vsub.f32 %v8379_v54, %v8411_v0  ;;  %v8449_v33 = vand.u32 4294901760, %v8417_v2 }
  0x16   :  { %101 = vmatpush1.msra.mxu0 %v8304_v28  ;;  %260 = vmatpush1.msra.mxu1 %v8383_v55  ;;  %11517 = vst [vmem:[#allocation33_spill] sm:$0xff] %v8425_v8  ;;  %11518 = vst [vmem:[#allocation34_spill] sm:$0xff] %v8430_v13  ;;  %v8455_v39 = vsub.f32 %v20_v53, %v8402_v61  ;;  %v8460_v41 = vsub.f32 %v19_v59, %v8421_v7  ;;  %v8464_v42 = vand.u32 4294901760, %v286_v9  ;;  %v41_v59 = vld [vmem:[%s11273_s0 + $0xb8] sm:$0xff]  ;;  %v11531_v55 = vmov 0.0  }
  0x17   :  { %11519 = vst [vmem:[#allocation35_spill] sm:$0xff] %v8433_v14  ;;  %102 = vmatprep.subr.mxu0 %v11280_v3  ;;  %261 = vmatprep.subr.mxu1 %v11280_v3  ;;  %11520 = vst [vmem:[#allocation36_spill] sm:$0xff] %v8444_v31  ;;  %v300_v49 = vsub.f32 %v8398_v60, %v8430_v13  ;;  %v8468_v51 = vand.u32 4294901760, %v43_v26  ;;  %v8471_v53 = vand.u32 4294901760, %v8433_v14  ;;  %v8475_v56 = vand.u32 4294901760, %v42_v36 }
  0x18   :  { %104 = vmatpush1.msra.mxu0 %v8323_v35  ;;  %267 = vmatpush1.msra.mxu1 %v8406_v62  ;;  %11521 = vst [vmem:[#allocation37_spill] sm:$0xff] %v8449_v33  ;;  %11522 = vst [vmem:[#allocation38_spill] sm:$0xff] %v8455_v39  ;;  %v8482_v63 = vand.u32 4294901760, %v293_v32  ;;  %v307_v9 = vsub.f32 %v8417_v2, %v8449_v33  ;;  %v8493_v62 = vsub.f32 %v18_v1, %v8437_v19  ;;  %v39_v1 = vld [vmem:[%s11273_s0 + $0xa8] sm:$0xff]  ;;  %v38_v33 = vld [vmem:[%s11273_s0 + $0xa0] sm:$0xff]  ;;  %vm1027_vm1 = vcmask 211968  }
  0x19   :  { %105 = vmatprep.subr.mxu0 %v11280_v3  ;;  %268 = vmatprep.subr.mxu1 %v11280_v3  ;;  %11523 = vst [vmem:[#allocation39_spill] sm:$0xff] %v8460_v41  ;;  %11524 = vst [vmem:[#allocation40_spill] sm:$0xff] %v8464_v42  ;;  %v8498_v32 = vand.u32 4294901760, %v8460_v41  ;;  %v314_v50 = vsub.f32 %v8433_v14, %v8471_v53  ;;  %v8506_v44 = vand.u32 4294901760, %v41_v59  ;;  %vm1034_vm2 = vcmask 1041408  }
  0x1a   :  { %107 = vmatpush1.msra.mxu0 %v8351_v45  ;;  %274 = vmatpush1.msra.mxu1 %v8425_v8  ;;  %11525 = vst [vmem:[#allocation41_spill] sm:$0xff] %v8468_v51  ;;  %11526 = vst [vmem:[#allocation42_spill] sm:$0xff] %v8471_v53  ;;  %v8487_v8 = vand.u32 4294901760, %v8455_v39  ;;  %v8512_v38 = vsub.f32 %v43_v26, %v8468_v51  ;;  %v8528_v53 = vand.u32 4294901760, %v8493_v62 }
  0x1b   :  { %108 = vmatprep.subr.mxu0 %v11280_v3  ;;  %275 = vmatprep.subr.mxu1 %v11280_v3  ;;  %11527 = vst [vmem:[#allocation43_spill] sm:$0xff] %v8475_v56  ;;  %11528 = vst [vmem:[#allocation44_spill] sm:$0xff] %v8482_v63  ;;  %v40_v3 = vld [vmem:[%s11273_s0 + $0xb0] sm:$0xff]  ;;  %v8534_v13 = vsub.f32 %v42_v36, %v8475_v56  ;;  %v8550_v36 = vsub.f32 %v41_v59, %v8506_v44 }
  0x1c   :  { %110 = vmatpush1.msra.mxu0 %v8361_v48  ;;  %281 = vmatpush1.msra.mxu1 %v8444_v31  ;;  %11529 = vst [vmem:[#allocation45_spill] sm:$0xff] %v8487_v8  ;;  %11530 = vst [vmem:[#allocation46_spill] sm:$0xff] %v8493_v62  ;;  %v8502_v31 = vand.u32 4294901760, %v300_v49  ;;  %v8516_v37 = vand.u32 4294901760, %v40_v3  ;;  %v47_v49 = vld [vmem:[%s11275_s2 + $0x8] sm:$0xff]  ;;  %v321_v26 = vsub.f32 %v8455_v39, %v8487_v8  ;;  %v8544_v8 = vand.u32 4294901760, %v314_v50 }
  0x1d   :  { %111 = vmatprep.subr.mxu0 %v11531_v55  ;;  %282 = vmatprep.subr.mxu1 %v11531_v55  ;;  %11532 = vst [vmem:[#allocation47_spill] sm:$0xff] %v8498_v32  ;;  %11534 = vst [vmem:[#allocation49_spill] sm:$0xff] %v8506_v44  ;;  %v8547_v0 = vand.u32 4294901760, %v8512_v38  ;;  %v64_v58 = vsel %vm62_vm0, %v47_v49, 0  ;;  %v335_v59 = vsub.f32 %v8493_v62, %v8528_v53  ;;  %v8567_v49 = vand.u32 4294901760, %v8534_v13 }
  0x1e   :  { %113 = vmatpush1.msra.mxu0 %v8389_v57  ;;  %288 = vmatpush1.msra.mxu1 %v8464_v42  ;;  %11533 = vst [vmem:[#allocation48_spill] sm:$0xff] %v8502_v31  ;;  %11535 = vst [vmem:[#allocation50_spill] sm:$0xff] %v8512_v38  ;;  %v8523_v42 = vand.u32 4294901760, %v307_v9  ;;  %v328_v9 = vsub.f32 %v8460_v41, %v8498_v32  ;;  %v8555_v32 = vand.u32 4294901760, %v38_v33  ;;  %v8562_v50 = vand.u32 4294901760, %v321_v26 }
  0x1f   :  { %114 = vmatprep.subr.mxu0 %v11531_v55  ;;  %289 = vmatprep.subr.mxu1 %v11531_v55  ;;  %11536 = vst [vmem:[#allocation51_spill] sm:$0xff] %v8516_v37  ;;  %11538 = vst [vmem:[#allocation53_spill] sm:$0xff] %v8528_v53  ;;  %v8573_v46 = vsub.f32 %v40_v3, %v8516_v37  ;;  %v8579_v26 = vand.u32 4294901760, %v64_v58  ;;  %v354_v53 = vsub.f32 %v8512_v38, %v8547_v0  ;;  %v36_v3 = vld [vmem:[%s11273_s0 + $0x90] sm:$0xff] }
  0x20   :  { %116 = vmatpush1.msra.mxu0 %v8402_v61  ;;  %295 = vmatpush1.msra.mxu1 %v8482_v63  ;;  %11537 = vst [vmem:[#allocation52_spill] sm:$0xff] %v8523_v42  ;;  %11539 = vst [vmem:[#allocation54_spill] sm:$0xff] %v8534_v13  ;;  %v8540_v63 = vand.u32 4294901760, %v39_v1  ;;  %v8586_v40 = vand.u32 4294901760, %v8550_v36  ;;  %v361_v27 = vsub.f32 %v8534_v13, %v8567_v49 }
  0x21   :  { %117 = vmatprep.subr.mxu0 %v11531_v55  ;;  %296 = vmatprep.subr.mxu1 %v11531_v55  ;;  %11540 = vst [vmem:[#allocation55_spill] sm:$0xff] %v8544_v8  ;;  %11541 = vst [vmem:[#allocation56_spill] sm:$0xff] %v8547_v0  ;;  %v8602_v0 = vand.u32 4294901760, %v335_v59  ;;  %v8613_v23 = vsub.f32 %v38_v33, %v8555_v32  ;;  %v8620_v59 = vsub.f32 %v64_v58, %v8579_v26 }
  0x22   :  { %119 = vmatpush1.msra.mxu0 %v8421_v7  ;;  %302 = vmatpush1.msra.mxu1 %v8502_v31  ;;  %11542 = vst [vmem:[#allocation57_spill] sm:$0xff] %v8550_v36  ;;  %11543 = vst [vmem:[#allocation58_spill] sm:$0xff] %v8555_v32  ;;  %v46_v31 = vld [vmem:[%s11275_s2] sm:$0xff]  ;;  %v8592_v29 = vsub.f32 %v39_v1, %v8540_v63  ;;  %v8607_v1 = vand.u32 4294901760, %v8573_v46  ;;  %v368_v22 = vsub.f32 %v8550_v36, %v8586_v40 }
  0x23   :  { %120 = vmatprep.subr.mxu0 %v11531_v55  ;;  %303 = vmatprep.subr.mxu1 %v11531_v55  ;;  %11544 = vst [vmem:[#allocation59_spill] sm:$0xff] %v8562_v50  ;;  %11545 = vst [vmem:[#allocation60_spill] sm:$0xff] %v8567_v49  ;;  %v8624_v49 = vand.u32 4294901760, %v354_v53  ;;  %v8639_v58 = vand.u32 4294901760, %v35_v24 }
  0x24   :  { %122 = vmatpush1.msra.mxu0 %v8437_v19  ;;  %309 = vmatpush1.msra.mxu1 %v8523_v42  ;;  %11546 = vst [vmem:[#allocation61_spill] sm:$0xff] %v8573_v46  ;;  %v8577_v42 = vand.u32 4294901760, %v328_v9  ;;  %11548 = vst [vmem:[#allocation63_spill] sm:$0xff] %v8586_v40  ;;  %v8594_v9 = vand.u32 4294901760, %v46_v31  ;;  %v8629_v33 = vand.u32 4294901760, %v8592_v29  ;;  %v375_v40 = vsub.f32 %v8573_v46, %v8607_v1 }
  0x25   :  { %135 = vmatprep.subr.mxu0 %v11531_v55  ;;  %310 = vmatprep.subr.mxu1 %v11531_v55  ;;  %11549 = vst [vmem:[#allocation64_spill] sm:$0xff] %v8592_v29  ;;  %11551 = vst [vmem:[#allocation66_spill] sm:$0xff] %v8602_v0 }
  0x26   :  { %11547 = vst [vmem:[#allocation62_spill] sm:$0xff] %v8577_v42  ;;  %137 = vmatpush2.msra.mxu0 %v8468_v51  ;;  %316 = vmatpush1.msra.mxu1 %v8544_v8  ;;  %v8598_v8 = vand.u32 4294901760, %v37_v52  ;;  %11552 = vst [vmem:[#allocation67_spill] sm:$0xff] %v8607_v1  ;;  %v8635_v51 = vsub.f32 %v46_v31, %v8594_v9  ;;  %v8651_v31 = vand.u32 4294901760, %v8613_v23  ;;  %v11567_v1 = vand.u32 4294901760, %v8620_v59 }
  0x27   :  { %138 = vmatprep.subr.mxu0 %v11531_v55  ;;  %317 = vmatprep.subr.mxu1 %v11531_v55  ;;  %11553 = vst [vmem:[#allocation68_spill] sm:$0xff] %v8613_v23  ;;  %11555 = vst [vmem:[#allocation70_spill] sm:$0xff] %v8624_v49 }
  0x28   :  { %11550 = vst [vmem:[#allocation65_spill] sm:$0xff] %v8598_v8  ;;  %140 = vmatpush2.msra.mxu0 %v8475_v56  ;;  %323 = vmatpush1.msra.mxu1 %v8562_v50  ;;  %v8617_v50 = vand.u32 4294901760, %v36_v3  ;;  %11556 = vst [vmem:[#allocation71_spill] sm:$0xff] %v8629_v33  ;;  %v34_v56 = vld [vmem:[%s11273_s0 + $0x80] sm:$0xff]  ;;  %v8642_v53 = vsub.f32 %v37_v52, %v8598_v8 }
  0x29   :  { %141 = vmatprep.subr.mxu0 %v11531_v55  ;;  %324 = vmatprep.subr.mxu1 %v11531_v55  ;;  %11557 = vst [vmem:[#allocation72_spill] sm:$0xff] %v8639_v58  ;;  %11560 = vst [vmem:[#allocation75_spill] sm:$0xff] %v8651_v31 }
  0x2a   :  { %11554 = vst [vmem:[#allocation69_spill] sm:$0xff] %v8617_v50  ;;  %143 = vmatpush2.msra.mxu0 %v8506_v44  ;;  %330 = vmatpush1.msra.mxu1 %v8577_v42  ;;  %11558 = vst [vmem:[#allocation73_spill] sm:$0xff] %v8642_v53  ;;  %v8646_v42 = vand.u32 4294901760, %v361_v27  ;;  %v8655_v44 = vand.u32 4294901760, %v34_v56  ;;  %v8663_v27 = vand.u32 4294901760, %v368_v22  ;;  %v8671_v52 = vand.u32 4294901760, %v8642_v53 }
  0x2b   :  { %144 = vmatprep.subr.mxu0 %v11531_v55  ;;  %331 = vmatprep.subr.mxu1 %v11531_v55  ;;  %v8678_v22 = vand.u32 4294901760, %v375_v40 }
  0x2c   :  { %146 = vmatpush2.msra.mxu0 %v8516_v37  ;;  %337 = vmatpush1.msra.mxu1 %v8602_v0  ;;  %11559 = vst [vmem:[#allocation74_spill] sm:$0xff] %v8646_v42  ;;  %11561 = vst [vmem:[#allocation76_spill] sm:$0xff] %v8655_v44  ;;  %v8659_v37 = vsub.f32 %v36_v3, %v8617_v50  ;;  %v382_v0 = vsub.f32 %v8592_v29, %v8629_v33 }
  0x2d   :  { %147 = vmatprep.subr.mxu0 %v11531_v55  ;;  %350 = vmatprep.subr.mxu1 %v11531_v55  ;;  %11563 = vst [vmem:[#allocation78_spill] sm:$0xff] %v8663_v27  ;;  %11564 = vst [vmem:[#allocation79_spill] sm:$0xff] %v8671_v52  ;;  %v8674_v3 = vsub.f32 %v35_v24, %v8639_v58  ;;  %v168_v33 = vsub.f32 %v8620_v59, %v11567_v1 }
  0x2e   :  { %11562 = vst [vmem:[#allocation77_spill] sm:$0xff] %v8659_v37  ;;  %149 = vmatpush2.msra.mxu0 %v8540_v63  ;;  %356 = vmatpush2.msra.mxu1 %v8624_v49  ;;  %11566 = vst [vmem:[#allocation81_spill] sm:$0xff] %v8678_v22  ;;  %v389_v49 = vsub.f32 %v8613_v23, %v8651_v31  ;;  %v8688_v24 = vand.u32 4294901760, %v8659_v37  ;;  %v8695_v40 = vand.u32 4294901760, %v382_v0 }
  0x2f   :  { %150 = vmatprep.subr.mxu0 %v11531_v55  ;;  %357 = vmatprep.subr.mxu1 %v11531_v55  ;;  %11565 = vst [vmem:[#allocation80_spill] sm:$0xff] %v8674_v3  ;;  %v396_v1 = vsub.f32 %v8642_v53, %v8671_v52 }
  0x30   :  { %152 = vmatpush2.msra.mxu0 %v8555_v32  ;;  %363 = vmatpush2.msra.mxu1 %v8646_v42  ;;  %11568 = vst [vmem:[#allocation82_spill] sm:$0xff] %v8688_v24  ;;  %v8691_v32 = vsub.f32 %v34_v56, %v8655_v44  ;;  %11570 = vst [vmem:[#allocation84_spill] sm:$0xff] %v8695_v40  ;;  %v11571_v42 = vand.u32 4294901760, %v8635_v51  ;;  %v8705_v56 = vand.u32 4294901760, %v8674_v3  ;;  %v8709_v0 = vand.u32 4294901760, %v389_v49 }
  0x31   :  { %153 = vmatprep.subr.mxu0 %v11531_v55  ;;  %364 = vmatprep.subr.mxu1 %v11531_v55  ;;  %v8722_v49 = vand.u32 4294901760, %v396_v1 }
  0x32   :  { %11569 = vst [vmem:[#allocation83_spill] sm:$0xff] %v8691_v32  ;;  %155 = vmatpush2.msra.mxu0 %v8598_v8  ;;  %370 = vmatpush2.msra.mxu1 %v8663_v27  ;;  %v174_v31 = vsub.f32 %v8635_v51, %v11571_v42  ;;  %11572 = vst [vmem:[#allocation85_spill] sm:$0xff] %v8705_v56  ;;  %v169_v42 = vand.u32 4294901760, %v168_v33  ;;  %v403_v27 = vsub.f32 %v8659_v37, %v8688_v24 }
  0x33   :  { %156 = vmatprep.subr.mxu0 %v11531_v55  ;;  %371 = vmatprep.subr.mxu1 %v11531_v55  ;;  %11573 = vst [vmem:[#allocation86_spill] sm:$0xff] %v8709_v0  ;;  %v8716_v8 = vand.u32 4294901760, %v8691_v32  ;;  %11575 = vst [vmem:[#allocation88_spill] sm:$0xff] %v8722_v49  ;;  %v410_v33 = vsub.f32 %v8674_v3, %v8705_v56 }
  0x34   :  { %158 = vmatpush2.msra.mxu0 %v8617_v50  ;;  %377 = vmatpush2.msra.mxu1 %v8678_v22  ;;  %v175_v52 = vand.u32 4294901760, %v174_v31  ;;  %v8729_v22 = vand.u32 4294901760, %v403_v27 }
  0x35   :  { %159 = vmatprep.subr.mxu0 %v11531_v55  ;;  %378 = vmatprep.subr.mxu1 %v11531_v55  ;;  %11574 = vst [vmem:[#allocation87_spill] sm:$0xff] %v8716_v8  ;;  %v417_v31 = vsub.f32 %v8691_v32, %v8716_v8  ;;  %v8736_v1 = vand.u32 4294901760, %v410_v33  ;;  %v48_v33 = vld [vmem:[%s11275_s2 + $0x10] sm:$0xff] }
  0x36   :  { %161 = vmatpush2.msra.mxu0 %v8639_v58  ;;  %384 = vmatpush2.msra.mxu1 %v8695_v40  ;;  %11576 = vst [vmem:[#allocation89_spill] sm:$0xff] %v8729_v22 }
  0x37   :  { %162 = vmatprep.subr.mxu0 %v11531_v55  ;;  %385 = vmatprep.subr.mxu1 %v11531_v55  ;;  %11577 = vst [vmem:[#allocation90_spill] sm:$0xff] %v8736_v1  ;;  %v8742_v27 = vand.u32 4294901760, %v417_v31  ;;  %v51_v31 = vld [vmem:[%s11275_s2 + $0x28] sm:$0xff] }
  0x38   :  { %164 = vmatpush2.msra.mxu0 %v8655_v44  ;;  %391 = vmatpush2.msra.mxu1 %v8709_v0 }
  0x39   :  { %170 = vmatprep.mubr.f32.mxu0 %v169_v42  ;;  %392 = vmatprep.subr.mxu1 %v11531_v55  ;;  %11578 = vst [vmem:[#allocation91_spill] sm:$0xff] %v8742_v27 }
  0x3a   :  { %449 = vmatprep.subr.mxu0 %v11531_v55  ;;  %176 = vmatmul.mubr.f32.vlgmr.msra.gmra.mxu0 %v175_v52  ;;  %v49_v52 = vld [vmem:[%s11275_s2 + $0x18] sm:$0xff] }
  0x3b   :  { %398 = vmatpush2.msra.mxu1 %v8722_v49  ;;  %452 = vmatpush1.msra.mxu0 %v8265_v15  ;;  %v67_v42 = vsel %vm62_vm0, %v49_v52, 0 }
  0x3c   :  { %399 = vmatprep.subr.mxu1 %v11531_v55  ;;  %453 = vmatprep.subr.mxu0 %v11531_v55  ;;  %v8788_v52 = vand.u32 4294901760, %v67_v42 }
  0x3d   :  { %405 = vmatpush2.msra.mxu1 %v8729_v22  ;;  %456 = vmatpush1.msra.mxu0 %v8268_v16 }
  0x3e   :  { %406 = vmatprep.subr.mxu1 %v11531_v55  ;;  %457 = vmatprep.subr.mxu0 %v11531_v55 }
  0x3f   :  { %412 = vmatpush2.msra.mxu1 %v8736_v1  ;;  %460 = vmatpush1.msra.mxu0 %v8273_v18 }
  0x40   :  { %413 = vmatprep.subr.mxu1 %v11531_v55  ;;  %461 = vmatprep.subr.mxu0 %v11531_v55 }
  0x41   :  { %419 = vmatpush2.msra.mxu1 %v8742_v27  ;;  %421 = vmatprep.mubr.f32.mxu1 %v8579_v26 }
  0x42   :  { %464 = vmatpush1.msra.mxu0 %v8280_v20  ;;  %423 = vmatmul.mubr.f32.vlgmr.msra.gmra.mxu1 %v8594_v9  ;;  %v52_v20 = vld [vmem:[%s11275_s2 + $0x30] sm:$0x3] }
  0x43   :  { %465 = vmatprep.subr.mxu0 %v11531_v55  ;;  %602 = vmatprep.subr.mxu1 %v11531_v55 }
  0x44   :  { %468 = vmatpush1.msra.mxu0 %v8283_v21  ;;  %604 = vmatpush1.msra.mxu1 %v8235_v4 }
  0x45   :  { %469 = vmatprep.subr.mxu0 %v11531_v55  ;;  %605 = vmatprep.subr.mxu1 %v11531_v55 }
  0x46   :  { %472 = vmatpush1.msra.mxu0 %v8310_v30  ;;  %607 = vmatpush1.msra.mxu1 %v8237_v5 }
  0x47   :  { %473 = vmatprep.subr.mxu0 %v11531_v55  ;;  %608 = vmatprep.subr.mxu1 %v11531_v55 }
  0x48   :  { %476 = vmatpush1.msra.mxu0 %v8320_v34  ;;  %610 = vmatpush1.msra.mxu1 %v8239_v6  ;;  %v8805_v34 = vsub.f32 %v67_v42, %v8788_v52 }
  0x49   :  { %477 = vmatprep.subr.mxu0 %v11531_v55  ;;  %611 = vmatprep.subr.mxu1 %v11531_v55 }
  0x4a   :  { %480 = vmatpush1.msra.mxu0 %v8345_v43  ;;  %613 = vmatpush1.msra.mxu1 %v8251_v10  ;;  %v70_v43 = vsel %vm62_vm0, %v51_v31, 0 }
  0x4b   :  { %481 = vmatprep.subr.mxu0 %v11531_v55  ;;  %614 = vmatprep.subr.mxu1 %v11531_v55  ;;  %v8815_v30 = vand.u32 4294901760, %v70_v43 }
  0x4c   :  { %484 = vmatpush1.msra.mxu0 %v8357_v47  ;;  %616 = vmatpush1.msra.mxu1 %v8253_v11  ;;  %v8792_v47 = vand.u32 4294901760, %v48_v33 }
  0x4d   :  { %485 = vmatprep.subr.mxu0 %v11531_v55  ;;  %617 = vmatprep.subr.mxu1 %v11531_v55  ;;  %v8831_v21 = vsub.f32 %v70_v43, %v8815_v30  ;;  %v11579_v43 = vand.u32 4294901760, %v8805_v34 }
  0x4e   :  { %488 = vmatpush1.msra.mxu0 %v8379_v54  ;;  %619 = vmatpush1.msra.mxu1 %v8255_v12  ;;  %v50_v54 = vld [vmem:[%s11275_s2 + $0x20] sm:$0xff]  ;;  %v8813_v31 = vsub.f32 %v48_v33, %v8792_v47 }
  0x4f   :  { %489 = vmatprep.subr.mxu0 %v11531_v55  ;;  %620 = vmatprep.subr.mxu1 %v11531_v55 }
  0x50   :  { %492 = vmatpush1.msra.mxu0 %v8398_v60  ;;  %622 = vmatpush1.msra.mxu1 %v8270_v17  ;;  %v53_v60 = vld [vmem:[%s11275_s2 + $0x38] sm:$0x3] }
  0x51   :  { %493 = vmatprep.subr.mxu0 %v11531_v55  ;;  %623 = vmatprep.subr.mxu1 %v11531_v55  ;;  %v73_v42 = vsel %vm62_vm0, %v53_v60, 0 }
  0x52   :  { %496 = vmatpush1.msra.mxu0 %v8417_v2  ;;  %625 = vmatpush1.msra.mxu1 %v8295_v25  ;;  %v8819_v2 = vand.u32 4294901760, %v50_v54  ;;  %v8841_v33 = vand.u32 4294901760, %v73_v42 }
  0x53   :  { %497 = vmatprep.subr.mxu0 %v11531_v55  ;;  %626 = vmatprep.subr.mxu1 %v11531_v55 }
  0x54   :  { %500 = vmatpush1.msra.mxu0 %v8433_v14  ;;  %628 = vmatpush1.msra.mxu1 %v8304_v28  ;;  %v8839_v60 = vsub.f32 %v50_v54, %v8819_v2  ;;  %v183_v14 = vsub.f32 %v8805_v34, %v11579_v43  ;;  %v11580_v54 = vand.u32 4294901760, %v8813_v31  ;;  %v8862_v43 = vsub.f32 %v73_v42, %v8841_v33 }
  0x55   :  { %501 = vmatprep.subr.mxu0 %v11531_v55  ;;  %629 = vmatprep.subr.mxu1 %v11531_v55  ;;  %v11581_v42 = vand.u32 4294901760, %v8831_v21 }
  0x56   :  { %504 = vmatpush1.msra.mxu0 %v8455_v39  ;;  %631 = vmatpush1.msra.mxu1 %v8323_v35  ;;  %v189_v39 = vsub.f32 %v8813_v31, %v11580_v54  ;;  %v184_v54 = vand.u32 4294901760, %v183_v14 }
  0x57   :  { %505 = vmatprep.subr.mxu0 %v11531_v55  ;;  %632 = vmatprep.subr.mxu1 %v11531_v55 }
  0x58   :  { %508 = vmatpush1.msra.mxu0 %v8460_v41  ;;  %634 = vmatpush1.msra.mxu1 %v8351_v45  ;;  %v8850_v41 = vand.u32 4294901760, %v52_v20 }
  0x59   :  { %509 = vmatprep.subr.mxu0 %v11531_v55  ;;  %635 = vmatprep.subr.mxu1 %v11531_v55 }
  0x5a   :  { %512 = vmatpush1.msra.mxu0 %v8493_v62  ;;  %637 = vmatpush1.msra.mxu1 %v8361_v48  ;;  %v8869_v27 = vsub.f32 %v52_v20, %v8850_v41  ;;  %v190_v62 = vand.u32 4294901760, %v189_v39  ;;  %v11412_v20 = vand.u32 4294901760, %v8862_v43 }
  0x5b   :  { %525 = vmatprep.subr.mxu0 %v11531_v55  ;;  %638 = vmatprep.subr.mxu1 %v11531_v55 }
  0x5c   :  { %528 = vmatpush2.msra.mxu0 %v8512_v38  ;;  %640 = vmatpush1.msra.mxu1 %v8389_v57  ;;  %v198_v38 = vsub.f32 %v8831_v21, %v11581_v42  ;;  %v11415_v39 = vand.u32 4294901760, %v8869_v27 }
  0x5d   :  { %529 = vmatprep.subr.mxu0 %v11531_v55  ;;  %641 = vmatprep.subr.mxu1 %v11531_v55 }
  0x5e   :  { %532 = vmatpush2.msra.mxu0 %v8534_v13  ;;  %643 = vmatpush1.msra.mxu1 %v8402_v61  ;;  %v11582_v13 = vand.u32 4294901760, %v8839_v60  ;;  %v199_v42 = vand.u32 4294901760, %v198_v38  ;;  %v219_v38 = vsub.f32 %v8869_v27, %v11415_v39  ;;  %v11592_v39 = vand.u32 4294901760, %v8620_v59 }
  0x5f   :  { %533 = vmatprep.subr.mxu0 %v11531_v55  ;;  %644 = vmatprep.subr.mxu1 %v11531_v55 }
  0x60   :  { %536 = vmatpush2.msra.mxu0 %v8550_v36  ;;  %646 = vmatpush1.msra.mxu1 %v8421_v7  ;;  %v204_v14 = vsub.f32 %v8839_v60, %v11582_v13  ;;  %v213_v36 = vsub.f32 %v8862_v43, %v11412_v20  ;;  %v11585_v20 = vld [vmem:[#allocation49_spill] sm:$0xff] }
  0x61   :  { %537 = vmatprep.subr.mxu0 %v11531_v55  ;;  %647 = vmatprep.subr.mxu1 %v11531_v55 }
  0x62   :  { %185 = vmatprep.mubr.f32.mxu0 %v184_v54  ;;  %540 = vmatpush2.msra.mxu0 %v8573_v46  ;;  %v205_v13 = vand.u32 4294901760, %v204_v14  ;;  %v11583_v54 = vld [vmem:[#allocation41_spill] sm:$0xff]  ;;  %v214_v14 = vand.u32 4294901760, %v213_v36  ;;  %v11586_v36 = vld [vmem:[#allocation51_spill] sm:$0xff] }
  0x63   :  { %649 = vmatpush1.msra.mxu1 %v8437_v19  ;;  %191 = vmatmul.mubr.f32.gmra.mxu0 %v190_v62  ;;  %v11584_v62 = vld [vmem:[#allocation43_spill] sm:$0xff] }
  0x64   :  { %541 = vmatprep.subr.mxu0 %v11531_v55  ;;  %662 = vmatprep.subr.mxu1 %v11531_v55 }
  0x65   :  { %544 = vmatpush2.msra.mxu0 %v8592_v29  ;;  %664 = vmatpush2.msra.mxu1 %v11583_v54  ;;  %v220_v29 = vand.u32 4294901760, %v219_v38  ;;  %v11590_v38 = vld [vmem:[#allocation11_spill] sm:$0xff] }
  0x66   :  { %545 = vmatprep.subr.mxu0 %v11531_v55  ;;  %665 = vmatprep.subr.mxu1 %v11531_v55 }
  0x67   :  { %200 = vmatprep.mubr.f32.mxu0 %v199_v42  ;;  %548 = vmatpush2.msra.mxu0 %v8613_v23  ;;  %v11588_v42 = vld [vmem:[#allocation65_spill] sm:$0xff] }
  0x68   :  { %667 = vmatpush2.msra.mxu1 %v11584_v62  ;;  %206 = vmatmul.mubr.f32.gmra.mxu0 %v205_v13  ;;  %v11589_v13 = vld [vmem:[#allocation10_spill] sm:$0xff] }
  0x69   :  { %549 = vmatprep.subr.mxu0 %v11531_v55  ;;  %668 = vmatprep.subr.mxu1 %v11531_v55 }
  0x6a   :  { %552 = vmatpush2.msra.mxu0 %v8642_v53  ;;  %670 = vmatpush2.msra.mxu1 %v11585_v20 }
  0x6b   :  { %428 = vmatprep.mubr.f32.mxu1 %v8788_v52  ;;  %553 = vmatprep.subr.mxu0 %v11531_v55 }
  0x6c   :  { %671 = vmatprep.subr.mxu1 %v11531_v55  ;;  %215 = vmatprep.mubr.f32.mxu0 %v214_v14  ;;  %v11591_v14 = vld [vmem:[#allocation12_spill] sm:$0xff] }
  0x6d   :  { %430 = vmatmul.mubr.f32.gmra.mxu1 %v8792_v47  ;;  %556 = vmatpush2.msra.mxu0 %v8659_v37 }
  0x6e   :  { %673 = vmatpush2.msra.mxu1 %v11586_v36  ;;  %221 = vmatmul.mubr.f32.gmra.mxu0 %v220_v29  ;;  %v11587_v29 = vld [vmem:[#allocation58_spill] sm:$0xff] }
  0x6f   :  { %557 = vmatprep.subr.mxu0 %v11531_v55  ;;  %674 = vmatprep.subr.mxu1 %v11531_v55 }
  0x70   :  { %560 = vmatpush2.msra.mxu0 %v8674_v3  ;;  %676 = vmatpush2.msra.mxu1 %v8540_v63 }
  0x71   :  { %435 = vmatprep.mubr.f32.mxu1 %v8815_v30  ;;  %561 = vmatprep.subr.mxu0 %v11531_v55 }
  0x72   :  { %677 = vmatprep.subr.mxu1 %v11531_v55  ;;  %437 = vmatmul.mubr.f32.gmra.mxu1 %v8819_v2 }
  0x73   :  { %564 = vmatpush2.msra.mxu0 %v8691_v32  ;;  %567 = vmatprep.mubr.f32.mxu0 %v8620_v59  ;;  %v11596_v59 = vand.u32 4294901760, %v8805_v34 }
  0x74   :  { %679 = vmatpush2.msra.mxu1 %v11587_v29  ;;  %570 = vmatmul.mubr.f32.vlgmr.msra.gmra.mxu0 %v8635_v51 }
  0x75   :  { %680 = vmatprep.subr.mxu1 %v11531_v55  ;;  %737 = vmatprep.subr.mxu0 %v11531_v55 }
  0x76   :  { %682 = vmatpush2.msra.mxu1 %v11588_v42  ;;  %741 = vmatpush1.msra.mxu0 %v11589_v13  ;;  %v11594_v13 = vand.u32 4294901760, %v8635_v51  ;;  %v11598_v51 = vand.u32 4294901760, %v8813_v31 }
  0x77   :  { %442 = vmatprep.mubr.f32.mxu1 %v8841_v33  ;;  %683 = vmatprep.subr.mxu1 %v11531_v55 }
  0x78   :  { %742 = vmatprep.subr.mxu0 %v11531_v55  ;;  %444 = vmatmul.mubr.f32.gmra.mxu1 %v8850_v41 }
  0x79   :  { %576 = vmatprep.mubr.f32.mxu0 %v8805_v34  ;;  %685 = vmatpush2.msra.mxu1 %v8617_v50  ;;  %v11600_v34 = vand.u32 4294901760, %v8831_v21 }
  0x7a   :  { %746 = vmatpush1.msra.mxu0 %v11590_v38  ;;  %686 = vmatprep.subr.mxu1 %v11531_v55  ;;  %v11593_v38 = vld [vmem:[#allocation13_spill] sm:$0xff] }
  0x7b   :  { %579 = vmatmul.mubr.f32.gmra.mxu0 %v8813_v31  ;;  %747 = vmatprep.subr.mxu0 %v11531_v55  ;;  %v11602_v31 = vand.u32 4294901760, %v8839_v60 }
  0x7c   :  { %688 = vmatpush2.msra.mxu1 %v8639_v58  ;;  %751 = vmatpush1.msra.mxu0 %v11591_v14  ;;  %v11595_v14 = vld [vmem:[#allocation14_spill] sm:$0xff] }
  0x7d   :  { %689 = vmatprep.subr.mxu1 %v11531_v55  ;;  %752 = vmatprep.subr.mxu0 %v11531_v55 }
  0x7e   :  { %585 = vmatprep.mubr.f32.mxu0 %v8831_v21  ;;  %691 = vmatpush2.msra.mxu1 %v8655_v44  ;;  %v11604_v21 = vand.u32 4294901760, %v8862_v43 }
  0x7f   :  { %695 = vmatprep.mubr.f32.mxu1 %v11592_v39  ;;  %756 = vmatpush1.msra.mxu0 %v11593_v38  ;;  %v11597_v39 = vld [vmem:[#allocation19_spill] sm:$0xff] }
  0x80   :  { %588 = vmatmul.mubr.f32.gmra.mxu0 %v8839_v60  ;;  %699 = vmatmul.mubr.f32.vlgmr.msra.gmra.mxu1 %v11594_v13  ;;  %v11599_v13 = vld [vmem:[#allocation22_spill] sm:$0xff]  ;;  %v11606_v60 = vand.u32 4294901760, %v8869_v27 }
  0x81   :  { %757 = vmatprep.subr.mxu0 %v11531_v55  ;;  %908 = vmatprep.subr.mxu1 %v11531_v55 }
  0x82   :  { %761 = vmatpush1.msra.mxu0 %v11595_v14  ;;  %910 = vmatpush1.msra.mxu1 %v8235_v4 }
  0x83   :  { %762 = vmatprep.subr.mxu0 %v11531_v55  ;;  %911 = vmatprep.subr.mxu1 %v11531_v55 }
  0x84   :  { %594 = vmatprep.mubr.f32.mxu0 %v8862_v43  ;;  %706 = vmatprep.mubr.f32.mxu1 %v11596_v59  ;;  %v11601_v59 = vld [vmem:[#allocation25_spill] sm:$0xff] }
  0x85   :  { %766 = vmatpush1.msra.mxu0 %v11597_v39  ;;  %913 = vmatpush1.msra.mxu1 %v8237_v5  ;;  %v11608_v43 = vld [vmem:[#allocation37_spill] sm:$0xff] }
  0x86   :  { %597 = vmatmul.mubr.f32.gmra.mxu0 %v8869_v27  ;;  %710 = vmatmul.mubr.f32.gmra.mxu1 %v11598_v51  ;;  %v11603_v51 = vld [vmem:[#allocation28_spill] sm:$0xff]  ;;  %v11609_v27 = vld [vmem:[#allocation42_spill] sm:$0xff] }
  0x87   :  { %767 = vmatprep.subr.mxu0 %v11531_v55  ;;  %914 = vmatprep.subr.mxu1 %v11531_v55 }
  0x88   :  { %771 = vmatpush1.msra.mxu0 %v11599_v13  ;;  %916 = vmatpush1.msra.mxu1 %v8239_v6 }
  0x89   :  { %772 = vmatprep.subr.mxu0 %v11531_v55  ;;  %917 = vmatprep.subr.mxu1 %v11531_v55 }
  0x8a   :  { %717 = vmatprep.mubr.f32.mxu1 %v11600_v34  ;;  %776 = vmatpush1.msra.mxu0 %v11601_v59  ;;  %v11605_v34 = vld [vmem:[#allocation31_spill] sm:$0xff] }
  0x8b   :  { %919 = vmatpush1.msra.mxu1 %v8251_v10  ;;  %777 = vmatprep.subr.mxu0 %v11531_v55 }
  0x8c   :  { %721 = vmatmul.mubr.f32.gmra.mxu1 %v11602_v31  ;;  %920 = vmatprep.subr.mxu1 %v11531_v55  ;;  %v11607_v31 = vld [vmem:[#allocation34_spill] sm:$0xff] }
  0x8d   :  { %781 = vmatpush1.msra.mxu0 %v11603_v51  ;;  %922 = vmatpush1.msra.mxu1 %v8253_v11 }
  0x8e   :  { %782 = vmatprep.subr.mxu0 %v11531_v55  ;;  %923 = vmatprep.subr.mxu1 %v11531_v55 }
  0x8f   :  { %728 = vmatprep.mubr.f32.mxu1 %v11604_v21  ;;  %786 = vmatpush1.msra.mxu0 %v11605_v34  ;;  %v11610_v21 = vld [vmem:[#allocation45_spill] sm:$0xff] }
  0x90   :  { %925 = vmatpush1.msra.mxu1 %v8255_v12  ;;  %787 = vmatprep.subr.mxu0 %v11531_v55 }
  0x91   :  { %732 = vmatmul.mubr.f32.gmra.mxu1 %v11606_v60  ;;  %926 = vmatprep.subr.mxu1 %v11531_v55  ;;  %v11611_v60 = vld [vmem:[#allocation47_spill] sm:$0xff] }
  0x92   :  { %791 = vmatpush1.msra.mxu0 %v11607_v31  ;;  %928 = vmatpush1.msra.mxu1 %v8270_v17 }
  0x93   :  { %792 = vmatprep.subr.mxu0 %v11531_v55  ;;  %929 = vmatprep.subr.mxu1 %v11531_v55 }
  0x94   :  { %796 = vmatpush1.msra.mxu0 %v11608_v43  ;;  %931 = vmatpush1.msra.mxu1 %v8295_v25 }
  0x95   :  { %797 = vmatprep.subr.mxu0 %v11531_v55  ;;  %932 = vmatprep.subr.mxu1 %v11531_v55 }
  0x96   :  { %801 = vmatpush1.msra.mxu0 %v11609_v27  ;;  %934 = vmatpush1.msra.mxu1 %v8304_v28  ;;  %v11612_v27 = vld [vmem:[#allocation53_spill] sm:$0xff] }
  0x97   :  { %802 = vmatprep.subr.mxu0 %v11531_v55  ;;  %935 = vmatprep.subr.mxu1 %v11531_v55 }
  0x98   :  { %806 = vmatpush1.msra.mxu0 %v11610_v21  ;;  %937 = vmatpush1.msra.mxu1 %v8323_v35  ;;  %v11613_v21 = vld [vmem:[#allocation56_spill] sm:$0xff] }
  0x99   :  { %807 = vmatprep.subr.mxu0 %v11531_v55  ;;  %938 = vmatprep.subr.mxu1 %v11531_v55 }
  0x9a   :  { %811 = vmatpush1.msra.mxu0 %v11611_v60  ;;  %940 = vmatpush1.msra.mxu1 %v8351_v45  ;;  %v11614_v60 = vld [vmem:[#allocation60_spill] sm:$0xff] }
  0x9b   :  { %812 = vmatprep.subr.mxu0 %v11531_v55  ;;  %941 = vmatprep.subr.mxu1 %v11531_v55 }
  0x9c   :  { %816 = vmatpush1.msra.mxu0 %v11612_v27  ;;  %943 = vmatpush1.msra.mxu1 %v8361_v48  ;;  %v11615_v27 = vld [vmem:[#allocation63_spill] sm:$0xff] }
  0x9d   :  { %829 = vmatprep.subr.mxu0 %v11531_v55  ;;  %944 = vmatprep.subr.mxu1 %v11531_v55 }
  0x9e   :  { %833 = vmatpush2.msra.mxu0 %v11613_v21  ;;  %946 = vmatpush1.msra.mxu1 %v8389_v57  ;;  %v11616_v21 = vld [vmem:[#allocation67_spill] sm:$0xff] }
  0x9f   :  { %834 = vmatprep.subr.mxu0 %v11531_v55  ;;  %947 = vmatprep.subr.mxu1 %v11531_v55 }
  0xa0   :  { %838 = vmatpush2.msra.mxu0 %v11614_v60  ;;  %949 = vmatpush1.msra.mxu1 %v8402_v61  ;;  %v11617_v60 = vld [vmem:[#allocation71_spill] sm:$0xff] }
  0xa1   :  { %839 = vmatprep.subr.mxu0 %v11531_v55  ;;  %950 = vmatprep.subr.mxu1 %v11531_v55 }
  0xa2   :  { %843 = vmatpush2.msra.mxu0 %v11615_v27  ;;  %952 = vmatpush1.msra.mxu1 %v8421_v7  ;;  %v11618_v27 = vld [vmem:[#allocation75_spill] sm:$0xff] }
  0xa3   :  { %844 = vmatprep.subr.mxu0 %v11531_v55  ;;  %953 = vmatprep.subr.mxu1 %v11531_v55 }
  0xa4   :  { %848 = vmatpush2.msra.mxu0 %v11616_v21  ;;  %955 = vmatpush1.msra.mxu1 %v8437_v19  ;;  %v11619_v21 = vld [vmem:[#allocation79_spill] sm:$0xff] }
  0xa5   :  { %849 = vmatprep.subr.mxu0 %v11531_v55  ;;  %968 = vmatprep.subr.mxu1 %v11531_v55 }
  0xa6   :  { %853 = vmatpush2.msra.mxu0 %v11617_v60  ;;  %970 = vmatpush2.msra.mxu1 %v11583_v54 }
  0xa7   :  { %854 = vmatprep.subr.mxu0 %v11531_v55  ;;  %971 = vmatprep.subr.mxu1 %v11531_v55 }
  0xa8   :  { %858 = vmatpush2.msra.mxu0 %v11618_v27  ;;  %973 = vmatpush2.msra.mxu1 %v11584_v62 }
  0xa9   :  { %859 = vmatprep.subr.mxu0 %v11531_v55  ;;  %974 = vmatprep.subr.mxu1 %v11531_v55 }
  0xaa   :  { %863 = vmatpush2.msra.mxu0 %v11619_v21  ;;  %976 = vmatpush2.msra.mxu1 %v11585_v20 }
  0xab   :  { %864 = vmatprep.subr.mxu0 %v11531_v55  ;;  %977 = vmatprep.subr.mxu1 %v11531_v55 }
  0xac   :  { %868 = vmatpush2.msra.mxu0 %v8688_v24  ;;  %979 = vmatpush2.msra.mxu1 %v11586_v36 }
  0xad   :  { %869 = vmatprep.subr.mxu0 %v11531_v55  ;;  %980 = vmatprep.subr.mxu1 %v11531_v55 }
  0xae   :  { %873 = vmatpush2.msra.mxu0 %v8705_v56  ;;  %982 = vmatpush2.msra.mxu1 %v8540_v63 }
  0xaf   :  { %874 = vmatprep.subr.mxu0 %v11531_v55  ;;  %983 = vmatprep.subr.mxu1 %v11531_v55 }
  0xb0   :  { %878 = vmatpush2.msra.mxu0 %v8716_v8  ;;  %880 = vmatprep.mubr.f32.mxu0 %v8579_v26 }
  0xb1   :  { %985 = vmatpush2.msra.mxu1 %v11587_v29  ;;  %882 = vmatmul.mubr.f32.vlgmr.msra.gmra.mxu0 %v8594_v9 }
  0xb2   :  { %986 = vmatprep.subr.mxu1 %v11531_v55  ;;  %887 = vmatprep.mubr.f32.mxu0 %v8788_v52 }
  0xb3   :  { %988 = vmatpush2.msra.mxu1 %v11588_v42  ;;  %999 = vmatprep.mubr.f32.mxu1 %v8579_v26 }
  0xb4   :  { %989 = vmatprep.subr.mxu1 %v11531_v55 }
  0xb5   :  { %991 = vmatpush2.msra.mxu1 %v8617_v50  ;;  %889 = vmatmul.mubr.f32.gmra.mxu0 %v8792_v47 }
  0xb6   :  { %992 = vmatprep.subr.mxu1 %v11531_v55  ;;  %894 = vmatprep.mubr.f32.mxu0 %v8815_v30 }
  0xb7   :  { %994 = vmatpush2.msra.mxu1 %v8639_v58 }
  0xb8   :  { %995 = vmatprep.subr.mxu1 %v11531_v55 }
  0xb9   :  { %997 = vmatpush2.msra.mxu1 %v8655_v44  ;;  %896 = vmatmul.mubr.f32.gmra.mxu0 %v8819_v2 }
  0xba   :  { %1001 = vmatmul.mubr.f32.vlgmr.msra.gmra.mxu1 %v8594_v9  ;;  %901 = vmatprep.mubr.f32.mxu0 %v8841_v33 }
  0xbb   :  { %1006 = vmatprep.mubr.f32.mxu1 %v8788_v52  ;;  %v44_v52 = vld [vmem:[%s11274_s1] sm:$0xff] }
  0xbd   :  { %903 = vmatmul.mubr.f32.gmra.mxu0 %v8850_v41 }
  0xbe   :  { %1008 = vmatmul.mubr.f32.gmra.mxu1 %v8792_v47  ;;  %v1029_v47 = vsel %vm1027_vm1, %v44_v52, 0 }
  0xbf   :  { %1013 = vmatprep.mubr.f32.mxu1 %v8815_v30  ;;  %v9079_v21 = vand.u32 4294901760, %v1029_v47 }
  0xc1   :  { %v9082_v30 = vsub.f32 %v1029_v47, %v9079_v21 }
  0xc2   :  { %1015 = vmatmul.mubr.f32.gmra.mxu1 %v8819_v2 }
  0xc3   :  { %1020 = vmatprep.mubr.f32.mxu1 %v8841_v33  ;;  %v9086_v2 = vand.u32 4294901760, %v9082_v30 }
  0xc6   :  { %1022 = vmatmul.mubr.f32.gmra.mxu1 %v8850_v41 }
  0xc7   :  { %7827 = vmatprep.mubr.f32.mxu1 %v9079_v21 }
  0xfa   :  { %v177_v26 = vpop.f32.mrf.mxu0 }
  0xfc   :  { %v179_v8 = vpop.f32.mrf.mxu0 }
  0xfd   :  { %v1110_v8 = vsub.f32 %v9082_v30, %v9086_v2 }
  0xff   :  { %v9090_v41 = vand.u32 4294901760, %v1110_v8 }
 0x101   :  { %11620 = vst [vmem:[#allocation41_spill] sm:$0xff] %v9090_v41  ;;  %7816 = vmatprep.mubr.f32.mxu0 %v9090_v41 }
 0x102   :  { %v424_v56 = vpop.f32.mrf.mxu1 }
 0x103   :  { %v425_v9 = vadd.f32 %v424_v56, %v177_v26 }
 0x104   :  { %v426_v24 = vpop.f32.mrf.mxu1 }
 0x123   :  { %v192_v24 = vpop.f32.mrf.mxu0 }
 0x125   :  { %v194_v56 = vpop.f32.mrf.mxu0 }
 0x128   :  { %v207_v33 = vpop.f32.mrf.mxu0 }
 0x12a   :  { %v209_v26 = vpop.f32.mrf.mxu0 }
 0x12d   :  { %v431_v52 = vpop.f32.mrf.mxu1 }
 0x12e   :  { %v432_v27 = vadd.f32 %v431_v52, %v192_v24  ;;  %v222_v47 = vpop.f32.mrf.mxu0 }
 0x12f   :  { %v433_v60 = vpop.f32.mrf.mxu1 }
 0x130   :  { %v224_v43 = vpop.f32.mrf.mxu0 }
 0x132   :  { %v438_v31 = vpop.f32.mrf.mxu1 }
 0x133   :  { %v439_v34 = vadd.f32 %v438_v31, %v207_v33 }
 0x134   :  { %v571_v51 = vpop.f32.mrf.mxu0  ;;  %v440_v59 = vpop.f32.mrf.mxu1 }
 0x135   :  { %v572_v13 = vadd.f32 %v571_v51, %v425_v9 }
 0x136   :  { %v573_v39 = vpop.f32.mrf.mxu0 }
 0x138   :  { %v445_v14 = vpop.f32.mrf.mxu1 }
 0x139   :  { %v446_v8 = vadd.f32 %v445_v14, %v222_v47 }
 0x13a   :  { %v447_v38 = vpop.f32.mrf.mxu1 }
 0x13b   :  { %v580_v32 = vpop.f32.mrf.mxu0 }
 0x13c   :  { %v581_v41 = vadd.f32 %v580_v32, %v432_v27 }
 0x13d   :  { %v582_v3 = vpop.f32.mrf.mxu0 }
 0x140   :  { %v589_v56 = vpop.f32.mrf.mxu0  ;;  %v700_v37 = vpop.f32.mrf.mxu1 }
 0x141   :  { %v590_v26 = vadd.f32 %v589_v56, %v439_v34  ;;  %v701_v53 = vadd.f32 %v700_v37, %v572_v13  ;;  %v45_v37 = vld [vmem:[%s11274_s1 + $0x8] sm:$0xff] }
 0x142   :  { %v591_v24 = vpop.f32.mrf.mxu0  ;;  %v702_v52 = vpop.f32.mrf.mxu1  ;;  %v1032_v56 = vsel %vm1027_vm1, %v45_v37, 0 }
 0x146   :  { %v598_v60 = vpop.f32.mrf.mxu0  ;;  %v711_v43 = vpop.f32.mrf.mxu1 }
 0x147   :  { %v712_v23 = vadd.f32 %v711_v43, %v581_v41 }
 0x148   :  { %v713_v31 = vpop.f32.mrf.mxu1  ;;  %v600_v33 = vpop.f32.mrf.mxu0 }
 0x149   :  { %v599_v33 = vadd.f32 %v598_v60, %v446_v8 }
 0x14c   :  { %v722_v59 = vpop.f32.mrf.mxu1 }
 0x14d   :  { %v723_v24 = vadd.f32 %v722_v59, %v590_v26 }
 0x14e   :  { %v724_v51 = vpop.f32.mrf.mxu1 }
 0x151   :  { %v733_v39 = vpop.f32.mrf.mxu1 }
 0x152   :  { %v734_v18 = vadd.f32 %v733_v39, %v599_v33 }
 0x153   :  { %v735_v9 = vpop.f32.mrf.mxu1 }
 0x154   :  { %v9097_v9 = vand.u32 4294901760, %v1032_v56 }
 0x156   :  { %v9102_v37 = vsub.f32 %v1032_v56, %v9097_v9 }
 0x171   :  { %v883_v14 = vpop.f32.mrf.mxu0 }
 0x173   :  { %v885_v38 = vpop.f32.mrf.mxu0 }
 0x174   :  { %v884_v38 = vadd.f32 %v883_v14, %v701_v53 }
 0x175   :  { %v890_v47 = vpop.f32.mrf.mxu0 }
 0x176   :  { %v891_v43 = vadd.f32 %v890_v47, %v712_v23 }
 0x177   :  { %v892_v32 = vpop.f32.mrf.mxu0 }
 0x179   :  { %v897_v3 = vpop.f32.mrf.mxu0 }
 0x17a   :  { %v1002_v27 = vpop.f32.mrf.mxu1  ;;  %v898_v51 = vadd.f32 %v897_v3, %v723_v24 }
 0x17b   :  { %v899_v46 = vpop.f32.mrf.mxu0  ;;  %v1003_v16 = vadd.f32 %v1002_v27, %v884_v38 }
 0x17c   :  { %v1004_v13 = vpop.f32.mrf.mxu1 }
 0x17d   :  { %v904_v34 = vpop.f32.mrf.mxu0  ;;  %v9106_v60 = vand.u32 4294901760, %v1003_v16 }
 0x17e   :  { %v1009_v41 = vpop.f32.mrf.mxu1  ;;  %v905_v13 = vadd.f32 %v904_v34, %v734_v18 }
 0x17f   :  { %v906_v52 = vpop.f32.mrf.mxu0  ;;  %v1010_v32 = vadd.f32 %v1009_v41, %v891_v43  ;;  %v1174_v47 = vsub.f32 %v1003_v16, %v9106_v60 }
 0x180   :  { %v1011_v31 = vpop.f32.mrf.mxu1 }
 0x181   :  { %v9104_v26 = vand.u32 4294901760, %v1010_v32  ;;  %v1175_v24 = vand.u32 4294901760, %v1174_v47 }
 0x182   :  { %v1016_v46 = vpop.f32.mrf.mxu1 }
 0x183   :  { %v1017_v1 = vadd.f32 %v1016_v46, %v898_v51  ;;  %v1167_v18 = vsub.f32 %v1010_v32, %v9104_v26  ;;  %v1176_v51 = vsub.f32 %v1174_v47, %v1175_v24  ;;  %v11622_v46 = vld [vmem:[#allocation18_spill] sm:$0xff] }
 0x184   :  { %v1018_v22 = vpop.f32.mrf.mxu1 }
 0x185   :  { %v9099_v15 = vand.u32 4294901760, %v1017_v1  ;;  %v9111_v22 = vand.u32 4294901760, %v9102_v37  ;;  %v1168_v41 = vand.u32 4294901760, %v1167_v18  ;;  %v1177_v32 = vand.u32 4294901760, %v1176_v51  ;;  %v11637_v51 = vld [vmem:[#allocation70_spill] sm:$0xff] }
 0x186   :  { %v1023_v23 = vpop.f32.mrf.mxu1 }
 0x187   :  { %v1024_v8 = vadd.f32 %v1023_v23, %v905_v13  ;;  %v1160_v53 = vsub.f32 %v1017_v1, %v9099_v15  ;;  %v1120_v1 = vsub.f32 %v9102_v37, %v9111_v22  ;;  %v1169_v31 = vsub.f32 %v1167_v18, %v1168_v41  ;;  %v11623_v13 = vld [vmem:[#allocation21_spill] sm:$0xff]  ;;  %v11625_v23 = vld [vmem:[#allocation27_spill] sm:$0xff] }
 0x188   :  { %v1025_v59 = vpop.f32.mrf.mxu1 }
 0x189   :  { %v1036_v39 = vsel %vm1034_vm2, %v1024_v8, 0  ;;  %v1161_v27 = vand.u32 4294901760, %v1160_v53  ;;  %v9126_v52 = vand.u32 4294901760, %v1120_v1  ;;  %v1170_v38 = vand.u32 4294901760, %v1169_v31  ;;  %v11626_v8 = vld [vmem:[#allocation30_spill] sm:$0xff]  ;;  %v11629_v59 = vld [vmem:[#allocation40_spill] sm:$0xff] }
 0x18a   :  { %v9114_v14 = vand.u32 4294901760, %v1036_v39  ;;  %v11636_v31 = vld [vmem:[#allocation66_spill] sm:$0xff] }
 0x18b   :  { %v1162_v16 = vsub.f32 %v1160_v53, %v1161_v27 }
 0x18c   :  { %v1153_v3 = vsub.f32 %v1036_v39, %v9114_v14  ;;  %7808 = vmatprep.subr.mxu0 %v9114_v14  ;;  %v55_v39 = vld [vmem:[%s11276_s3 + $0x8] sm:$0xff] }
 0x18d   :  { %7809 = vmatpush3.msra.mxu0 %v9114_v14  ;;  %v1163_v33 = vand.u32 4294901760, %v1162_v16 }
 0x18e   :  { %7810 = vmatprep.subr.mxu0 %v9099_v15  ;;  %v1154_v34 = vand.u32 4294901760, %v1153_v3 }
 0x18f   :  { %7811 = vmatpush3.msra.mxu0 %v9099_v15 }
 0x190   :  { %7812 = vmatprep.subr.mxu0 %v9104_v26  ;;  %v1155_v56 = vsub.f32 %v1153_v3, %v1154_v34 }
 0x191   :  { %7813 = vmatpush3.msra.mxu0 %v9104_v26 }
 0x192   :  { %7814 = vmatprep.subr.mxu0 %v9106_v60  ;;  %v1156_v43 = vand.u32 4294901760, %v1155_v56  ;;  %v11634_v56 = vld [vmem:[#allocation59_spill] sm:$0xff] }
 0x193   :  { %7815 = vmatpush3.msra.mxu0 %v9106_v60 }
 0x194   :  { %7819 = vmatprep.subr.mxu1 %v1156_v43  ;;  %7830 = vmatprep.subr.mxu0 %v1153_v3 }
 0x195   :  { %7817 = vmatmul.mubr.f32.vlgmr.msra.gmra.mxu0 %v9126_v52  ;;  %7820 = vmatpush3.msra.mxu1 %v1156_v43 }
 0x196   :  { %7831 = vmatpush3.msra.mxu0 %v1153_v3  ;;  %7821 = vmatprep.subr.mxu1 %v1163_v33  ;;  %v54_v3 = vld [vmem:[%s11276_s3] sm:$0xff] }
 0x197   :  { %7832 = vmatprep.subr.mxu0 %v1160_v53  ;;  %7822 = vmatpush3.msra.mxu1 %v1163_v33 }
 0x198   :  { %7833 = vmatpush3.msra.mxu0 %v1160_v53  ;;  %7823 = vmatprep.subr.mxu1 %v1170_v38  ;;  %v11628_v53 = vld [vmem:[#allocation36_spill] sm:$0xff] }
 0x199   :  { %7834 = vmatprep.subr.mxu0 %v1167_v18  ;;  %7824 = vmatpush3.msra.mxu1 %v1170_v38 }
 0x19a   :  { %7835 = vmatpush3.msra.mxu0 %v1167_v18  ;;  %7825 = vmatprep.subr.mxu1 %v1177_v32  ;;  %v11630_v18 = vld [vmem:[#allocation44_spill] sm:$0xff] }
 0x19b   :  { %7836 = vmatprep.subr.mxu0 %v1174_v47  ;;  %7826 = vmatpush3.msra.mxu1 %v1177_v32  ;;  %v11638_v32 = vld [vmem:[#allocation74_spill] sm:$0xff] }
 0x19c   :  { %7837 = vmatpush3.msra.mxu0 %v1174_v47  ;;  %7828 = vmatmul.mubr.f32.vlgmr.msra.gmra.mxu1 %v9097_v9  ;;  %v1567_v47 = vsel %vm62_vm0, %v55_v39, 0 }
 0x19d   :  { %7838 = vmatprep.mubr.f32.mxu0 %v9082_v30  ;;  %7841 = vmatprep.subr.mxu1 %v9114_v14  ;;  %v9221_v1 = vand.u32 4294901760, %v1567_v47 }
 0x19e   :  { %7852 = vmatprep.subr.mxu0 %v1154_v34  ;;  %7839 = vmatmul.mubr.f32.vlgmr.msra.gmra.mxu0 %v9102_v37 }
 0x19f   :  { %7842 = vmatpush3.msra.mxu1 %v9114_v14  ;;  %7853 = vmatpush3.msra.mxu0 %v1154_v34  ;;  %v11633_v34 = vld [vmem:[#allocation55_spill] sm:$0xff]  ;;  %v9234_v16 = vsub.f32 %v1567_v47, %v9221_v1  ;;  %v11639_v47 = vld [vmem:[#allocation78_spill] sm:$0xff] }
 0x1a0   :  { %7843 = vmatprep.subr.mxu1 %v9099_v15  ;;  %7854 = vmatprep.subr.mxu0 %v1161_v27 }
 0x1a1   :  { %7844 = vmatpush3.msra.mxu1 %v9099_v15  ;;  %7855 = vmatpush3.msra.mxu0 %v1161_v27  ;;  %v11632_v27 = vld [vmem:[#allocation52_spill] sm:$0xff]  ;;  %v11446_v33 = vand.u32 4294901760, %v9234_v16 }
 0x1a2   :  { %7845 = vmatprep.subr.mxu1 %v9104_v26  ;;  %7856 = vmatprep.subr.mxu0 %v1168_v41 }
 0x1a3   :  { %7846 = vmatpush3.msra.mxu1 %v9104_v26  ;;  %7857 = vmatpush3.msra.mxu0 %v1168_v41  ;;  %v9225_v41 = vand.u32 4294901760, %v54_v3  ;;  %v1671_v39 = vsub.f32 %v9234_v16, %v11446_v33 }
 0x1a4   :  { %7847 = vmatprep.subr.mxu1 %v9106_v60  ;;  %7858 = vmatprep.subr.mxu0 %v1175_v24 }
 0x1a5   :  { %7848 = vmatpush3.msra.mxu1 %v9106_v60  ;;  %7849 = vmatprep.mubr.f32.mxu1 %v9086_v2  ;;  %v9239_v43 = vsub.f32 %v54_v3, %v9225_v41  ;;  %v1672_v33 = vand.u32 4294901760, %v1671_v39  ;;  %v11641_v39 = vld [vmem:[#allocation5_spill] sm:$0xff] }
 0x1a6   :  { %7859 = vmatpush3.msra.mxu0 %v1175_v24  ;;  %7850 = vmatmul.mubr.f32.vlgmr.msra.gmra.mxu1 %v9111_v22  ;;  %v11635_v24 = vld [vmem:[#allocation62_spill] sm:$0xff] }
 0x1a7   :  { %7860 = vmatprep.mubr.f32.mxu0 %v9079_v21  ;;  %7863 = vmatprep.subr.mxu1 %v9114_v14  ;;  %v11447_v38 = vand.u32 4294901760, %v9239_v43 }
 0x1a8   :  { %1578 = vmatprep.subr.mxu0 %v11531_v55  ;;  %7861 = vmatmul.mubr.f32.vlgmr.msra.gmra.mxu0 %v9097_v9 }
 0x1a9   :  { %7864 = vmatpush3.msra.mxu1 %v9114_v14  ;;  %1580 = vmatpush1.msra.mxu0 %v8235_v4  ;;  %v11631_v14 = vld [vmem:[#allocation48_spill] sm:$0xff]  ;;  %v1677_v3 = vsub.f32 %v9239_v43, %v11447_v38  ;;  %v11643_v38 = vld [vmem:[#allocation6_spill] sm:$0xff] }
 0x1aa   :  { %7865 = vmatprep.subr.mxu1 %v9099_v15  ;;  %1581 = vmatprep.subr.mxu0 %v11531_v55 }
 0x1ab   :  { %7866 = vmatpush3.msra.mxu1 %v9099_v15  ;;  %1583 = vmatpush1.msra.mxu0 %v8237_v5  ;;  %v11621_v15 = vld [vmem:[#allocation17_spill] sm:$0xff] }
 0x1ac   :  { %7867 = vmatprep.subr.mxu1 %v9104_v26  ;;  %1584 = vmatprep.subr.mxu0 %v11531_v55 }
 0x1ad   :  { %7868 = vmatpush3.msra.mxu1 %v9104_v26  ;;  %1586 = vmatpush1.msra.mxu0 %v8239_v6  ;;  %v11624_v26 = vld [vmem:[#allocation24_spill] sm:$0xff] }
 0x1ae   :  { %7869 = vmatprep.subr.mxu1 %v9106_v60  ;;  %1587 = vmatprep.subr.mxu0 %v11531_v55 }
 0x1af   :  { %7870 = vmatpush3.msra.mxu1 %v9106_v60  ;;  %7871 = vmatprep.mubr.f32.mxu1 %v9079_v21  ;;  %v11627_v60 = vld [vmem:[#allocation33_spill] sm:$0xff] }
 0x1b0   :  { %1589 = vmatpush1.msra.mxu0 %v8251_v10  ;;  %7872 = vmatmul.mubr.f32.vlgmr.msra.gmra.mxu1 %v9097_v9 }
 0x1b1   :  { %1590 = vmatprep.subr.mxu0 %v11531_v55  ;;  %1729 = vmatprep.subr.mxu1 %v11531_v55 }
 0x1b2   :  { %1592 = vmatpush1.msra.mxu0 %v8253_v11  ;;  %1735 = vmatpush1.msra.mxu1 %v11621_v15 }
 0x1b3   :  { %1593 = vmatprep.subr.mxu0 %v11531_v55  ;;  %1736 = vmatprep.subr.mxu1 %v11531_v55 }
 0x1b4   :  { %1595 = vmatpush1.msra.mxu0 %v8255_v12  ;;  %1742 = vmatpush1.msra.mxu1 %v11622_v46 }
 0x1b5   :  { %1596 = vmatprep.subr.mxu0 %v11531_v55  ;;  %1743 = vmatprep.subr.mxu1 %v11531_v55 }
 0x1b6   :  { %1598 = vmatpush1.msra.mxu0 %v8270_v17  ;;  %1749 = vmatpush1.msra.mxu1 %v11623_v13 }
 0x1b7   :  { %1599 = vmatprep.subr.mxu0 %v11531_v55  ;;  %1750 = vmatprep.subr.mxu1 %v11531_v55 }
 0x1b8   :  { %1601 = vmatpush1.msra.mxu0 %v8295_v25  ;;  %1756 = vmatpush1.msra.mxu1 %v11624_v26  ;;  %v11668_v26 = vld [vmem:[#allocation64_spill] sm:$0xff] }
 0x1b9   :  { %1602 = vmatprep.subr.mxu0 %v11531_v55  ;;  %1757 = vmatprep.subr.mxu1 %v11531_v55 }
 0x1ba   :  { %1604 = vmatpush1.msra.mxu0 %v8304_v28  ;;  %1763 = vmatpush1.msra.mxu1 %v11625_v23 }
 0x1bb   :  { %1605 = vmatprep.subr.mxu0 %v11531_v55  ;;  %1764 = vmatprep.subr.mxu1 %v11531_v55 }
 0x1bc   :  { %1607 = vmatpush1.msra.mxu0 %v8323_v35  ;;  %1770 = vmatpush1.msra.mxu1 %v11626_v8  ;;  %v11665_v8 = vld [vmem:[#allocation57_spill] sm:$0xff] }
 0x1bd   :  { %1608 = vmatprep.subr.mxu0 %v11531_v55  ;;  %1771 = vmatprep.subr.mxu1 %v11531_v55 }
 0x1be   :  { %1610 = vmatpush1.msra.mxu0 %v8351_v45  ;;  %1777 = vmatpush1.msra.mxu1 %v11627_v60  ;;  %v11663_v60 = vld [vmem:[#allocation54_spill] sm:$0xff] }
 0x1bf   :  { %1611 = vmatprep.subr.mxu0 %v11531_v55  ;;  %1778 = vmatprep.subr.mxu1 %v11531_v55 }
 0x1c0   :  { %1613 = vmatpush1.msra.mxu0 %v8361_v48  ;;  %1784 = vmatpush1.msra.mxu1 %v11628_v53  ;;  %v11662_v53 = vld [vmem:[#allocation50_spill] sm:$0xff] }
 0x1c1   :  { %1614 = vmatprep.subr.mxu0 %v11531_v55  ;;  %1785 = vmatprep.subr.mxu1 %v11531_v55 }
 0x1c2   :  { %1616 = vmatpush1.msra.mxu0 %v8389_v57  ;;  %1791 = vmatpush1.msra.mxu1 %v11629_v59 }
 0x1c3   :  { %1617 = vmatprep.subr.mxu0 %v11531_v55  ;;  %1792 = vmatprep.subr.mxu1 %v11531_v55 }
 0x1c4   :  { %1619 = vmatpush1.msra.mxu0 %v8402_v61  ;;  %1798 = vmatpush1.msra.mxu1 %v11630_v18 }
 0x1c5   :  { %1620 = vmatprep.subr.mxu0 %v11531_v55  ;;  %1799 = vmatprep.subr.mxu1 %v11531_v55 }
 0x1c6   :  { %1622 = vmatpush1.msra.mxu0 %v8421_v7  ;;  %1805 = vmatpush1.msra.mxu1 %v11631_v14 }
 0x1c7   :  { %1623 = vmatprep.subr.mxu0 %v11531_v55  ;;  %1806 = vmatprep.subr.mxu1 %v11531_v55 }
 0x1c8   :  { %1625 = vmatpush1.msra.mxu0 %v8437_v19  ;;  %1812 = vmatpush1.msra.mxu1 %v11632_v27  ;;  %v60_v27 = vld [vmem:[%s11276_s3 + $0x30] sm:$0x3] }
 0x1c9   :  { %1638 = vmatprep.subr.mxu0 %v11531_v55  ;;  %1813 = vmatprep.subr.mxu1 %v11531_v55 }
 0x1ca   :  { %1640 = vmatpush2.msra.mxu0 %v11583_v54  ;;  %1819 = vmatpush1.msra.mxu1 %v11633_v34 }
 0x1cb   :  { %1641 = vmatprep.subr.mxu0 %v11531_v55  ;;  %1820 = vmatprep.subr.mxu1 %v11531_v55 }
 0x1cc   :  { %1643 = vmatpush2.msra.mxu0 %v11584_v62  ;;  %1826 = vmatpush1.msra.mxu1 %v11634_v56  ;;  %v11657_v56 = vld [vmem:[#allocation38_spill] sm:$0xff] }
 0x1cd   :  { %1644 = vmatprep.subr.mxu0 %v11531_v55  ;;  %1827 = vmatprep.subr.mxu1 %v11531_v55 }
 0x1ce   :  { %1646 = vmatpush2.msra.mxu0 %v11585_v20  ;;  %1833 = vmatpush1.msra.mxu1 %v11635_v24  ;;  %v11656_v24 = vld [vmem:[#allocation35_spill] sm:$0xff] }
 0x1cf   :  { %1647 = vmatprep.subr.mxu0 %v11531_v55  ;;  %1834 = vmatprep.subr.mxu1 %v11531_v55 }
 0x1d0   :  { %1649 = vmatpush2.msra.mxu0 %v11586_v36  ;;  %1840 = vmatpush1.msra.mxu1 %v11636_v31 }
 0x1d1   :  { %1650 = vmatprep.subr.mxu0 %v11531_v55  ;;  %1853 = vmatprep.subr.mxu1 %v11531_v55 }
 0x1d2   :  { %1652 = vmatpush2.msra.mxu0 %v8540_v63  ;;  %1859 = vmatpush2.msra.mxu1 %v11637_v51 }
 0x1d3   :  { %1653 = vmatprep.subr.mxu0 %v11531_v55  ;;  %1860 = vmatprep.subr.mxu1 %v11531_v55 }
 0x1d4   :  { %1655 = vmatpush2.msra.mxu0 %v11587_v29  ;;  %1866 = vmatpush2.msra.mxu1 %v11638_v32  ;;  %v11640_v32 = vld [vmem:[#allocation81_spill] sm:$0xff] }
 0x1d5   :  { %1656 = vmatprep.subr.mxu0 %v11531_v55  ;;  %1867 = vmatprep.subr.mxu1 %v11531_v55 }
 0x1d6   :  { %1658 = vmatpush2.msra.mxu0 %v11588_v42  ;;  %1873 = vmatpush2.msra.mxu1 %v11639_v47  ;;  %v1678_v47 = vand.u32 4294901760, %v1677_v3  ;;  %v11642_v3 = vld [vmem:[#allocation89_spill] sm:$0xff] }
 0x1d7   :  { %1659 = vmatprep.subr.mxu0 %v11531_v55  ;;  %1874 = vmatprep.subr.mxu1 %v11531_v55 }
 0x1d8   :  { %1661 = vmatpush2.msra.mxu0 %v8617_v50  ;;  %1880 = vmatpush2.msra.mxu1 %v11640_v32  ;;  %v11655_v32 = vld [vmem:[#allocation32_spill] sm:$0xff] }
 0x1d9   :  { %1662 = vmatprep.subr.mxu0 %v11531_v55  ;;  %1881 = vmatprep.subr.mxu1 %v11531_v55 }
 0x1da   :  { %1664 = vmatpush2.msra.mxu0 %v8639_v58  ;;  %1887 = vmatpush2.msra.mxu1 %v8695_v40 }
 0x1db   :  { %1665 = vmatprep.subr.mxu0 %v11531_v55  ;;  %1888 = vmatprep.subr.mxu1 %v11531_v55 }
 0x1dc   :  { %1667 = vmatpush2.msra.mxu0 %v8655_v44  ;;  %1894 = vmatpush2.msra.mxu1 %v8709_v0  ;;  %v11645_v0 = vld [vmem:[#allocation7_spill] sm:$0xff] }
 0x1dd   :  { %1673 = vmatprep.mubr.f32.mxu0 %v1672_v33  ;;  %1895 = vmatprep.subr.mxu1 %v11531_v55  ;;  %v11644_v33 = vld [vmem:[#allocation90_spill] sm:$0xff] }
 0x1de   :  { %1952 = vmatprep.subr.mxu0 %v11531_v55  ;;  %1679 = vmatmul.mubr.f32.vlgmr.msra.gmra.mxu0 %v1678_v47  ;;  %v11646_v47 = vld [vmem:[#allocation91_spill] sm:$0xff] }
 0x1df   :  { %1901 = vmatpush2.msra.mxu1 %v8722_v49  ;;  %1955 = vmatpush1.msra.mxu0 %v11641_v39  ;;  %v11647_v39 = vld [vmem:[#allocation8_spill] sm:$0xff]  ;;  %v11654_v49 = vld [vmem:[#allocation29_spill] sm:$0xff] }
 0x1e0   :  { %1902 = vmatprep.subr.mxu1 %v11531_v55  ;;  %1956 = vmatprep.subr.mxu0 %v11531_v55 }
 0x1e1   :  { %1908 = vmatpush2.msra.mxu1 %v11642_v3  ;;  %1959 = vmatpush1.msra.mxu0 %v11643_v38  ;;  %v11648_v38 = vld [vmem:[#allocation9_spill] sm:$0xff]  ;;  %v11653_v3 = vld [vmem:[#allocation26_spill] sm:$0xff] }
 0x1e2   :  { %1909 = vmatprep.subr.mxu1 %v11531_v55  ;;  %1960 = vmatprep.subr.mxu0 %v11531_v55 }
 0x1e3   :  { %1915 = vmatpush2.msra.mxu1 %v11644_v33  ;;  %1963 = vmatpush1.msra.mxu0 %v11645_v0  ;;  %v11649_v0 = vld [vmem:[#allocation15_spill] sm:$0xff] }
 0x1e4   :  { %1916 = vmatprep.subr.mxu1 %v11531_v55  ;;  %1964 = vmatprep.subr.mxu0 %v11531_v55  ;;  %v56_v33 = vld [vmem:[%s11276_s3 + $0x10] sm:$0xff] }
 0x1e5   :  { %1922 = vmatpush2.msra.mxu1 %v11646_v47  ;;  %1924 = vmatprep.mubr.f32.mxu1 %v9221_v1  ;;  %v11651_v47 = vld [vmem:[#allocation20_spill] sm:$0xff] }
 0x1e6   :  { %1967 = vmatpush1.msra.mxu0 %v11647_v39  ;;  %1926 = vmatmul.mubr.f32.vlgmr.msra.gmra.mxu1 %v9225_v41  ;;  %v11650_v39 = vld [vmem:[#allocation16_spill] sm:$0xff] }
 0x1e7   :  { %1968 = vmatprep.subr.mxu0 %v11531_v55  ;;  %2105 = vmatprep.subr.mxu1 %v11531_v55 }
 0x1e8   :  { %1971 = vmatpush1.msra.mxu0 %v11648_v38  ;;  %2107 = vmatpush1.msra.mxu1 %v8235_v4  ;;  %v57_v38 = vld [vmem:[%s11276_s3 + $0x18] sm:$0xff] }
 0x1e9   :  { %1972 = vmatprep.subr.mxu0 %v11531_v55  ;;  %2108 = vmatprep.subr.mxu1 %v11531_v55 }
 0x1ea   :  { %1975 = vmatpush1.msra.mxu0 %v11649_v0  ;;  %2110 = vmatpush1.msra.mxu1 %v8237_v5  ;;  %v11652_v0 = vld [vmem:[#allocation23_spill] sm:$0xff] }
 0x1eb   :  { %1976 = vmatprep.subr.mxu0 %v11531_v55  ;;  %2111 = vmatprep.subr.mxu1 %v11531_v55 }
 0x1ec   :  { %1979 = vmatpush1.msra.mxu0 %v11650_v39  ;;  %2113 = vmatpush1.msra.mxu1 %v8239_v6  ;;  %v1570_v39 = vsel %vm62_vm0, %v57_v38, 0 }
 0x1ed   :  { %1980 = vmatprep.subr.mxu0 %v11531_v55  ;;  %2114 = vmatprep.subr.mxu1 %v11531_v55  ;;  %v9329_v38 = vand.u32 4294901760, %v1570_v39 }
 0x1ee   :  { %1983 = vmatpush1.msra.mxu0 %v11651_v47  ;;  %2116 = vmatpush1.msra.mxu1 %v8251_v10  ;;  %v59_v47 = vld [vmem:[%s11276_s3 + $0x28] sm:$0xff] }
 0x1ef   :  { %1984 = vmatprep.subr.mxu0 %v11531_v55  ;;  %2117 = vmatprep.subr.mxu1 %v11531_v55  ;;  %v1573_v40 = vsel %vm62_vm0, %v59_v47, 0  ;;  %v9346_v51 = vsub.f32 %v1570_v39, %v9329_v38 }
 0x1f0   :  { %1987 = vmatpush1.msra.mxu0 %v11652_v0  ;;  %2119 = vmatpush1.msra.mxu1 %v8253_v11  ;;  %v9333_v0 = vand.u32 4294901760, %v56_v33  ;;  %v9356_v31 = vand.u32 4294901760, %v1573_v40 }
 0x1f1   :  { %1988 = vmatprep.subr.mxu0 %v11531_v55  ;;  %2120 = vmatprep.subr.mxu1 %v11531_v55 }
 0x1f2   :  { %1991 = vmatpush1.msra.mxu0 %v11653_v3  ;;  %2122 = vmatpush1.msra.mxu1 %v8255_v12  ;;  %v58_v3 = vld [vmem:[%s11276_s3 + $0x20] sm:$0xff]  ;;  %v9354_v47 = vsub.f32 %v56_v33, %v9333_v0  ;;  %v9372_v34 = vsub.f32 %v1573_v40, %v9356_v31  ;;  %v11660_v40 = vand.u32 4294901760, %v9346_v51 }
 0x1f3   :  { %1992 = vmatprep.subr.mxu0 %v11531_v55  ;;  %2123 = vmatprep.subr.mxu1 %v11531_v55 }
 0x1f4   :  { %1995 = vmatpush1.msra.mxu0 %v11654_v49  ;;  %2125 = vmatpush1.msra.mxu1 %v8270_v17  ;;  %v61_v49 = vld [vmem:[%s11276_s3 + $0x38] sm:$0x3]  ;;  %v1686_v14 = vsub.f32 %v9346_v51, %v11660_v40 }
 0x1f5   :  { %1996 = vmatprep.subr.mxu0 %v11531_v55  ;;  %2126 = vmatprep.subr.mxu1 %v11531_v55  ;;  %v1576_v39 = vsel %vm62_vm0, %v61_v49, 0  ;;  %v11658_v49 = vld [vmem:[#allocation39_spill] sm:$0xff] }
 0x1f6   :  { %1999 = vmatpush1.msra.mxu0 %v11655_v32  ;;  %2128 = vmatpush1.msra.mxu1 %v8295_v25  ;;  %v9360_v32 = vand.u32 4294901760, %v58_v3  ;;  %v9382_v33 = vand.u32 4294901760, %v1576_v39 }
 0x1f7   :  { %2000 = vmatprep.subr.mxu0 %v11531_v55  ;;  %2129 = vmatprep.subr.mxu1 %v11531_v55 }
 0x1f8   :  { %2003 = vmatpush1.msra.mxu0 %v11656_v24  ;;  %2131 = vmatpush1.msra.mxu1 %v8304_v28  ;;  %v11659_v24 = vld [vmem:[#allocation46_spill] sm:$0xff]  ;;  %v9403_v40 = vsub.f32 %v1576_v39, %v9382_v33  ;;  %v11664_v39 = vand.u32 4294901760, %v9372_v34 }
 0x1f9   :  { %2004 = vmatprep.subr.mxu0 %v11531_v55  ;;  %2132 = vmatprep.subr.mxu1 %v11531_v55 }
 0x1fa   :  { %2007 = vmatpush1.msra.mxu0 %v11657_v56  ;;  %2134 = vmatpush1.msra.mxu1 %v8323_v35  ;;  %v9380_v56 = vsub.f32 %v58_v3, %v9360_v32  ;;  %v11661_v3 = vand.u32 4294901760, %v9354_v47 }
 0x1fb   :  { %2008 = vmatprep.subr.mxu0 %v11531_v55  ;;  %2135 = vmatprep.subr.mxu1 %v11531_v55 }
 0x1fc   :  { %2011 = vmatpush1.msra.mxu0 %v11658_v49  ;;  %2137 = vmatpush1.msra.mxu1 %v8351_v45  ;;  %v9391_v49 = vand.u32 4294901760, %v60_v27  ;;  %v1692_v18 = vsub.f32 %v9354_v47, %v11661_v3  ;;  %v1687_v3 = vand.u32 4294901760, %v1686_v14 }
 0x1fd   :  { %2012 = vmatprep.subr.mxu0 %v11531_v55  ;;  %2138 = vmatprep.subr.mxu1 %v11531_v55 }
 0x1fe   :  { %2015 = vmatpush1.msra.mxu0 %v11659_v24  ;;  %2140 = vmatpush1.msra.mxu1 %v8361_v48  ;;  %v9410_v59 = vsub.f32 %v60_v27, %v9391_v49  ;;  %v1693_v24 = vand.u32 4294901760, %v1692_v18  ;;  %v11454_v27 = vand.u32 4294901760, %v9403_v40  ;;  %v11667_v18 = vld [vmem:[#allocation61_spill] sm:$0xff] }
 0x1ff   :  { %2028 = vmatprep.subr.mxu0 %v11531_v55  ;;  %2141 = vmatprep.subr.mxu1 %v11531_v55 }
 0x200   :  { %2031 = vmatpush2.msra.mxu0 %v11662_v53  ;;  %2143 = vmatpush1.msra.mxu1 %v8389_v57  ;;  %v1701_v53 = vsub.f32 %v9372_v34, %v11664_v39  ;;  %v11455_v23 = vand.u32 4294901760, %v9410_v59 }
 0x201   :  { %2032 = vmatprep.subr.mxu0 %v11531_v55  ;;  %2144 = vmatprep.subr.mxu1 %v11531_v55 }
 0x202   :  { %2035 = vmatpush2.msra.mxu0 %v11663_v60  ;;  %2146 = vmatpush1.msra.mxu1 %v8402_v61  ;;  %v11666_v60 = vand.u32 4294901760, %v9380_v56  ;;  %v1702_v39 = vand.u32 4294901760, %v1701_v53  ;;  %v1722_v53 = vsub.f32 %v9410_v59, %v11455_v23  ;;  %v11677_v23 = vand.u32 4294901760, %v9234_v16 }
 0x203   :  { %2036 = vmatprep.subr.mxu0 %v11531_v55  ;;  %2147 = vmatprep.subr.mxu1 %v11531_v55 }
 0x204   :  { %2039 = vmatpush2.msra.mxu0 %v11665_v8  ;;  %2149 = vmatpush1.msra.mxu1 %v8421_v7  ;;  %v1707_v14 = vsub.f32 %v9380_v56, %v11666_v60  ;;  %v1716_v8 = vsub.f32 %v9403_v40, %v11454_v27  ;;  %v1723_v27 = vand.u32 4294901760, %v1722_v53  ;;  %v11675_v53 = vld [vmem:[#allocation11_spill] sm:$0xff] }
 0x205   :  { %2040 = vmatprep.subr.mxu0 %v11531_v55  ;;  %2150 = vmatprep.subr.mxu1 %v11531_v55 }
 0x206   :  { %1688 = vmatprep.mubr.f32.mxu0 %v1687_v3  ;;  %2043 = vmatpush2.msra.mxu0 %v11667_v18  ;;  %v1708_v60 = vand.u32 4294901760, %v1707_v14  ;;  %v1717_v3 = vand.u32 4294901760, %v1716_v8  ;;  %v11670_v14 = vld [vmem:[#allocation73_spill] sm:$0xff]  ;;  %v11672_v8 = vld [vmem:[#allocation80_spill] sm:$0xff] }
 0x207   :  { %2152 = vmatpush1.msra.mxu1 %v8437_v19  ;;  %1694 = vmatmul.mubr.f32.gmra.mxu0 %v1693_v24  ;;  %v11669_v24 = vld [vmem:[#allocation68_spill] sm:$0xff] }
 0x208   :  { %2044 = vmatprep.subr.mxu0 %v11531_v55  ;;  %2165 = vmatprep.subr.mxu1 %v11531_v55 }
 0x209   :  { %2047 = vmatpush2.msra.mxu0 %v11668_v26  ;;  %2167 = vmatpush2.msra.mxu1 %v11583_v54 }
 0x20a   :  { %2048 = vmatprep.subr.mxu0 %v11531_v55  ;;  %2168 = vmatprep.subr.mxu1 %v11531_v55 }
 0x20b   :  { %1703 = vmatprep.mubr.f32.mxu0 %v1702_v39  ;;  %2051 = vmatpush2.msra.mxu0 %v11669_v24  ;;  %v11671_v39 = vld [vmem:[#allocation77_spill] sm:$0xff] }
 0x20c   :  { %2170 = vmatpush2.msra.mxu1 %v11584_v62  ;;  %1709 = vmatmul.mubr.f32.gmra.mxu0 %v1708_v60  ;;  %v11673_v60 = vld [vmem:[#allocation83_spill] sm:$0xff] }
 0x20d   :  { %2052 = vmatprep.subr.mxu0 %v11531_v55  ;;  %2171 = vmatprep.subr.mxu1 %v11531_v55 }
 0x20e   :  { %2055 = vmatpush2.msra.mxu0 %v11670_v14  ;;  %2173 = vmatpush2.msra.mxu1 %v11585_v20 }
 0x20f   :  { %1931 = vmatprep.mubr.f32.mxu1 %v9329_v38  ;;  %2056 = vmatprep.subr.mxu0 %v11531_v55 }
 0x210   :  { %2174 = vmatprep.subr.mxu1 %v11531_v55  ;;  %1718 = vmatprep.mubr.f32.mxu0 %v1717_v3  ;;  %v11676_v3 = vld [vmem:[#allocation12_spill] sm:$0xff] }
 0x211   :  { %1933 = vmatmul.mubr.f32.gmra.mxu1 %v9333_v0  ;;  %2059 = vmatpush2.msra.mxu0 %v11671_v39 }
 0x212   :  { %2176 = vmatpush2.msra.mxu1 %v11586_v36  ;;  %1724 = vmatmul.mubr.f32.gmra.mxu0 %v1723_v27  ;;  %v11674_v27 = vld [vmem:[#allocation10_spill] sm:$0xff] }
 0x213   :  { %2060 = vmatprep.subr.mxu0 %v11531_v55  ;;  %2177 = vmatprep.subr.mxu1 %v11531_v55 }
 0x214   :  { %2063 = vmatpush2.msra.mxu0 %v11672_v8  ;;  %2179 = vmatpush2.msra.mxu1 %v8540_v63 }
 0x215   :  { %1938 = vmatprep.mubr.f32.mxu1 %v9356_v31  ;;  %2064 = vmatprep.subr.mxu0 %v11531_v55 }
 0x216   :  { %2180 = vmatprep.subr.mxu1 %v11531_v55  ;;  %1940 = vmatmul.mubr.f32.gmra.mxu1 %v9360_v32 }
 0x217   :  { %2067 = vmatpush2.msra.mxu0 %v11673_v60  ;;  %2070 = vmatprep.mubr.f32.mxu0 %v9234_v16  ;;  %v11682_v16 = vld [vmem:[#allocation19_spill] sm:$0xff] }
 0x218   :  { %2182 = vmatpush2.msra.mxu1 %v11587_v29  ;;  %2073 = vmatmul.mubr.f32.vlgmr.msra.gmra.mxu0 %v9239_v43 }
 0x219   :  { %2183 = vmatprep.subr.mxu1 %v11531_v55  ;;  %2240 = vmatprep.subr.mxu0 %v11531_v55 }
 0x21a   :  { %2185 = vmatpush2.msra.mxu1 %v11588_v42  ;;  %2244 = vmatpush1.msra.mxu0 %v11674_v27  ;;  %v11679_v27 = vand.u32 4294901760, %v9239_v43  ;;  %v11683_v43 = vand.u32 4294901760, %v9354_v47 }
 0x21b   :  { %1945 = vmatprep.mubr.f32.mxu1 %v9382_v33  ;;  %2186 = vmatprep.subr.mxu1 %v11531_v55 }
 0x21c   :  { %2245 = vmatprep.subr.mxu0 %v11531_v55  ;;  %1947 = vmatmul.mubr.f32.gmra.mxu1 %v9391_v49 }
 0x21d   :  { %2079 = vmatprep.mubr.f32.mxu0 %v9346_v51  ;;  %2188 = vmatpush2.msra.mxu1 %v8617_v50 }
 0x21e   :  { %2249 = vmatpush1.msra.mxu0 %v11675_v53  ;;  %2189 = vmatprep.subr.mxu1 %v11531_v55  ;;  %v11678_v53 = vld [vmem:[#allocation13_spill] sm:$0xff] }
 0x21f   :  { %2082 = vmatmul.mubr.f32.gmra.mxu0 %v9354_v47  ;;  %2250 = vmatprep.subr.mxu0 %v11531_v55  ;;  %v11687_v47 = vand.u32 4294901760, %v9380_v56 }
 0x220   :  { %2191 = vmatpush2.msra.mxu1 %v8639_v58  ;;  %2254 = vmatpush1.msra.mxu0 %v11676_v3  ;;  %v11680_v3 = vld [vmem:[#allocation14_spill] sm:$0xff] }
 0x221   :  { %2192 = vmatprep.subr.mxu1 %v11531_v55  ;;  %2255 = vmatprep.subr.mxu0 %v11531_v55 }
 0x222   :  { %2088 = vmatprep.mubr.f32.mxu0 %v9372_v34  ;;  %2194 = vmatpush2.msra.mxu1 %v8655_v44 }
 0x223   :  { %2198 = vmatprep.mubr.f32.mxu1 %v11677_v23  ;;  %2259 = vmatpush1.msra.mxu0 %v11678_v53  ;;  %v11681_v23 = vand.u32 4294901760, %v9346_v51  ;;  %v11685_v51 = vand.u32 4294901760, %v9372_v34  ;;  %v11689_v34 = vand.u32 4294901760, %v9403_v40 }
 0x224   :  { %2091 = vmatmul.mubr.f32.gmra.mxu0 %v9380_v56  ;;  %2202 = vmatmul.mubr.f32.vlgmr.msra.gmra.mxu1 %v11679_v27  ;;  %v11684_v27 = vld [vmem:[#allocation22_spill] sm:$0xff]  ;;  %v11691_v56 = vand.u32 4294901760, %v9410_v59 }
 0x225   :  { %2260 = vmatprep.subr.mxu0 %v11531_v55  ;;  %2411 = vmatprep.subr.mxu1 %v11531_v55 }
 0x226   :  { %2264 = vmatpush1.msra.mxu0 %v11680_v3  ;;  %2413 = vmatpush1.msra.mxu1 %v8235_v4 }
 0x227   :  { %2265 = vmatprep.subr.mxu0 %v11531_v55  ;;  %2414 = vmatprep.subr.mxu1 %v11531_v55 }
 0x228   :  { %2097 = vmatprep.mubr.f32.mxu0 %v9403_v40  ;;  %2209 = vmatprep.mubr.f32.mxu1 %v11681_v23  ;;  %v11686_v23 = vld [vmem:[#allocation25_spill] sm:$0xff] }
 0x229   :  { %2269 = vmatpush1.msra.mxu0 %v11682_v16  ;;  %2416 = vmatpush1.msra.mxu1 %v8237_v5  ;;  %v11693_v40 = vld [vmem:[#allocation37_spill] sm:$0xff] }
 0x22a   :  { %2100 = vmatmul.mubr.f32.gmra.mxu0 %v9410_v59  ;;  %2213 = vmatmul.mubr.f32.gmra.mxu1 %v11683_v43  ;;  %v11688_v43 = vld [vmem:[#allocation28_spill] sm:$0xff]  ;;  %v11694_v59 = vld [vmem:[#allocation42_spill] sm:$0xff] }
 0x22b   :  { %2270 = vmatprep.subr.mxu0 %v11531_v55  ;;  %2417 = vmatprep.subr.mxu1 %v11531_v55 }
 0x22c   :  { %2274 = vmatpush1.msra.mxu0 %v11684_v27  ;;  %2419 = vmatpush1.msra.mxu1 %v8239_v6 }
 0x22d   :  { %2275 = vmatprep.subr.mxu0 %v11531_v55  ;;  %2420 = vmatprep.subr.mxu1 %v11531_v55 }
 0x22e   :  { %2220 = vmatprep.mubr.f32.mxu1 %v11685_v51  ;;  %2279 = vmatpush1.msra.mxu0 %v11686_v23  ;;  %v11690_v51 = vld [vmem:[#allocation31_spill] sm:$0xff] }
 0x22f   :  { %2422 = vmatpush1.msra.mxu1 %v8251_v10  ;;  %2280 = vmatprep.subr.mxu0 %v11531_v55 }
 0x230   :  { %2224 = vmatmul.mubr.f32.gmra.mxu1 %v11687_v47  ;;  %2423 = vmatprep.subr.mxu1 %v11531_v55  ;;  %v11692_v47 = vld [vmem:[#allocation34_spill] sm:$0xff] }
 0x231   :  { %2284 = vmatpush1.msra.mxu0 %v11688_v43  ;;  %2425 = vmatpush1.msra.mxu1 %v8253_v11 }
 0x232   :  { %2285 = vmatprep.subr.mxu0 %v11531_v55  ;;  %2426 = vmatprep.subr.mxu1 %v11531_v55 }
 0x233   :  { %2231 = vmatprep.mubr.f32.mxu1 %v11689_v34  ;;  %2289 = vmatpush1.msra.mxu0 %v11690_v51  ;;  %v11695_v34 = vld [vmem:[#allocation45_spill] sm:$0xff] }
 0x234   :  { %2428 = vmatpush1.msra.mxu1 %v8255_v12  ;;  %2290 = vmatprep.subr.mxu0 %v11531_v55 }
 0x235   :  { %2235 = vmatmul.mubr.f32.gmra.mxu1 %v11691_v56  ;;  %2429 = vmatprep.subr.mxu1 %v11531_v55  ;;  %v11696_v56 = vld [vmem:[#allocation47_spill] sm:$0xff] }
 0x236   :  { %2294 = vmatpush1.msra.mxu0 %v11692_v47  ;;  %2431 = vmatpush1.msra.mxu1 %v8270_v17 }
 0x237   :  { %2295 = vmatprep.subr.mxu0 %v11531_v55  ;;  %2432 = vmatprep.subr.mxu1 %v11531_v55 }
 0x238   :  { %2299 = vmatpush1.msra.mxu0 %v11693_v40  ;;  %2434 = vmatpush1.msra.mxu1 %v8295_v25 }
 0x239   :  { %2300 = vmatprep.subr.mxu0 %v11531_v55  ;;  %2435 = vmatprep.subr.mxu1 %v11531_v55 }
 0x23a   :  { %2304 = vmatpush1.msra.mxu0 %v11694_v59  ;;  %2437 = vmatpush1.msra.mxu1 %v8304_v28  ;;  %v11697_v59 = vld [vmem:[#allocation53_spill] sm:$0xff] }
 0x23b   :  { %2305 = vmatprep.subr.mxu0 %v11531_v55  ;;  %2438 = vmatprep.subr.mxu1 %v11531_v55 }
 0x23c   :  { %2309 = vmatpush1.msra.mxu0 %v11695_v34  ;;  %2440 = vmatpush1.msra.mxu1 %v8323_v35  ;;  %v11698_v34 = vld [vmem:[#allocation56_spill] sm:$0xff] }
 0x23d   :  { %2310 = vmatprep.subr.mxu0 %v11531_v55  ;;  %2441 = vmatprep.subr.mxu1 %v11531_v55 }
 0x23e   :  { %2314 = vmatpush1.msra.mxu0 %v11696_v56  ;;  %2443 = vmatpush1.msra.mxu1 %v8351_v45  ;;  %v11699_v56 = vld [vmem:[#allocation60_spill] sm:$0xff] }
 0x23f   :  { %2315 = vmatprep.subr.mxu0 %v11531_v55  ;;  %2444 = vmatprep.subr.mxu1 %v11531_v55 }
 0x240   :  { %2319 = vmatpush1.msra.mxu0 %v11697_v59  ;;  %2446 = vmatpush1.msra.mxu1 %v8361_v48  ;;  %v11700_v59 = vld [vmem:[#allocation63_spill] sm:$0xff] }
 0x241   :  { %2332 = vmatprep.subr.mxu0 %v11531_v55  ;;  %2447 = vmatprep.subr.mxu1 %v11531_v55 }
 0x242   :  { %2336 = vmatpush2.msra.mxu0 %v11698_v34  ;;  %2449 = vmatpush1.msra.mxu1 %v8389_v57  ;;  %v11701_v34 = vld [vmem:[#allocation67_spill] sm:$0xff] }
 0x243   :  { %2337 = vmatprep.subr.mxu0 %v11531_v55  ;;  %2450 = vmatprep.subr.mxu1 %v11531_v55 }
 0x244   :  { %2341 = vmatpush2.msra.mxu0 %v11699_v56  ;;  %2452 = vmatpush1.msra.mxu1 %v8402_v61  ;;  %v11702_v56 = vld [vmem:[#allocation71_spill] sm:$0xff] }
 0x245   :  { %2342 = vmatprep.subr.mxu0 %v11531_v55  ;;  %2453 = vmatprep.subr.mxu1 %v11531_v55 }
 0x246   :  { %2346 = vmatpush2.msra.mxu0 %v11700_v59  ;;  %2455 = vmatpush1.msra.mxu1 %v8421_v7  ;;  %v11703_v59 = vld [vmem:[#allocation75_spill] sm:$0xff] }
 0x247   :  { %2347 = vmatprep.subr.mxu0 %v11531_v55  ;;  %2456 = vmatprep.subr.mxu1 %v11531_v55 }
 0x248   :  { %2351 = vmatpush2.msra.mxu0 %v11701_v34  ;;  %2458 = vmatpush1.msra.mxu1 %v8437_v19  ;;  %v11704_v34 = vld [vmem:[#allocation79_spill] sm:$0xff] }
 0x249   :  { %2352 = vmatprep.subr.mxu0 %v11531_v55  ;;  %2471 = vmatprep.subr.mxu1 %v11531_v55 }
 0x24a   :  { %2356 = vmatpush2.msra.mxu0 %v11702_v56  ;;  %2473 = vmatpush2.msra.mxu1 %v11583_v54  ;;  %v11705_v56 = vld [vmem:[#allocation82_spill] sm:$0xff] }
 0x24b   :  { %2357 = vmatprep.subr.mxu0 %v11531_v55  ;;  %2474 = vmatprep.subr.mxu1 %v11531_v55 }
 0x24c   :  { %2361 = vmatpush2.msra.mxu0 %v11703_v59  ;;  %2476 = vmatpush2.msra.mxu1 %v11584_v62  ;;  %v11706_v59 = vld [vmem:[#allocation85_spill] sm:$0xff] }
 0x24d   :  { %2362 = vmatprep.subr.mxu0 %v11531_v55  ;;  %2477 = vmatprep.subr.mxu1 %v11531_v55 }
 0x24e   :  { %2366 = vmatpush2.msra.mxu0 %v11704_v34  ;;  %2479 = vmatpush2.msra.mxu1 %v11585_v20  ;;  %v11707_v34 = vld [vmem:[#allocation87_spill] sm:$0xff] }
 0x24f   :  { %2367 = vmatprep.subr.mxu0 %v11531_v55  ;;  %2480 = vmatprep.subr.mxu1 %v11531_v55 }
 0x250   :  { %2371 = vmatpush2.msra.mxu0 %v11705_v56  ;;  %2482 = vmatpush2.msra.mxu1 %v11586_v36 }
 0x251   :  { %2372 = vmatprep.subr.mxu0 %v11531_v55  ;;  %2483 = vmatprep.subr.mxu1 %v11531_v55 }
 0x252   :  { %2376 = vmatpush2.msra.mxu0 %v11706_v59  ;;  %2485 = vmatpush2.msra.mxu1 %v8540_v63 }
 0x253   :  { %2377 = vmatprep.subr.mxu0 %v11531_v55  ;;  %2486 = vmatprep.subr.mxu1 %v11531_v55 }
 0x254   :  { %2381 = vmatpush2.msra.mxu0 %v11707_v34  ;;  %2383 = vmatprep.mubr.f32.mxu0 %v9221_v1 }
 0x255   :  { %2488 = vmatpush2.msra.mxu1 %v11587_v29  ;;  %2385 = vmatmul.mubr.f32.vlgmr.msra.gmra.mxu0 %v9225_v41  ;;  %v7818_v56 = vpop.f32.mrf.mxu0 }
 0x256   :  { %2489 = vmatprep.subr.mxu1 %v11531_v55  ;;  %2390 = vmatprep.mubr.f32.mxu0 %v9329_v38 }
 0x257   :  { %2491 = vmatpush2.msra.mxu1 %v11588_v42  ;;  %2502 = vmatprep.mubr.f32.mxu1 %v9221_v1  ;;  %v9603_v34 = vpop.f32.mrf.mxu0 }
 0x258   :  { %2492 = vmatprep.subr.mxu1 %v11531_v55  ;;  %11708 = vst [vmem:[#allocation43_spill] sm:$0xff] %v9603_v34  ;;  %v11709_v34 = vld [vmem:[#allocation41_spill] sm:$0xff] }
 0x259   :  { %2494 = vmatpush2.msra.mxu1 %v8617_v50  ;;  %2392 = vmatmul.mubr.f32.gmra.mxu0 %v9333_v0 }
 0x25a   :  { %2495 = vmatprep.subr.mxu1 %v11531_v55  ;;  %2397 = vmatprep.mubr.f32.mxu0 %v9356_v31 }
 0x25b   :  { %2497 = vmatpush2.msra.mxu1 %v8639_v58 }
 0x25c   :  { %2498 = vmatprep.subr.mxu1 %v11531_v55  ;;  %v7829_v59 = vpop.f32.mrf.mxu1 }
 0x25d   :  { %2500 = vmatpush2.msra.mxu1 %v8655_v44  ;;  %2399 = vmatmul.mubr.f32.gmra.mxu0 %v9360_v32  ;;  %v1221_v1 = vadd.f32 %v7829_v59, %v7818_v56 }
 0x25e   :  { %2504 = vmatmul.mubr.f32.vlgmr.msra.gmra.mxu1 %v9225_v41  ;;  %2404 = vmatprep.mubr.f32.mxu0 %v9382_v33  ;;  %v7840_v40 = vpop.f32.mrf.mxu0  ;;  %v9616_v51 = vpop.f32.mrf.mxu1 }
 0x25f   :  { %2509 = vmatprep.mubr.f32.mxu1 %v9329_v38  ;;  %v1308_v47 = vadd.f32 %v7840_v40, %v1221_v1  ;;  %11710 = vst [vmem:[#allocation49_spill] sm:$0xff] %v9616_v51 }
 0x260   :  { %v9619_v59 = vpop.f32.mrf.mxu0 }
 0x261   :  { %2406 = vmatmul.mubr.f32.gmra.mxu0 %v9391_v49  ;;  %11711 = vst [vmem:[#allocation51_spill] sm:$0xff] %v9619_v59 }
 0x262   :  { %2511 = vmatmul.mubr.f32.gmra.mxu1 %v9333_v0  ;;  %7882 = vmatprep.mubr.f32.mxu0 %v11709_v34 }
 0x263   :  { %2516 = vmatprep.mubr.f32.mxu1 %v9356_v31 }
 0x266   :  { %2518 = vmatmul.mubr.f32.gmra.mxu1 %v9360_v32  ;;  %v7851_v41 = vpop.f32.mrf.mxu1 }
 0x267   :  { %2523 = vmatprep.mubr.f32.mxu1 %v9382_v33  ;;  %v1393_v56 = vadd.f32 %v7851_v41, %v1308_v47 }
 0x268   :  { %v7862_v38 = vpop.f32.mrf.mxu0  ;;  %v9624_v0 = vpop.f32.mrf.mxu1 }
 0x269   :  { %v1482_v40 = vadd.f32 %v7862_v38, %v1393_v56  ;;  %11712 = vst [vmem:[#allocation58_spill] sm:$0xff] %v9624_v0 }
 0x26a   :  { %2525 = vmatmul.mubr.f32.gmra.mxu1 %v9391_v49  ;;  %v9628_v51 = vpop.f32.mrf.mxu0 }
 0x26b   :  { %7893 = vmatprep.mubr.f32.mxu1 %v9079_v21  ;;  %11714 = vst [vmem:[#allocation18_spill] sm:$0xff] %v9628_v51 }
 0x270   :  { %v7873_v1 = vpop.f32.mrf.mxu1 }
 0x271   :  { %v9626_v31 = vadd.f32 %v7873_v1, %v1482_v40 }
 0x272   :  { %v9630_v59 = vpop.f32.mrf.mxu1 }
 0x273   :  { %11713 = vst [vmem:[#allocation17_spill] sm:$0xff] %v9626_v31  ;;  %11715 = vst [vmem:[#allocation21_spill] sm:$0xff] %v9630_v59 }
 0x29e   :  { %v1680_v32 = vpop.f32.mrf.mxu0 }
 0x2a0   :  { %v1682_v34 = vpop.f32.mrf.mxu0 }
 0x2a6   :  { %v1927_v43 = vpop.f32.mrf.mxu1 }
 0x2a7   :  { %v1928_v33 = vadd.f32 %v1927_v43, %v1680_v32 }
 0x2a8   :  { %v1929_v47 = vpop.f32.mrf.mxu1 }
 0x2c7   :  { %v1695_v41 = vpop.f32.mrf.mxu0 }
 0x2c9   :  { %v1697_v56 = vpop.f32.mrf.mxu0 }
 0x2cc   :  { %v1710_v38 = vpop.f32.mrf.mxu0 }
 0x2ce   :  { %v1712_v49 = vpop.f32.mrf.mxu0 }
 0x2d1   :  { %v1934_v23 = vpop.f32.mrf.mxu1 }
 0x2d2   :  { %v1935_v27 = vadd.f32 %v1934_v23, %v1695_v41  ;;  %v1725_v16 = vpop.f32.mrf.mxu0 }
 0x2d3   :  { %v1936_v0 = vpop.f32.mrf.mxu1 }
 0x2d4   :  { %v1727_v3 = vpop.f32.mrf.mxu0 }
 0x2d6   :  { %v1941_v40 = vpop.f32.mrf.mxu1 }
 0x2d7   :  { %v1942_v1 = vadd.f32 %v1941_v40, %v1710_v38 }
 0x2d8   :  { %v2074_v31 = vpop.f32.mrf.mxu0  ;;  %v1943_v51 = vpop.f32.mrf.mxu1 }
 0x2d9   :  { %v2075_v53 = vadd.f32 %v2074_v31, %v1928_v33 }
 0x2da   :  { %v2076_v34 = vpop.f32.mrf.mxu0 }
 0x2dc   :  { %v1948_v60 = vpop.f32.mrf.mxu1 }
 0x2dd   :  { %v1949_v59 = vadd.f32 %v1948_v60, %v1725_v16 }
 0x2de   :  { %v1950_v8 = vpop.f32.mrf.mxu1 }
 0x2df   :  { %v2083_v43 = vpop.f32.mrf.mxu0 }
 0x2e0   :  { %v2084_v32 = vadd.f32 %v2083_v43, %v1935_v27 }
 0x2e1   :  { %v2085_v47 = vpop.f32.mrf.mxu0 }
 0x2e4   :  { %v2092_v56 = vpop.f32.mrf.mxu0  ;;  %v2203_v39 = vpop.f32.mrf.mxu1 }
 0x2e5   :  { %v2093_v49 = vadd.f32 %v2092_v56, %v1942_v1  ;;  %v2204_v14 = vadd.f32 %v2203_v39, %v2075_v53 }
 0x2e6   :  { %v2094_v23 = vpop.f32.mrf.mxu0  ;;  %v2205_v41 = vpop.f32.mrf.mxu1 }
 0x2ea   :  { %v2101_v0 = vpop.f32.mrf.mxu0  ;;  %v2214_v3 = vpop.f32.mrf.mxu1 }
 0x2eb   :  { %v2215_v24 = vadd.f32 %v2214_v3, %v2084_v32  ;;  %v2102_v3 = vadd.f32 %v2101_v0, %v1949_v59 }
 0x2ec   :  { %v2216_v38 = vpop.f32.mrf.mxu1  ;;  %v2103_v40 = vpop.f32.mrf.mxu0 }
 0x2f0   :  { %v2225_v51 = vpop.f32.mrf.mxu1 }
 0x2f1   :  { %v2226_v56 = vadd.f32 %v2225_v51, %v2093_v49 }
 0x2f2   :  { %v2227_v31 = vpop.f32.mrf.mxu1 }
 0x2f5   :  { %v2236_v33 = vpop.f32.mrf.mxu1 }
 0x2f7   :  { %v2238_v34 = vpop.f32.mrf.mxu1 }
 0x2f8   :  { %v2237_v34 = vadd.f32 %v2236_v33, %v2102_v3  ;;  %v11718_v3 = vld [vmem:[#allocation30_spill] sm:$0xff] }
 0x315   :  { %v2386_v60 = vpop.f32.mrf.mxu0 }
 0x316   :  { %v2387_v40 = vadd.f32 %v2386_v60, %v2204_v14 }
 0x317   :  { %v2388_v8 = vpop.f32.mrf.mxu0 }
 0x319   :  { %v2393_v16 = vpop.f32.mrf.mxu0 }
 0x31a   :  { %v2394_v41 = vadd.f32 %v2393_v16, %v2215_v24 }
 0x31b   :  { %v2395_v27 = vpop.f32.mrf.mxu0 }
 0x31d   :  { %v2400_v43 = vpop.f32.mrf.mxu0 }
 0x31e   :  { %v2505_v47 = vpop.f32.mrf.mxu1  ;;  %v2401_v38 = vadd.f32 %v2400_v43, %v2226_v56 }
 0x31f   :  { %v2402_v26 = vpop.f32.mrf.mxu0  ;;  %v2506_v8 = vadd.f32 %v2505_v47, %v2387_v40  ;;  %v11720_v40 = vld [vmem:[#allocation36_spill] sm:$0xff] }
 0x320   :  { %v2507_v1 = vpop.f32.mrf.mxu1 }
 0x321   :  { %v2407_v39 = vpop.f32.mrf.mxu0  ;;  %v9636_v49 = vand.u32 4294901760, %v2506_v8 }
 0x322   :  { %v2512_v53 = vpop.f32.mrf.mxu1  ;;  %v2408_v27 = vadd.f32 %v2407_v39, %v2237_v34 }
 0x323   :  { %v2409_v23 = vpop.f32.mrf.mxu0  ;;  %v2513_v31 = vadd.f32 %v2512_v53, %v2394_v41 }
 0x324   :  { %v2514_v32 = vpop.f32.mrf.mxu1 }
 0x325   :  { %v9634_v26 = vand.u32 4294901760, %v2513_v31  ;;  %v11717_v32 = vld [vmem:[#allocation27_spill] sm:$0xff] }
 0x326   :  { %v2519_v18 = vpop.f32.mrf.mxu1 }
 0x327   :  { %v2520_v44 = vadd.f32 %v2519_v18, %v2401_v38  ;;  %v2662_v0 = vsub.f32 %v2513_v31, %v9634_v26  ;;  %v11719_v38 = vld [vmem:[#allocation33_spill] sm:$0xff] }
 0x328   :  { %v2521_v58 = vpop.f32.mrf.mxu1  ;;  %v8144_v31 = vld [vmem:[%s11275_s2 + $0x8] sm:$0xff] }
 0x329   :  { %v9632_v50 = vand.u32 4294901760, %v2520_v44  ;;  %v2669_v58 = vsub.f32 %v2506_v8, %v9636_v49  ;;  %v3068_v34 = vmul.f32 %v8144_v31, %v8144_v31  ;;  %v11721_v8 = vld [vmem:[#allocation40_spill] sm:$0xff]  ;;  %v11734_v31 = vld [vmem:[#allocation81_spill] sm:$0xff] }
 0x32a   :  { %v2526_v1 = vpop.f32.mrf.mxu1 }
 0x32b   :  { %v2527_v42 = vadd.f32 %v2526_v1, %v2408_v27  ;;  %v2655_v24 = vsub.f32 %v2520_v44, %v9632_v50  ;;  %v2663_v44 = vand.u32 4294901760, %v2662_v0  ;;  %v2670_v43 = vand.u32 4294901760, %v2669_v58  ;;  %v11722_v27 = vld [vmem:[#allocation44_spill] sm:$0xff] }
 0x32c   :  { %v2528_v59 = vpop.f32.mrf.mxu1  ;;  %v3076_v1 = vsel %vm62_vm0, %v3068_v34, 0 }
 0x32d   :  { %v2531_v14 = vsel %vm1034_vm2, %v2527_v42, 0  ;;  %v2656_v33 = vand.u32 4294901760, %v2655_v24  ;;  %v2664_v39 = vsub.f32 %v2662_v0, %v2663_v44  ;;  %v2671_v56 = vsub.f32 %v2669_v58, %v2670_v43  ;;  %v11724_v59 = vld [vmem:[#allocation52_spill] sm:$0xff] }
 0x32e   :  { %v9641_v51 = vand.u32 4294901760, %v2531_v14 }
 0x32f   :  { %v2657_v16 = vsub.f32 %v2655_v24, %v2656_v33  ;;  %v2665_v23 = vand.u32 4294901760, %v2664_v39  ;;  %v2672_v41 = vand.u32 4294901760, %v2671_v56  ;;  %v11732_v56 = vld [vmem:[#allocation78_spill] sm:$0xff] }
 0x330   :  { %v2648_v18 = vsub.f32 %v2531_v14, %v9641_v51  ;;  %7874 = vmatprep.subr.mxu0 %v9641_v51  ;;  %v9744_v14 = vand.u32 4294901760, %v3076_v1 }
 0x331   :  { %7875 = vmatpush3.msra.mxu0 %v9641_v51  ;;  %v2658_v53 = vand.u32 4294901760, %v2657_v16  ;;  %v11729_v16 = vld [vmem:[#allocation70_spill] sm:$0xff] }
 0x332   :  { %7876 = vmatprep.subr.mxu0 %v9632_v50  ;;  %v2649_v60 = vand.u32 4294901760, %v2648_v18 }
 0x333   :  { %7877 = vmatpush3.msra.mxu0 %v9632_v50 }
 0x334   :  { %7878 = vmatprep.subr.mxu0 %v9634_v26  ;;  %v2650_v42 = vsub.f32 %v2648_v18, %v2649_v60 }
 0x335   :  { %7879 = vmatpush3.msra.mxu0 %v9634_v26 }
 0x336   :  { %7880 = vmatprep.subr.mxu0 %v9636_v49  ;;  %v2651_v47 = vand.u32 4294901760, %v2650_v42 }
 0x337   :  { %7881 = vmatpush3.msra.mxu0 %v9636_v49 }
 0x338   :  { %7885 = vmatprep.subr.mxu1 %v2651_v47  ;;  %7896 = vmatprep.subr.mxu0 %v2648_v18 }
 0x339   :  { %7883 = vmatmul.mubr.f32.vlgmr.msra.gmra.mxu0 %v9126_v52  ;;  %7886 = vmatpush3.msra.mxu1 %v2651_v47  ;;  %v11730_v47 = vld [vmem:[#allocation74_spill] sm:$0xff] }
 0x33a   :  { %7897 = vmatpush3.msra.mxu0 %v2648_v18  ;;  %7887 = vmatprep.subr.mxu1 %v2658_v53  ;;  %v9757_v18 = vsub.f32 %v3076_v1, %v9744_v14  ;;  %v11735_v1 = vld [vmem:[#allocation72_spill] sm:$0xff] }
 0x33b   :  { %7898 = vmatprep.subr.mxu0 %v2655_v24  ;;  %7888 = vmatpush3.msra.mxu1 %v2658_v53  ;;  %v11731_v53 = vld [vmem:[#allocation65_spill] sm:$0xff] }
 0x33c   :  { %7899 = vmatpush3.msra.mxu0 %v2655_v24  ;;  %7889 = vmatprep.subr.mxu1 %v2665_v23  ;;  %v11465_v42 = vand.u32 4294901760, %v9757_v18 }
 0x33d   :  { %7900 = vmatprep.subr.mxu0 %v2662_v0  ;;  %7890 = vmatpush3.msra.mxu1 %v2665_v23 }
 0x33e   :  { %7901 = vmatpush3.msra.mxu0 %v2662_v0  ;;  %7891 = vmatprep.subr.mxu1 %v2672_v41  ;;  %v11725_v0 = vld [vmem:[#allocation55_spill] sm:$0xff]  ;;  %v3180_v39 = vsub.f32 %v9757_v18, %v11465_v42  ;;  %v11738_v42 = vld [vmem:[#allocation86_spill] sm:$0xff] }
 0x33f   :  { %7902 = vmatprep.subr.mxu0 %v2669_v58  ;;  %7892 = vmatpush3.msra.mxu1 %v2672_v41  ;;  %v11733_v41 = vld [vmem:[#allocation69_spill] sm:$0xff] }
 0x340   :  { %7903 = vmatpush3.msra.mxu0 %v2669_v58  ;;  %7894 = vmatmul.mubr.f32.vlgmr.msra.gmra.mxu1 %v9097_v9  ;;  %v11726_v58 = vld [vmem:[#allocation59_spill] sm:$0xff]  ;;  %v3181_v34 = vand.u32 4294901760, %v3180_v39  ;;  %v11739_v39 = vld [vmem:[#allocation88_spill] sm:$0xff] }
 0x341   :  { %7904 = vmatprep.mubr.f32.mxu0 %v9082_v30  ;;  %7907 = vmatprep.subr.mxu1 %v9641_v51 }
 0x342   :  { %7918 = vmatprep.subr.mxu0 %v2649_v60  ;;  %7905 = vmatmul.mubr.f32.vlgmr.msra.gmra.mxu0 %v9102_v37 }
 0x343   :  { %7908 = vmatpush3.msra.mxu1 %v9641_v51  ;;  %7919 = vmatpush3.msra.mxu0 %v2649_v60 }
 0x344   :  { %7909 = vmatprep.subr.mxu1 %v9632_v50  ;;  %7920 = vmatprep.subr.mxu0 %v2656_v33 }
 0x345   :  { %7910 = vmatpush3.msra.mxu1 %v9632_v50  ;;  %7921 = vmatpush3.msra.mxu0 %v2656_v33  ;;  %v11727_v33 = vld [vmem:[#allocation62_spill] sm:$0xff] }
 0x346   :  { %7911 = vmatprep.subr.mxu1 %v9634_v26  ;;  %7922 = vmatprep.subr.mxu0 %v2663_v44 }
 0x347   :  { %7912 = vmatpush3.msra.mxu1 %v9634_v26  ;;  %7923 = vmatpush3.msra.mxu0 %v2663_v44  ;;  %v11728_v44 = vld [vmem:[#allocation66_spill] sm:$0xff] }
 0x348   :  { %7913 = vmatprep.subr.mxu1 %v9636_v49  ;;  %7924 = vmatprep.subr.mxu0 %v2670_v43 }
 0x349   :  { %7914 = vmatpush3.msra.mxu1 %v9636_v49  ;;  %7915 = vmatprep.mubr.f32.mxu1 %v9086_v2 }
 0x34a   :  { %7925 = vmatpush3.msra.mxu0 %v2670_v43  ;;  %7916 = vmatmul.mubr.f32.vlgmr.msra.gmra.mxu1 %v9111_v22 }
 0x34b   :  { %7926 = vmatprep.mubr.f32.mxu0 %v9079_v21  ;;  %7929 = vmatprep.subr.mxu1 %v9641_v51 }
 0x34c   :  { %3087 = vmatprep.subr.mxu0 %v11531_v55  ;;  %7927 = vmatmul.mubr.f32.vlgmr.msra.gmra.mxu0 %v9097_v9 }
 0x34d   :  { %7930 = vmatpush3.msra.mxu1 %v9641_v51  ;;  %3089 = vmatpush1.msra.mxu0 %v8235_v4 }
 0x34e   :  { %7931 = vmatprep.subr.mxu1 %v9632_v50  ;;  %3090 = vmatprep.subr.mxu0 %v11531_v55 }
 0x34f   :  { %7932 = vmatpush3.msra.mxu1 %v9632_v50  ;;  %3092 = vmatpush1.msra.mxu0 %v8237_v5  ;;  %v11716_v50 = vld [vmem:[#allocation24_spill] sm:$0xff] }
 0x350   :  { %7933 = vmatprep.subr.mxu1 %v9634_v26  ;;  %3093 = vmatprep.subr.mxu0 %v11531_v55 }
 0x351   :  { %7934 = vmatpush3.msra.mxu1 %v9634_v26  ;;  %3095 = vmatpush1.msra.mxu0 %v8239_v6  ;;  %v11723_v26 = vld [vmem:[#allocation48_spill] sm:$0xff] }
 0x352   :  { %7935 = vmatprep.subr.mxu1 %v9636_v49  ;;  %3096 = vmatprep.subr.mxu0 %v11531_v55 }
 0x353   :  { %7936 = vmatpush3.msra.mxu1 %v9636_v49  ;;  %7937 = vmatprep.mubr.f32.mxu1 %v9079_v21  ;;  %v8145_v49 = vld [vmem:[%s11275_s2] sm:$0xff] }
 0x354   :  { %3098 = vmatpush1.msra.mxu0 %v8251_v10  ;;  %7938 = vmatmul.mubr.f32.vlgmr.msra.gmra.mxu1 %v9097_v9  ;;  %v3067_v24 = vmul.f32 %v8145_v49, %v8145_v49  ;;  %v11736_v49 = vld [vmem:[#allocation84_spill] sm:$0xff] }
 0x355   :  { %3099 = vmatprep.subr.mxu0 %v11531_v55  ;;  %3238 = vmatprep.subr.mxu1 %v11531_v55 }
 0x356   :  { %3101 = vmatpush1.msra.mxu0 %v8253_v11  ;;  %3244 = vmatpush1.msra.mxu1 %v11621_v15  ;;  %v9748_v51 = vand.u32 4294901760, %v3067_v24 }
 0x357   :  { %3102 = vmatprep.subr.mxu0 %v11531_v55  ;;  %3245 = vmatprep.subr.mxu1 %v11531_v55 }
 0x358   :  { %3104 = vmatpush1.msra.mxu0 %v8255_v12  ;;  %3251 = vmatpush1.msra.mxu1 %v11622_v46  ;;  %v9762_v60 = vsub.f32 %v3067_v24, %v9748_v51 }
 0x359   :  { %3105 = vmatprep.subr.mxu0 %v11531_v55  ;;  %3252 = vmatprep.subr.mxu1 %v11531_v55 }
 0x35a   :  { %3107 = vmatpush1.msra.mxu0 %v8270_v17  ;;  %3258 = vmatpush1.msra.mxu1 %v11623_v13  ;;  %v11464_v43 = vand.u32 4294901760, %v9762_v60 }
 0x35b   :  { %3108 = vmatprep.subr.mxu0 %v11531_v55  ;;  %3259 = vmatprep.subr.mxu1 %v11531_v55 }
 0x35c   :  { %3110 = vmatpush1.msra.mxu0 %v8295_v25  ;;  %3265 = vmatpush1.msra.mxu1 %v11716_v50  ;;  %v3186_v23 = vsub.f32 %v9762_v60, %v11464_v43  ;;  %v11737_v43 = vld [vmem:[#allocation76_spill] sm:$0xff] }
 0x35d   :  { %3111 = vmatprep.subr.mxu0 %v11531_v55  ;;  %3266 = vmatprep.subr.mxu1 %v11531_v55  ;;  %v11767_v50 = vld [vmem:[#allocation64_spill] sm:$0xff] }
 0x35e   :  { %3113 = vmatpush1.msra.mxu0 %v8304_v28  ;;  %3272 = vmatpush1.msra.mxu1 %v11717_v32  ;;  %v3187_v24 = vand.u32 4294901760, %v3186_v23  ;;  %v11741_v23 = vld [vmem:[#allocation89_spill] sm:$0xff] }
 0x35f   :  { %3114 = vmatprep.subr.mxu0 %v11531_v55  ;;  %3273 = vmatprep.subr.mxu1 %v11531_v55 }
 0x360   :  { %3116 = vmatpush1.msra.mxu0 %v8323_v35  ;;  %3279 = vmatpush1.msra.mxu1 %v11718_v3  ;;  %v11764_v3 = vld [vmem:[#allocation57_spill] sm:$0xff] }
 0x361   :  { %3117 = vmatprep.subr.mxu0 %v11531_v55  ;;  %3280 = vmatprep.subr.mxu1 %v11531_v55 }
 0x362   :  { %3119 = vmatpush1.msra.mxu0 %v8351_v45  ;;  %3286 = vmatpush1.msra.mxu1 %v11719_v38  ;;  %v11762_v38 = vld [vmem:[#allocation54_spill] sm:$0xff] }
 0x363   :  { %3120 = vmatprep.subr.mxu0 %v11531_v55  ;;  %3287 = vmatprep.subr.mxu1 %v11531_v55 }
 0x364   :  { %3122 = vmatpush1.msra.mxu0 %v8361_v48  ;;  %3293 = vmatpush1.msra.mxu1 %v11720_v40  ;;  %v11761_v40 = vld [vmem:[#allocation50_spill] sm:$0xff] }
 0x365   :  { %3123 = vmatprep.subr.mxu0 %v11531_v55  ;;  %3294 = vmatprep.subr.mxu1 %v11531_v55 }
 0x366   :  { %3125 = vmatpush1.msra.mxu0 %v8389_v57  ;;  %3300 = vmatpush1.msra.mxu1 %v11721_v8 }
 0x367   :  { %3126 = vmatprep.subr.mxu0 %v11531_v55  ;;  %3301 = vmatprep.subr.mxu1 %v11531_v55 }
 0x368   :  { %3128 = vmatpush1.msra.mxu0 %v8402_v61  ;;  %3307 = vmatpush1.msra.mxu1 %v11722_v27 }
 0x369   :  { %3129 = vmatprep.subr.mxu0 %v11531_v55  ;;  %3308 = vmatprep.subr.mxu1 %v11531_v55 }
 0x36a   :  { %3131 = vmatpush1.msra.mxu0 %v8421_v7  ;;  %3314 = vmatpush1.msra.mxu1 %v11723_v26 }
 0x36b   :  { %3132 = vmatprep.subr.mxu0 %v11531_v55  ;;  %3315 = vmatprep.subr.mxu1 %v11531_v55 }
 0x36c   :  { %3134 = vmatpush1.msra.mxu0 %v8437_v19  ;;  %3321 = vmatpush1.msra.mxu1 %v11724_v59 }
 0x36d   :  { %3147 = vmatprep.subr.mxu0 %v11531_v55  ;;  %3322 = vmatprep.subr.mxu1 %v11531_v55 }
 0x36e   :  { %3149 = vmatpush2.msra.mxu0 %v11583_v54  ;;  %3328 = vmatpush1.msra.mxu1 %v11725_v0 }
 0x36f   :  { %3150 = vmatprep.subr.mxu0 %v11531_v55  ;;  %3329 = vmatprep.subr.mxu1 %v11531_v55 }
 0x370   :  { %3152 = vmatpush2.msra.mxu0 %v11584_v62  ;;  %3335 = vmatpush1.msra.mxu1 %v11726_v58  ;;  %v11755_v58 = vld [vmem:[#allocation35_spill] sm:$0xff] }
 0x371   :  { %3153 = vmatprep.subr.mxu0 %v11531_v55  ;;  %3336 = vmatprep.subr.mxu1 %v11531_v55 }
 0x372   :  { %3155 = vmatpush2.msra.mxu0 %v11585_v20  ;;  %3342 = vmatpush1.msra.mxu1 %v11727_v33  ;;  %v11754_v33 = vld [vmem:[#allocation32_spill] sm:$0xff] }
 0x373   :  { %3156 = vmatprep.subr.mxu0 %v11531_v55  ;;  %3343 = vmatprep.subr.mxu1 %v11531_v55 }
 0x374   :  { %3158 = vmatpush2.msra.mxu0 %v11586_v36  ;;  %3349 = vmatpush1.msra.mxu1 %v11728_v44 }
 0x375   :  { %3159 = vmatprep.subr.mxu0 %v11531_v55  ;;  %3362 = vmatprep.subr.mxu1 %v11531_v55 }
 0x376   :  { %3161 = vmatpush2.msra.mxu0 %v8540_v63  ;;  %3368 = vmatpush2.msra.mxu1 %v11729_v16  ;;  %v8150_v16 = vld [vmem:[%s11275_s2 + $0x38] sm:$0x3] }
 0x377   :  { %3162 = vmatprep.subr.mxu0 %v11531_v55  ;;  %3369 = vmatprep.subr.mxu1 %v11531_v55  ;;  %v3074_v44 = vmul.f32 %v8150_v16, %v8150_v16 }
 0x378   :  { %3164 = vmatpush2.msra.mxu0 %v11587_v29  ;;  %3375 = vmatpush2.msra.mxu1 %v11730_v47 }
 0x379   :  { %3165 = vmatprep.subr.mxu0 %v11531_v55  ;;  %3376 = vmatprep.subr.mxu1 %v11531_v55 }
 0x37a   :  { %3167 = vmatpush2.msra.mxu0 %v11731_v53  ;;  %3382 = vmatpush2.msra.mxu1 %v11732_v56  ;;  %v11752_v56 = vld [vmem:[#allocation26_spill] sm:$0xff] }
 0x37b   :  { %3168 = vmatprep.subr.mxu0 %v11531_v55  ;;  %3383 = vmatprep.subr.mxu1 %v11531_v55 }
 0x37c   :  { %3170 = vmatpush2.msra.mxu0 %v11733_v41  ;;  %3389 = vmatpush2.msra.mxu1 %v11734_v31  ;;  %v11740_v31 = vld [vmem:[#allocation5_spill] sm:$0xff] }
 0x37d   :  { %3171 = vmatprep.subr.mxu0 %v11531_v55  ;;  %3390 = vmatprep.subr.mxu1 %v11531_v55 }
 0x37e   :  { %3173 = vmatpush2.msra.mxu0 %v11735_v1  ;;  %3396 = vmatpush2.msra.mxu1 %v11736_v49  ;;  %v11742_v49 = vld [vmem:[#allocation6_spill] sm:$0xff] }
 0x37f   :  { %3174 = vmatprep.subr.mxu0 %v11531_v55  ;;  %3397 = vmatprep.subr.mxu1 %v11531_v55 }
 0x380   :  { %3176 = vmatpush2.msra.mxu0 %v11737_v43  ;;  %3403 = vmatpush2.msra.mxu1 %v11738_v42  ;;  %v11744_v42 = vld [vmem:[#allocation7_spill] sm:$0xff] }
 0x381   :  { %3182 = vmatprep.mubr.f32.mxu0 %v3181_v34  ;;  %3404 = vmatprep.subr.mxu1 %v11531_v55  ;;  %v11743_v34 = vld [vmem:[#allocation90_spill] sm:$0xff] }
 0x382   :  { %3461 = vmatprep.subr.mxu0 %v11531_v55  ;;  %3188 = vmatmul.mubr.f32.vlgmr.msra.gmra.mxu0 %v3187_v24  ;;  %v11745_v24 = vld [vmem:[#allocation91_spill] sm:$0xff] }
 0x383   :  { %3410 = vmatpush2.msra.mxu1 %v11739_v39  ;;  %3464 = vmatpush1.msra.mxu0 %v11740_v31  ;;  %v11746_v31 = vld [vmem:[#allocation8_spill] sm:$0xff] }
 0x384   :  { %3411 = vmatprep.subr.mxu1 %v11531_v55  ;;  %3465 = vmatprep.subr.mxu0 %v11531_v55 }
 0x385   :  { %3417 = vmatpush2.msra.mxu1 %v11741_v23  ;;  %3468 = vmatpush1.msra.mxu0 %v11742_v49  ;;  %v11747_v49 = vld [vmem:[#allocation9_spill] sm:$0xff]  ;;  %v11751_v23 = vld [vmem:[#allocation23_spill] sm:$0xff] }
 0x386   :  { %3418 = vmatprep.subr.mxu1 %v11531_v55  ;;  %3469 = vmatprep.subr.mxu0 %v11531_v55 }
 0x387   :  { %3424 = vmatpush2.msra.mxu1 %v11743_v34  ;;  %3472 = vmatpush1.msra.mxu0 %v11744_v42  ;;  %v11748_v42 = vld [vmem:[#allocation15_spill] sm:$0xff] }
 0x388   :  { %3425 = vmatprep.subr.mxu1 %v11531_v55  ;;  %3473 = vmatprep.subr.mxu0 %v11531_v55 }
 0x389   :  { %3431 = vmatpush2.msra.mxu1 %v11745_v24  ;;  %3433 = vmatprep.mubr.f32.mxu1 %v9744_v14 }
 0x38a   :  { %3476 = vmatpush1.msra.mxu0 %v11746_v31  ;;  %3435 = vmatmul.mubr.f32.vlgmr.msra.gmra.mxu1 %v9748_v51  ;;  %v8146_v31 = vld [vmem:[%s11275_s2 + $0x18] sm:$0xff] }
 0x38b   :  { %3477 = vmatprep.subr.mxu0 %v11531_v55  ;;  %3614 = vmatprep.subr.mxu1 %v11531_v55  ;;  %v3070_v24 = vmul.f32 %v8146_v31, %v8146_v31  ;;  %v8147_v31 = vld [vmem:[%s11275_s2 + $0x10] sm:$0xff] }
 0x38c   :  { %3480 = vmatpush1.msra.mxu0 %v11747_v49  ;;  %3616 = vmatpush1.msra.mxu1 %v8235_v4  ;;  %v11749_v49 = vld [vmem:[#allocation16_spill] sm:$0xff] }
 0x38d   :  { %3481 = vmatprep.subr.mxu0 %v11531_v55  ;;  %3617 = vmatprep.subr.mxu1 %v11531_v55  ;;  %v3079_v34 = vsel %vm62_vm0, %v3070_v24, 0 }
 0x38e   :  { %3484 = vmatpush1.msra.mxu0 %v11748_v42  ;;  %3619 = vmatpush1.msra.mxu1 %v8237_v5  ;;  %v11750_v42 = vld [vmem:[#allocation20_spill] sm:$0xff]  ;;  %v9852_v24 = vand.u32 4294901760, %v3079_v34 }
 0x38f   :  { %3485 = vmatprep.subr.mxu0 %v11531_v55  ;;  %3620 = vmatprep.subr.mxu1 %v11531_v55 }
 0x390   :  { %3488 = vmatpush1.msra.mxu0 %v11749_v49  ;;  %3622 = vmatpush1.msra.mxu1 %v8239_v6  ;;  %v3069_v49 = vmul.f32 %v8147_v31, %v8147_v31 }
 0x391   :  { %3489 = vmatprep.subr.mxu0 %v11531_v55  ;;  %3623 = vmatprep.subr.mxu1 %v11531_v55 }
 0x392   :  { %3492 = vmatpush1.msra.mxu0 %v11750_v42  ;;  %3625 = vmatpush1.msra.mxu1 %v8251_v10  ;;  %v8148_v42 = vld [vmem:[%s11275_s2 + $0x28] sm:$0xff]  ;;  %v9856_v31 = vand.u32 4294901760, %v3069_v49 }
 0x393   :  { %3493 = vmatprep.subr.mxu0 %v11531_v55  ;;  %3626 = vmatprep.subr.mxu1 %v11531_v55  ;;  %v3072_v39 = vmul.f32 %v8148_v42, %v8148_v42 }
 0x394   :  { %3496 = vmatpush1.msra.mxu0 %v11751_v23  ;;  %3628 = vmatpush1.msra.mxu1 %v8253_v11  ;;  %v11753_v23 = vld [vmem:[#allocation29_spill] sm:$0xff] }
 0x395   :  { %3497 = vmatprep.subr.mxu0 %v11531_v55  ;;  %3629 = vmatprep.subr.mxu1 %v11531_v55  ;;  %v3082_v42 = vsel %vm62_vm0, %v3072_v39, 0  ;;  %v9872_v39 = vsub.f32 %v3079_v34, %v9852_v24  ;;  %v3085_v34 = vsel %vm62_vm0, %v3074_v44, 0  ;;  %v11757_v44 = vld [vmem:[#allocation39_spill] sm:$0xff] }
 0x396   :  { %3500 = vmatpush1.msra.mxu0 %v11752_v56  ;;  %3631 = vmatpush1.msra.mxu1 %v8255_v12  ;;  %v8149_v56 = vld [vmem:[%s11275_s2 + $0x20] sm:$0xff] }
 0x397   :  { %3501 = vmatprep.subr.mxu0 %v11531_v55  ;;  %3632 = vmatprep.subr.mxu1 %v11531_v55  ;;  %v3071_v47 = vmul.f32 %v8149_v56, %v8149_v56  ;;  %v9877_v56 = vsub.f32 %v3069_v49, %v9856_v31 }
 0x398   :  { %3504 = vmatpush1.msra.mxu0 %v11753_v23  ;;  %3634 = vmatpush1.msra.mxu1 %v8270_v17  ;;  %v9879_v23 = vand.u32 4294901760, %v3082_v42 }
 0x399   :  { %3505 = vmatprep.subr.mxu0 %v11531_v55  ;;  %3635 = vmatprep.subr.mxu1 %v11531_v55  ;;  %v9883_v16 = vand.u32 4294901760, %v3071_v47 }
 0x39a   :  { %3508 = vmatpush1.msra.mxu0 %v11754_v33  ;;  %3637 = vmatpush1.msra.mxu1 %v8295_v25  ;;  %v11756_v33 = vld [vmem:[#allocation38_spill] sm:$0xff]  ;;  %v9898_v26 = vsub.f32 %v3082_v42, %v9879_v23  ;;  %v11759_v42 = vand.u32 4294901760, %v9872_v39 }
 0x39b   :  { %3509 = vmatprep.subr.mxu0 %v11531_v55  ;;  %3638 = vmatprep.subr.mxu1 %v11531_v55  ;;  %v9903_v49 = vsub.f32 %v3071_v47, %v9883_v16  ;;  %v11760_v47 = vand.u32 4294901760, %v9877_v56 }
 0x39c   :  { %3512 = vmatpush1.msra.mxu0 %v11755_v58  ;;  %3640 = vmatpush1.msra.mxu1 %v8304_v28  ;;  %v8151_v58 = vld [vmem:[%s11275_s2 + $0x30] sm:$0x3]  ;;  %v3195_v59 = vsub.f32 %v9872_v39, %v11759_v42 }
 0x39d   :  { %3513 = vmatprep.subr.mxu0 %v11531_v55  ;;  %3641 = vmatprep.subr.mxu1 %v11531_v55  ;;  %v3073_v0 = vmul.f32 %v8151_v58, %v8151_v58  ;;  %v11758_v58 = vld [vmem:[#allocation46_spill] sm:$0xff]  ;;  %v3201_v27 = vsub.f32 %v9877_v56, %v11760_v47 }
 0x39e   :  { %3516 = vmatpush1.msra.mxu0 %v11756_v33  ;;  %3643 = vmatpush1.msra.mxu1 %v8323_v35  ;;  %v9905_v33 = vand.u32 4294901760, %v3085_v34  ;;  %v3196_v47 = vand.u32 4294901760, %v3195_v59 }
 0x39f   :  { %3517 = vmatprep.subr.mxu0 %v11531_v55  ;;  %3644 = vmatprep.subr.mxu1 %v11531_v55 }
 0x3a0   :  { %3520 = vmatpush1.msra.mxu0 %v11757_v44  ;;  %3646 = vmatpush1.msra.mxu1 %v8351_v45  ;;  %v9914_v44 = vand.u32 4294901760, %v3073_v0  ;;  %v9926_v42 = vsub.f32 %v3085_v34, %v9905_v33  ;;  %v11763_v34 = vand.u32 4294901760, %v9898_v26 }
 0x3a1   :  { %3521 = vmatprep.subr.mxu0 %v11531_v55  ;;  %3647 = vmatprep.subr.mxu1 %v11531_v55 }
 0x3a2   :  { %3524 = vmatpush1.msra.mxu0 %v11758_v58  ;;  %3649 = vmatpush1.msra.mxu1 %v8361_v48  ;;  %v9933_v8 = vsub.f32 %v3073_v0, %v9914_v44  ;;  %v3202_v58 = vand.u32 4294901760, %v3201_v27  ;;  %v11466_v0 = vand.u32 4294901760, %v9926_v42  ;;  %v11766_v27 = vld [vmem:[#allocation61_spill] sm:$0xff] }
 0x3a3   :  { %3537 = vmatprep.subr.mxu0 %v11531_v55  ;;  %3650 = vmatprep.subr.mxu1 %v11531_v55 }
 0x3a4   :  { %3540 = vmatpush2.msra.mxu0 %v11761_v40  ;;  %3652 = vmatpush1.msra.mxu1 %v8389_v57  ;;  %v3210_v40 = vsub.f32 %v9898_v26, %v11763_v34  ;;  %v11467_v32 = vand.u32 4294901760, %v9933_v8 }
 0x3a5   :  { %3541 = vmatprep.subr.mxu0 %v11531_v55  ;;  %3653 = vmatprep.subr.mxu1 %v11531_v55 }
 0x3a6   :  { %3544 = vmatpush2.msra.mxu0 %v11762_v38  ;;  %3655 = vmatpush1.msra.mxu1 %v8402_v61  ;;  %v11765_v38 = vand.u32 4294901760, %v9903_v49  ;;  %v3211_v34 = vand.u32 4294901760, %v3210_v40  ;;  %v3231_v40 = vsub.f32 %v9933_v8, %v11467_v32  ;;  %v11776_v32 = vand.u32 4294901760, %v9757_v18 }
 0x3a7   :  { %3545 = vmatprep.subr.mxu0 %v11531_v55  ;;  %3656 = vmatprep.subr.mxu1 %v11531_v55 }
 0x3a8   :  { %3548 = vmatpush2.msra.mxu0 %v11764_v3  ;;  %3658 = vmatpush1.msra.mxu1 %v8421_v7  ;;  %v3216_v59 = vsub.f32 %v9903_v49, %v11765_v38  ;;  %v3225_v3 = vsub.f32 %v9926_v42, %v11466_v0  ;;  %v3232_v0 = vand.u32 4294901760, %v3231_v40  ;;  %v11774_v40 = vld [vmem:[#allocation11_spill] sm:$0xff] }
 0x3a9   :  { %3549 = vmatprep.subr.mxu0 %v11531_v55  ;;  %3659 = vmatprep.subr.mxu1 %v11531_v55 }
 0x3aa   :  { %3197 = vmatprep.mubr.f32.mxu0 %v3196_v47  ;;  %3552 = vmatpush2.msra.mxu0 %v11766_v27  ;;  %v3217_v38 = vand.u32 4294901760, %v3216_v59  ;;  %v3226_v47 = vand.u32 4294901760, %v3225_v3  ;;  %v11769_v59 = vld [vmem:[#allocation73_spill] sm:$0xff]  ;;  %v11771_v3 = vld [vmem:[#allocation80_spill] sm:$0xff] }
 0x3ab   :  { %3661 = vmatpush1.msra.mxu1 %v8437_v19  ;;  %3203 = vmatmul.mubr.f32.gmra.mxu0 %v3202_v58  ;;  %v11768_v58 = vld [vmem:[#allocation68_spill] sm:$0xff] }
 0x3ac   :  { %3553 = vmatprep.subr.mxu0 %v11531_v55  ;;  %3674 = vmatprep.subr.mxu1 %v11531_v55 }
 0x3ad   :  { %3556 = vmatpush2.msra.mxu0 %v11767_v50  ;;  %3676 = vmatpush2.msra.mxu1 %v11583_v54 }
 0x3ae   :  { %3557 = vmatprep.subr.mxu0 %v11531_v55  ;;  %3677 = vmatprep.subr.mxu1 %v11531_v55 }
 0x3af   :  { %3212 = vmatprep.mubr.f32.mxu0 %v3211_v34  ;;  %3560 = vmatpush2.msra.mxu0 %v11768_v58  ;;  %v11770_v34 = vld [vmem:[#allocation77_spill] sm:$0xff] }
 0x3b0   :  { %3679 = vmatpush2.msra.mxu1 %v11584_v62  ;;  %3218 = vmatmul.mubr.f32.gmra.mxu0 %v3217_v38  ;;  %v11772_v38 = vld [vmem:[#allocation83_spill] sm:$0xff] }
 0x3b1   :  { %3561 = vmatprep.subr.mxu0 %v11531_v55  ;;  %3680 = vmatprep.subr.mxu1 %v11531_v55 }
 0x3b2   :  { %3564 = vmatpush2.msra.mxu0 %v11769_v59  ;;  %3682 = vmatpush2.msra.mxu1 %v11585_v20 }
 0x3b3   :  { %3440 = vmatprep.mubr.f32.mxu1 %v9852_v24  ;;  %3565 = vmatprep.subr.mxu0 %v11531_v55 }
 0x3b4   :  { %3683 = vmatprep.subr.mxu1 %v11531_v55  ;;  %3227 = vmatprep.mubr.f32.mxu0 %v3226_v47  ;;  %v11775_v47 = vld [vmem:[#allocation12_spill] sm:$0xff] }
 0x3b5   :  { %3442 = vmatmul.mubr.f32.gmra.mxu1 %v9856_v31  ;;  %3568 = vmatpush2.msra.mxu0 %v11770_v34 }
 0x3b6   :  { %3685 = vmatpush2.msra.mxu1 %v11586_v36  ;;  %3233 = vmatmul.mubr.f32.gmra.mxu0 %v3232_v0  ;;  %v11773_v0 = vld [vmem:[#allocation10_spill] sm:$0xff] }
 0x3b7   :  { %3569 = vmatprep.subr.mxu0 %v11531_v55  ;;  %3686 = vmatprep.subr.mxu1 %v11531_v55 }
 0x3b8   :  { %3572 = vmatpush2.msra.mxu0 %v11771_v3  ;;  %3688 = vmatpush2.msra.mxu1 %v8540_v63 }
 0x3b9   :  { %3447 = vmatprep.mubr.f32.mxu1 %v9879_v23  ;;  %3573 = vmatprep.subr.mxu0 %v11531_v55 }
 0x3ba   :  { %3689 = vmatprep.subr.mxu1 %v11531_v55  ;;  %3449 = vmatmul.mubr.f32.gmra.mxu1 %v9883_v16 }
 0x3bb   :  { %3576 = vmatpush2.msra.mxu0 %v11772_v38  ;;  %3579 = vmatprep.mubr.f32.mxu0 %v9757_v18  ;;  %v11781_v18 = vld [vmem:[#allocation19_spill] sm:$0xff] }
 0x3bc   :  { %3691 = vmatpush2.msra.mxu1 %v11587_v29  ;;  %3582 = vmatmul.mubr.f32.vlgmr.msra.gmra.mxu0 %v9762_v60 }
 0x3bd   :  { %3692 = vmatprep.subr.mxu1 %v11531_v55  ;;  %3749 = vmatprep.subr.mxu0 %v11531_v55 }
 0x3be   :  { %3694 = vmatpush2.msra.mxu1 %v11731_v53  ;;  %3753 = vmatpush1.msra.mxu0 %v11773_v0  ;;  %v11778_v0 = vand.u32 4294901760, %v9762_v60  ;;  %v11782_v60 = vand.u32 4294901760, %v9877_v56 }
 0x3bf   :  { %3454 = vmatprep.mubr.f32.mxu1 %v9905_v33  ;;  %3695 = vmatprep.subr.mxu1 %v11531_v55 }
 0x3c0   :  { %3754 = vmatprep.subr.mxu0 %v11531_v55  ;;  %3456 = vmatmul.mubr.f32.gmra.mxu1 %v9914_v44 }
 0x3c1   :  { %3588 = vmatprep.mubr.f32.mxu0 %v9872_v39  ;;  %3697 = vmatpush2.msra.mxu1 %v11733_v41 }
 0x3c2   :  { %3758 = vmatpush1.msra.mxu0 %v11774_v40  ;;  %3698 = vmatprep.subr.mxu1 %v11531_v55  ;;  %v11777_v40 = vld [vmem:[#allocation13_spill] sm:$0xff] }
 0x3c3   :  { %3591 = vmatmul.mubr.f32.gmra.mxu0 %v9877_v56  ;;  %3759 = vmatprep.subr.mxu0 %v11531_v55  ;;  %v11786_v56 = vand.u32 4294901760, %v9903_v49 }
 0x3c4   :  { %3700 = vmatpush2.msra.mxu1 %v11735_v1  ;;  %3763 = vmatpush1.msra.mxu0 %v11775_v47  ;;  %v11779_v47 = vld [vmem:[#allocation14_spill] sm:$0xff] }
 0x3c5   :  { %3701 = vmatprep.subr.mxu1 %v11531_v55  ;;  %3764 = vmatprep.subr.mxu0 %v11531_v55 }
 0x3c6   :  { %3597 = vmatprep.mubr.f32.mxu0 %v9898_v26  ;;  %3703 = vmatpush2.msra.mxu1 %v11737_v43 }
 0x3c7   :  { %3707 = vmatprep.mubr.f32.mxu1 %v11776_v32  ;;  %3768 = vmatpush1.msra.mxu0 %v11777_v40  ;;  %v11780_v32 = vand.u32 4294901760, %v9872_v39  ;;  %v11784_v39 = vand.u32 4294901760, %v9898_v26  ;;  %v11788_v26 = vand.u32 4294901760, %v9926_v42 }
 0x3c8   :  { %3600 = vmatmul.mubr.f32.gmra.mxu0 %v9903_v49  ;;  %3711 = vmatmul.mubr.f32.vlgmr.msra.gmra.mxu1 %v11778_v0  ;;  %v11783_v0 = vld [vmem:[#allocation22_spill] sm:$0xff]  ;;  %v11790_v49 = vand.u32 4294901760, %v9933_v8 }
 0x3c9   :  { %3769 = vmatprep.subr.mxu0 %v11531_v55  ;;  %3920 = vmatprep.subr.mxu1 %v11531_v55 }
 0x3ca   :  { %3773 = vmatpush1.msra.mxu0 %v11779_v47  ;;  %3922 = vmatpush1.msra.mxu1 %v8235_v4 }
 0x3cb   :  { %3774 = vmatprep.subr.mxu0 %v11531_v55  ;;  %3923 = vmatprep.subr.mxu1 %v11531_v55 }
 0x3cc   :  { %3606 = vmatprep.mubr.f32.mxu0 %v9926_v42  ;;  %3718 = vmatprep.mubr.f32.mxu1 %v11780_v32  ;;  %v11785_v32 = vld [vmem:[#allocation25_spill] sm:$0xff] }
 0x3cd   :  { %3778 = vmatpush1.msra.mxu0 %v11781_v18  ;;  %3925 = vmatpush1.msra.mxu1 %v8237_v5  ;;  %v11792_v42 = vld [vmem:[#allocation37_spill] sm:$0xff] }
 0x3ce   :  { %3609 = vmatmul.mubr.f32.gmra.mxu0 %v9933_v8  ;;  %3722 = vmatmul.mubr.f32.gmra.mxu1 %v11782_v60  ;;  %v11787_v60 = vld [vmem:[#allocation28_spill] sm:$0xff]  ;;  %v11793_v8 = vld [vmem:[#allocation42_spill] sm:$0xff]  ;;  %v11807_v18 = vld [vmem:[#allocation41_spill] sm:$0xff] }
 0x3cf   :  { %3779 = vmatprep.subr.mxu0 %v11531_v55  ;;  %3926 = vmatprep.subr.mxu1 %v11531_v55 }
 0x3d0   :  { %3783 = vmatpush1.msra.mxu0 %v11783_v0  ;;  %3928 = vmatpush1.msra.mxu1 %v8239_v6 }
 0x3d1   :  { %3784 = vmatprep.subr.mxu0 %v11531_v55  ;;  %3929 = vmatprep.subr.mxu1 %v11531_v55 }
 0x3d2   :  { %3729 = vmatprep.mubr.f32.mxu1 %v11784_v39  ;;  %3788 = vmatpush1.msra.mxu0 %v11785_v32  ;;  %v11789_v39 = vld [vmem:[#allocation31_spill] sm:$0xff] }
 0x3d3   :  { %3931 = vmatpush1.msra.mxu1 %v8251_v10  ;;  %3789 = vmatprep.subr.mxu0 %v11531_v55 }
 0x3d4   :  { %3733 = vmatmul.mubr.f32.gmra.mxu1 %v11786_v56  ;;  %3932 = vmatprep.subr.mxu1 %v11531_v55  ;;  %v11791_v56 = vld [vmem:[#allocation34_spill] sm:$0xff] }
 0x3d5   :  { %3793 = vmatpush1.msra.mxu0 %v11787_v60  ;;  %3934 = vmatpush1.msra.mxu1 %v8253_v11 }
 0x3d6   :  { %3794 = vmatprep.subr.mxu0 %v11531_v55  ;;  %3935 = vmatprep.subr.mxu1 %v11531_v55 }
 0x3d7   :  { %3740 = vmatprep.mubr.f32.mxu1 %v11788_v26  ;;  %3798 = vmatpush1.msra.mxu0 %v11789_v39  ;;  %v11794_v26 = vld [vmem:[#allocation45_spill] sm:$0xff] }
 0x3d8   :  { %3937 = vmatpush1.msra.mxu1 %v8255_v12  ;;  %3799 = vmatprep.subr.mxu0 %v11531_v55 }
 0x3d9   :  { %3744 = vmatmul.mubr.f32.gmra.mxu1 %v11790_v49  ;;  %3938 = vmatprep.subr.mxu1 %v11531_v55  ;;  %v11795_v49 = vld [vmem:[#allocation47_spill] sm:$0xff] }
 0x3da   :  { %3803 = vmatpush1.msra.mxu0 %v11791_v56  ;;  %3940 = vmatpush1.msra.mxu1 %v8270_v17 }
 0x3db   :  { %3804 = vmatprep.subr.mxu0 %v11531_v55  ;;  %3941 = vmatprep.subr.mxu1 %v11531_v55 }
 0x3dc   :  { %3808 = vmatpush1.msra.mxu0 %v11792_v42  ;;  %3943 = vmatpush1.msra.mxu1 %v8295_v25 }
 0x3dd   :  { %3809 = vmatprep.subr.mxu0 %v11531_v55  ;;  %3944 = vmatprep.subr.mxu1 %v11531_v55 }
 0x3de   :  { %3813 = vmatpush1.msra.mxu0 %v11793_v8  ;;  %3946 = vmatpush1.msra.mxu1 %v8304_v28  ;;  %v11796_v8 = vld [vmem:[#allocation53_spill] sm:$0xff] }
 0x3df   :  { %3814 = vmatprep.subr.mxu0 %v11531_v55  ;;  %3947 = vmatprep.subr.mxu1 %v11531_v55 }
 0x3e0   :  { %3818 = vmatpush1.msra.mxu0 %v11794_v26  ;;  %3949 = vmatpush1.msra.mxu1 %v8323_v35  ;;  %v11797_v26 = vld [vmem:[#allocation56_spill] sm:$0xff] }
 0x3e1   :  { %3819 = vmatprep.subr.mxu0 %v11531_v55  ;;  %3950 = vmatprep.subr.mxu1 %v11531_v55 }
 0x3e2   :  { %3823 = vmatpush1.msra.mxu0 %v11795_v49  ;;  %3952 = vmatpush1.msra.mxu1 %v8351_v45  ;;  %v11798_v49 = vld [vmem:[#allocation60_spill] sm:$0xff] }
 0x3e3   :  { %3824 = vmatprep.subr.mxu0 %v11531_v55  ;;  %3953 = vmatprep.subr.mxu1 %v11531_v55 }
 0x3e4   :  { %3828 = vmatpush1.msra.mxu0 %v11796_v8  ;;  %3955 = vmatpush1.msra.mxu1 %v8361_v48  ;;  %v11799_v8 = vld [vmem:[#allocation63_spill] sm:$0xff] }
 0x3e5   :  { %3841 = vmatprep.subr.mxu0 %v11531_v55  ;;  %3956 = vmatprep.subr.mxu1 %v11531_v55 }
 0x3e6   :  { %3845 = vmatpush2.msra.mxu0 %v11797_v26  ;;  %3958 = vmatpush1.msra.mxu1 %v8389_v57  ;;  %v11800_v26 = vld [vmem:[#allocation67_spill] sm:$0xff] }
 0x3e7   :  { %3846 = vmatprep.subr.mxu0 %v11531_v55  ;;  %3959 = vmatprep.subr.mxu1 %v11531_v55 }
 0x3e8   :  { %3850 = vmatpush2.msra.mxu0 %v11798_v49  ;;  %3961 = vmatpush1.msra.mxu1 %v8402_v61  ;;  %v11801_v49 = vld [vmem:[#allocation71_spill] sm:$0xff] }
 0x3e9   :  { %3851 = vmatprep.subr.mxu0 %v11531_v55  ;;  %3962 = vmatprep.subr.mxu1 %v11531_v55 }
 0x3ea   :  { %3855 = vmatpush2.msra.mxu0 %v11799_v8  ;;  %3964 = vmatpush1.msra.mxu1 %v8421_v7  ;;  %v11802_v8 = vld [vmem:[#allocation75_spill] sm:$0xff] }
 0x3eb   :  { %3856 = vmatprep.subr.mxu0 %v11531_v55  ;;  %3965 = vmatprep.subr.mxu1 %v11531_v55 }
 0x3ec   :  { %3860 = vmatpush2.msra.mxu0 %v11800_v26  ;;  %3967 = vmatpush1.msra.mxu1 %v8437_v19  ;;  %v11803_v26 = vld [vmem:[#allocation79_spill] sm:$0xff] }
 0x3ed   :  { %3861 = vmatprep.subr.mxu0 %v11531_v55  ;;  %3980 = vmatprep.subr.mxu1 %v11531_v55 }
 0x3ee   :  { %3865 = vmatpush2.msra.mxu0 %v11801_v49  ;;  %3982 = vmatpush2.msra.mxu1 %v11583_v54  ;;  %v11804_v49 = vld [vmem:[#allocation82_spill] sm:$0xff] }
 0x3ef   :  { %3866 = vmatprep.subr.mxu0 %v11531_v55  ;;  %3983 = vmatprep.subr.mxu1 %v11531_v55 }
 0x3f0   :  { %3870 = vmatpush2.msra.mxu0 %v11802_v8  ;;  %3985 = vmatpush2.msra.mxu1 %v11584_v62  ;;  %v11805_v8 = vld [vmem:[#allocation85_spill] sm:$0xff] }
 0x3f1   :  { %3871 = vmatprep.subr.mxu0 %v11531_v55  ;;  %3986 = vmatprep.subr.mxu1 %v11531_v55 }
 0x3f2   :  { %3875 = vmatpush2.msra.mxu0 %v11803_v26  ;;  %3988 = vmatpush2.msra.mxu1 %v11585_v20  ;;  %v11806_v26 = vld [vmem:[#allocation87_spill] sm:$0xff] }
 0x3f3   :  { %3876 = vmatprep.subr.mxu0 %v11531_v55  ;;  %3989 = vmatprep.subr.mxu1 %v11531_v55 }
 0x3f4   :  { %3880 = vmatpush2.msra.mxu0 %v11804_v49  ;;  %3991 = vmatpush2.msra.mxu1 %v11586_v36 }
 0x3f5   :  { %3881 = vmatprep.subr.mxu0 %v11531_v55  ;;  %3992 = vmatprep.subr.mxu1 %v11531_v55 }
 0x3f6   :  { %3885 = vmatpush2.msra.mxu0 %v11805_v8  ;;  %3994 = vmatpush2.msra.mxu1 %v8540_v63 }
 0x3f7   :  { %3886 = vmatprep.subr.mxu0 %v11531_v55  ;;  %3995 = vmatprep.subr.mxu1 %v11531_v55 }
 0x3f8   :  { %3890 = vmatpush2.msra.mxu0 %v11806_v26  ;;  %3892 = vmatprep.mubr.f32.mxu0 %v9744_v14 }
 0x3f9   :  { %3997 = vmatpush2.msra.mxu1 %v11587_v29  ;;  %3894 = vmatmul.mubr.f32.vlgmr.msra.gmra.mxu0 %v9748_v51  ;;  %v7884_v49 = vpop.f32.mrf.mxu0 }
 0x3fa   :  { %3998 = vmatprep.subr.mxu1 %v11531_v55  ;;  %3899 = vmatprep.mubr.f32.mxu0 %v9852_v24 }
 0x3fb   :  { %4000 = vmatpush2.msra.mxu1 %v11731_v53  ;;  %4011 = vmatprep.mubr.f32.mxu1 %v9744_v14  ;;  %v2608_v26 = vpop.f32.mrf.mxu0 }
 0x3fc   :  { %4001 = vmatprep.subr.mxu1 %v11531_v55 }
 0x3fd   :  { %4003 = vmatpush2.msra.mxu1 %v11733_v41  ;;  %3901 = vmatmul.mubr.f32.gmra.mxu0 %v9856_v31 }
 0x3fe   :  { %4004 = vmatprep.subr.mxu1 %v11531_v55  ;;  %3906 = vmatprep.mubr.f32.mxu0 %v9879_v23 }
 0x3ff   :  { %4006 = vmatpush2.msra.mxu1 %v11735_v1 }
 0x400   :  { %4007 = vmatprep.subr.mxu1 %v11531_v55  ;;  %v7895_v8 = vpop.f32.mrf.mxu1 }
 0x401   :  { %4009 = vmatpush2.msra.mxu1 %v11737_v43  ;;  %3908 = vmatmul.mubr.f32.gmra.mxu0 %v9883_v16  ;;  %v2716_v14 = vadd.f32 %v7895_v8, %v7884_v49 }
 0x402   :  { %4013 = vmatmul.mubr.f32.vlgmr.msra.gmra.mxu1 %v9748_v51  ;;  %3913 = vmatprep.mubr.f32.mxu0 %v9905_v33  ;;  %v2709_v42 = vpop.f32.mrf.mxu1  ;;  %v7906_v56 = vpop.f32.mrf.mxu0 }
 0x403   :  { %4018 = vmatprep.mubr.f32.mxu1 %v9852_v24  ;;  %v2710_v39 = vadd.f32 %v2709_v42, %v2608_v26  ;;  %v2803_v60 = vadd.f32 %v7906_v56, %v2716_v14 }
 0x404   :  { %v2795_v32 = vpop.f32.mrf.mxu0 }
 0x405   :  { %3915 = vmatmul.mubr.f32.gmra.mxu0 %v9914_v44  ;;  %v2796_v0 = vadd.f32 %v2795_v32, %v2710_v39 }
 0x406   :  { %4020 = vmatmul.mubr.f32.gmra.mxu1 %v9856_v31  ;;  %7948 = vmatprep.mubr.f32.mxu0 %v11807_v18 }
 0x407   :  { %4025 = vmatprep.mubr.f32.mxu1 %v9879_v23  ;;  %v11808_v23 = vld [vmem:[#allocation17_spill] sm:$0xff] }
 0x40a   :  { %4027 = vmatmul.mubr.f32.gmra.mxu1 %v9883_v16  ;;  %v7917_v51 = vpop.f32.mrf.mxu1  ;;  %v10143_v16 = vmul.f32 %v11808_v23, %v11808_v23 }
 0x40b   :  { %4032 = vmatprep.mubr.f32.mxu1 %v9905_v33  ;;  %v2888_v8 = vadd.f32 %v7917_v51, %v2803_v60 }
 0x40c   :  { %v2879_v49 = vpop.f32.mrf.mxu1  ;;  %v7928_v24 = vpop.f32.mrf.mxu0  ;;  %11809 = vst [vmem:[#allocation17_spill] sm:$0xff] %v10143_v16 }
 0x40d   :  { %v2880_v42 = vadd.f32 %v2879_v49, %v2796_v0  ;;  %v2977_v56 = vadd.f32 %v7928_v24, %v2888_v8 }
 0x40e   :  { %4034 = vmatmul.mubr.f32.gmra.mxu1 %v9914_v44  ;;  %v2970_v26 = vpop.f32.mrf.mxu0 }
 0x40f   :  { %v2971_v32 = vadd.f32 %v2970_v26, %v2880_v42  ;;  %7959 = vmatprep.mubr.f32.mxu1 %v9079_v21 }
 0x414   :  { %v7939_v31 = vpop.f32.mrf.mxu1 }
 0x415   :  { %v3058_v39 = vadd.f32 %v7939_v31, %v2977_v56 }
 0x416   :  { %v3051_v14 = vpop.f32.mrf.mxu1 }
 0x417   :  { %v10145_v18 = vmul.f32 %v3058_v39, %v3058_v39  ;;  %v10148_v33 = vmul.f32 %v3058_v39, %v11808_v23  ;;  %v10150_v0 = vadd.f32 %v3051_v14, %v2971_v32 }
 0x419   :  { %11810 = vst [vmem:[#allocation92_spill] sm:$0xff] %v10145_v18  ;;  %11811 = vst [vmem:[#allocation93_spill] sm:$0xff] %v10148_v33  ;;  %v10154_v44 = vadd.f32 %v10145_v18, %v10143_v16 }
 0x41a   :  { %11812 = vst [vmem:[#allocation94_spill] sm:$0xff] %v10150_v0 }
 0x41b   :  { %11813 = vst [vmem:[#allocation95_spill] sm:$0xff] %v10154_v44 }
 0x442   :  { %v3189_v60 = vpop.f32.mrf.mxu0 }
 0x444   :  { %v3191_v51 = vpop.f32.mrf.mxu0 }
 0x44a   :  { %v3436_v8 = vpop.f32.mrf.mxu1 }
 0x44b   :  { %v3437_v49 = vadd.f32 %v3436_v8, %v3189_v60 }
 0x44c   :  { %v3438_v24 = vpop.f32.mrf.mxu1 }
 0x46b   :  { %v3204_v42 = vpop.f32.mrf.mxu0 }
 0x46d   :  { %v3206_v56 = vpop.f32.mrf.mxu0 }
 0x470   :  { %v3219_v26 = vpop.f32.mrf.mxu0 }
 0x472   :  { %v3221_v31 = vpop.f32.mrf.mxu0 }
 0x475   :  { %v3443_v47 = vpop.f32.mrf.mxu1 }
 0x476   :  { %v3444_v40 = vadd.f32 %v3443_v47, %v3204_v42  ;;  %v3234_v38 = vpop.f32.mrf.mxu0 }
 0x477   :  { %v3445_v39 = vpop.f32.mrf.mxu1 }
 0x478   :  { %v3236_v23 = vpop.f32.mrf.mxu0 }
 0x47a   :  { %v3450_v32 = vpop.f32.mrf.mxu1 }
 0x47b   :  { %v3451_v14 = vadd.f32 %v3450_v32, %v3219_v26 }
 0x47c   :  { %v3583_v33 = vpop.f32.mrf.mxu0  ;;  %v3452_v0 = vpop.f32.mrf.mxu1 }
 0x47d   :  { %v3584_v18 = vadd.f32 %v3583_v33, %v3437_v49 }
 0x47e   :  { %v3585_v44 = vpop.f32.mrf.mxu0 }
 0x480   :  { %v3457_v16 = vpop.f32.mrf.mxu1 }
 0x481   :  { %v3458_v51 = vadd.f32 %v3457_v16, %v3234_v38 }
 0x482   :  { %v3459_v3 = vpop.f32.mrf.mxu1 }
 0x483   :  { %v3592_v60 = vpop.f32.mrf.mxu0 }
 0x484   :  { %v3593_v8 = vadd.f32 %v3592_v60, %v3444_v40 }
 0x485   :  { %v3594_v24 = vpop.f32.mrf.mxu0 }
 0x488   :  { %v3601_v56 = vpop.f32.mrf.mxu0  ;;  %v3712_v34 = vpop.f32.mrf.mxu1 }
 0x489   :  { %v3602_v31 = vadd.f32 %v3601_v56, %v3451_v14  ;;  %v3713_v59 = vadd.f32 %v3712_v34, %v3584_v18 }
 0x48a   :  { %v3603_v47 = vpop.f32.mrf.mxu0  ;;  %v3714_v42 = vpop.f32.mrf.mxu1 }
 0x48e   :  { %v3610_v39 = vpop.f32.mrf.mxu0  ;;  %v3723_v23 = vpop.f32.mrf.mxu1 }
 0x48f   :  { %v3724_v58 = vadd.f32 %v3723_v23, %v3593_v8  ;;  %v3611_v23 = vadd.f32 %v3610_v39, %v3458_v51 }
 0x490   :  { %v3725_v26 = vpop.f32.mrf.mxu1  ;;  %v3612_v32 = vpop.f32.mrf.mxu0 }
 0x494   :  { %v3734_v0 = vpop.f32.mrf.mxu1 }
 0x495   :  { %v3735_v56 = vadd.f32 %v3734_v0, %v3602_v31 }
 0x496   :  { %v3736_v33 = vpop.f32.mrf.mxu1 }
 0x499   :  { %v3745_v44 = vpop.f32.mrf.mxu1 }
 0x49b   :  { %v3747_v49 = vpop.f32.mrf.mxu1 }
 0x49c   :  { %v3746_v49 = vadd.f32 %v3745_v44, %v3611_v23  ;;  %v11816_v23 = vld [vmem:[#allocation30_spill] sm:$0xff] }
 0x4b9   :  { %v3895_v38 = vpop.f32.mrf.mxu0 }
 0x4ba   :  { %v3896_v32 = vadd.f32 %v3895_v38, %v3713_v59 }
 0x4bb   :  { %v3897_v3 = vpop.f32.mrf.mxu0 }
 0x4bd   :  { %v3902_v16 = vpop.f32.mrf.mxu0 }
 0x4be   :  { %v3903_v42 = vadd.f32 %v3902_v16, %v3724_v58 }
 0x4bf   :  { %v3904_v40 = vpop.f32.mrf.mxu0 }
 0x4c1   :  { %v3909_v60 = vpop.f32.mrf.mxu0 }
 0x4c2   :  { %v4014_v24 = vpop.f32.mrf.mxu1  ;;  %v3910_v26 = vadd.f32 %v3909_v60, %v3735_v56 }
 0x4c3   :  { %v3911_v50 = vpop.f32.mrf.mxu0  ;;  %v4015_v3 = vadd.f32 %v4014_v24, %v3896_v32  ;;  %v11818_v32 = vld [vmem:[#allocation36_spill] sm:$0xff] }
 0x4c4   :  { %v4016_v14 = vpop.f32.mrf.mxu1 }
 0x4c5   :  { %v3916_v34 = vpop.f32.mrf.mxu0  ;;  %v10160_v31 = vand.u32 4294901760, %v4015_v3 }
 0x4c6   :  { %v4021_v18 = vpop.f32.mrf.mxu1  ;;  %v3917_v40 = vadd.f32 %v3916_v34, %v3746_v49  ;;  %v8152_v49 = vld [vmem:[%s11276_s3 + $0x8] sm:$0xff] }
 0x4c7   :  { %v3918_v47 = vpop.f32.mrf.mxu0  ;;  %v4022_v33 = vadd.f32 %v4021_v18, %v3903_v42 }
 0x4c8   :  { %v4023_v8 = vpop.f32.mrf.mxu1 }
 0x4c9   :  { %v10158_v50 = vand.u32 4294901760, %v4022_v33  ;;  %v11815_v8 = vld [vmem:[#allocation27_spill] sm:$0xff] }
 0x4ca   :  { %v4028_v27 = vpop.f32.mrf.mxu1 }
 0x4cb   :  { %v4029_v43 = vadd.f32 %v4028_v27, %v3910_v26  ;;  %v4171_v39 = vsub.f32 %v4022_v33, %v10158_v50  ;;  %v11817_v26 = vld [vmem:[#allocation33_spill] sm:$0xff]  ;;  %v11819_v33 = vld [vmem:[#allocation40_spill] sm:$0xff] }
 0x4cc   :  { %v4030_v1 = vpop.f32.mrf.mxu1 }
 0x4cd   :  { %v10156_v41 = vand.u32 4294901760, %v4029_v43  ;;  %v4178_v1 = vsub.f32 %v4015_v3, %v10160_v31  ;;  %v4573_v3 = vmul.f32 %v8152_v49, %v8152_v49  ;;  %v11832_v49 = vld [vmem:[#allocation81_spill] sm:$0xff] }
 0x4ce   :  { %v4035_v14 = vpop.f32.mrf.mxu1 }
 0x4cf   :  { %v4036_v53 = vadd.f32 %v4035_v14, %v3917_v40  ;;  %v4164_v58 = vsub.f32 %v4029_v43, %v10156_v41  ;;  %v4172_v43 = vand.u32 4294901760, %v4171_v39  ;;  %v4179_v60 = vand.u32 4294901760, %v4178_v1  ;;  %v11820_v40 = vld [vmem:[#allocation44_spill] sm:$0xff] }
 0x4d0   :  { %v4037_v51 = vpop.f32.mrf.mxu1  ;;  %v4581_v14 = vsel %vm62_vm0, %v4573_v3, 0 }
 0x4d1   :  { %v4040_v59 = vsel %vm1034_vm2, %v4036_v53, 0  ;;  %v4165_v44 = vand.u32 4294901760, %v4164_v58  ;;  %v4173_v34 = vsub.f32 %v4171_v39, %v4172_v43  ;;  %v4180_v56 = vsub.f32 %v4178_v1, %v4179_v60  ;;  %v11822_v51 = vld [vmem:[#allocation52_spill] sm:$0xff] }
 0x4d2   :  { %v10165_v0 = vand.u32 4294901760, %v4040_v59 }
 0x4d3   :  { %v4166_v16 = vsub.f32 %v4164_v58, %v4165_v44  ;;  %v4174_v47 = vand.u32 4294901760, %v4173_v34  ;;  %v4181_v42 = vand.u32 4294901760, %v4180_v56  ;;  %v11830_v56 = vld [vmem:[#allocation78_spill] sm:$0xff] }
 0x4d4   :  { %v4157_v27 = vsub.f32 %v4040_v59, %v10165_v0  ;;  %7940 = vmatprep.subr.mxu0 %v10165_v0  ;;  %v10268_v59 = vand.u32 4294901760, %v4581_v14 }
 0x4d5   :  { %7941 = vmatpush3.msra.mxu0 %v10165_v0  ;;  %v4167_v18 = vand.u32 4294901760, %v4166_v16  ;;  %v11827_v16 = vld [vmem:[#allocation70_spill] sm:$0xff] }
 0x4d6   :  { %7942 = vmatprep.subr.mxu0 %v10156_v41  ;;  %v4158_v38 = vand.u32 4294901760, %v4157_v27 }
 0x4d7   :  { %7943 = vmatpush3.msra.mxu0 %v10156_v41 }
 0x4d8   :  { %7944 = vmatprep.subr.mxu0 %v10158_v50  ;;  %v4159_v53 = vsub.f32 %v4157_v27, %v4158_v38 }
 0x4d9   :  { %7945 = vmatpush3.msra.mxu0 %v10158_v50 }
 0x4da   :  { %7946 = vmatprep.subr.mxu0 %v10160_v31  ;;  %v4160_v24 = vand.u32 4294901760, %v4159_v53 }
 0x4db   :  { %7947 = vmatpush3.msra.mxu0 %v10160_v31 }
 0x4dc   :  { %7951 = vmatprep.subr.mxu1 %v4160_v24  ;;  %7962 = vmatprep.subr.mxu0 %v4157_v27 }
 0x4dd   :  { %7949 = vmatmul.mubr.f32.vlgmr.msra.gmra.mxu0 %v9126_v52  ;;  %7952 = vmatpush3.msra.mxu1 %v4160_v24  ;;  %v11828_v24 = vld [vmem:[#allocation74_spill] sm:$0xff] }
 0x4de   :  { %7963 = vmatpush3.msra.mxu0 %v4157_v27  ;;  %7953 = vmatprep.subr.mxu1 %v4167_v18  ;;  %v10281_v27 = vsub.f32 %v4581_v14, %v10268_v59  ;;  %v11833_v14 = vld [vmem:[#allocation72_spill] sm:$0xff] }
 0x4df   :  { %7964 = vmatprep.subr.mxu0 %v4164_v58  ;;  %7954 = vmatpush3.msra.mxu1 %v4167_v18  ;;  %v11829_v18 = vld [vmem:[#allocation65_spill] sm:$0xff] }
 0x4e0   :  { %7965 = vmatpush3.msra.mxu0 %v4164_v58  ;;  %7955 = vmatprep.subr.mxu1 %v4174_v47  ;;  %v11478_v53 = vand.u32 4294901760, %v10281_v27 }
 0x4e1   :  { %7966 = vmatprep.subr.mxu0 %v4171_v39  ;;  %7956 = vmatpush3.msra.mxu1 %v4174_v47 }
 0x4e2   :  { %7967 = vmatpush3.msra.mxu0 %v4171_v39  ;;  %7957 = vmatprep.subr.mxu1 %v4181_v42  ;;  %v11823_v39 = vld [vmem:[#allocation55_spill] sm:$0xff]  ;;  %v4685_v34 = vsub.f32 %v10281_v27, %v11478_v53  ;;  %v11836_v53 = vld [vmem:[#allocation86_spill] sm:$0xff] }
 0x4e3   :  { %7968 = vmatprep.subr.mxu0 %v4178_v1  ;;  %7958 = vmatpush3.msra.mxu1 %v4181_v42  ;;  %v11831_v42 = vld [vmem:[#allocation69_spill] sm:$0xff] }
 0x4e4   :  { %7969 = vmatpush3.msra.mxu0 %v4178_v1  ;;  %7960 = vmatmul.mubr.f32.vlgmr.msra.gmra.mxu1 %v9097_v9  ;;  %v11824_v1 = vld [vmem:[#allocation59_spill] sm:$0xff]  ;;  %v4686_v3 = vand.u32 4294901760, %v4685_v34  ;;  %v11837_v34 = vld [vmem:[#allocation88_spill] sm:$0xff] }
 0x4e5   :  { %7970 = vmatprep.mubr.f32.mxu0 %v9082_v30  ;;  %7973 = vmatprep.subr.mxu1 %v10165_v0 }
 0x4e6   :  { %7984 = vmatprep.subr.mxu0 %v4158_v38  ;;  %7971 = vmatmul.mubr.f32.vlgmr.msra.gmra.mxu0 %v9102_v37 }
 0x4e7   :  { %7974 = vmatpush3.msra.mxu1 %v10165_v0  ;;  %7985 = vmatpush3.msra.mxu0 %v4158_v38 }
 0x4e8   :  { %7975 = vmatprep.subr.mxu1 %v10156_v41  ;;  %7986 = vmatprep.subr.mxu0 %v4165_v44 }
 0x4e9   :  { %7976 = vmatpush3.msra.mxu1 %v10156_v41  ;;  %7987 = vmatpush3.msra.mxu0 %v4165_v44  ;;  %v11825_v44 = vld [vmem:[#allocation62_spill] sm:$0xff] }
 0x4ea   :  { %7977 = vmatprep.subr.mxu1 %v10158_v50  ;;  %7988 = vmatprep.subr.mxu0 %v4172_v43 }
 0x4eb   :  { %7978 = vmatpush3.msra.mxu1 %v10158_v50  ;;  %7989 = vmatpush3.msra.mxu0 %v4172_v43  ;;  %v11826_v43 = vld [vmem:[#allocation66_spill] sm:$0xff] }
 0x4ec   :  { %7979 = vmatprep.subr.mxu1 %v10160_v31  ;;  %7990 = vmatprep.subr.mxu0 %v4179_v60 }
 0x4ed   :  { %7980 = vmatpush3.msra.mxu1 %v10160_v31  ;;  %7981 = vmatprep.mubr.f32.mxu1 %v9086_v2 }
 0x4ee   :  { %7991 = vmatpush3.msra.mxu0 %v4179_v60  ;;  %7982 = vmatmul.mubr.f32.vlgmr.msra.gmra.mxu1 %v9111_v22 }
 0x4ef   :  { %7992 = vmatprep.mubr.f32.mxu0 %v9079_v21  ;;  %7995 = vmatprep.subr.mxu1 %v10165_v0 }
 0x4f0   :  { %4592 = vmatprep.subr.mxu0 %v11531_v55  ;;  %7993 = vmatmul.mubr.f32.vlgmr.msra.gmra.mxu0 %v9097_v9 }
 0x4f1   :  { %7996 = vmatpush3.msra.mxu1 %v10165_v0  ;;  %4594 = vmatpush1.msra.mxu0 %v8235_v4 }
 0x4f2   :  { %7997 = vmatprep.subr.mxu1 %v10156_v41  ;;  %4595 = vmatprep.subr.mxu0 %v11531_v55 }
 0x4f3   :  { %7998 = vmatpush3.msra.mxu1 %v10156_v41  ;;  %4597 = vmatpush1.msra.mxu0 %v8237_v5  ;;  %v11814_v41 = vld [vmem:[#allocation24_spill] sm:$0xff] }
 0x4f4   :  { %7999 = vmatprep.subr.mxu1 %v10158_v50  ;;  %4598 = vmatprep.subr.mxu0 %v11531_v55 }
 0x4f5   :  { %8000 = vmatpush3.msra.mxu1 %v10158_v50  ;;  %4600 = vmatpush1.msra.mxu0 %v8239_v6  ;;  %v11821_v50 = vld [vmem:[#allocation48_spill] sm:$0xff] }
 0x4f6   :  { %8001 = vmatprep.subr.mxu1 %v10160_v31  ;;  %4601 = vmatprep.subr.mxu0 %v11531_v55 }
 0x4f7   :  { %8002 = vmatpush3.msra.mxu1 %v10160_v31  ;;  %8003 = vmatprep.mubr.f32.mxu1 %v9079_v21  ;;  %v8153_v31 = vld [vmem:[%s11276_s3] sm:$0xff] }
 0x4f8   :  { %4603 = vmatpush1.msra.mxu0 %v8251_v10  ;;  %8004 = vmatmul.mubr.f32.vlgmr.msra.gmra.mxu1 %v9097_v9  ;;  %v4572_v58 = vmul.f32 %v8153_v31, %v8153_v31  ;;  %v11834_v31 = vld [vmem:[#allocation84_spill] sm:$0xff] }
 0x4f9   :  { %4604 = vmatprep.subr.mxu0 %v11531_v55  ;;  %4743 = vmatprep.subr.mxu1 %v11531_v55 }
 0x4fa   :  { %4606 = vmatpush1.msra.mxu0 %v8253_v11  ;;  %4749 = vmatpush1.msra.mxu1 %v11621_v15  ;;  %v10272_v0 = vand.u32 4294901760, %v4572_v58 }
 0x4fb   :  { %4607 = vmatprep.subr.mxu0 %v11531_v55  ;;  %4750 = vmatprep.subr.mxu1 %v11531_v55 }
 0x4fc   :  { %4609 = vmatpush1.msra.mxu0 %v8255_v12  ;;  %4756 = vmatpush1.msra.mxu1 %v11622_v46  ;;  %v10286_v38 = vsub.f32 %v4572_v58, %v10272_v0 }
 0x4fd   :  { %4610 = vmatprep.subr.mxu0 %v11531_v55  ;;  %4757 = vmatprep.subr.mxu1 %v11531_v55 }
 0x4fe   :  { %4612 = vmatpush1.msra.mxu0 %v8270_v17  ;;  %4763 = vmatpush1.msra.mxu1 %v11623_v13  ;;  %v11477_v60 = vand.u32 4294901760, %v10286_v38 }
 0x4ff   :  { %4613 = vmatprep.subr.mxu0 %v11531_v55  ;;  %4764 = vmatprep.subr.mxu1 %v11531_v55 }
 0x500   :  { %4615 = vmatpush1.msra.mxu0 %v8295_v25  ;;  %4770 = vmatpush1.msra.mxu1 %v11814_v41  ;;  %v4691_v47 = vsub.f32 %v10286_v38, %v11477_v60  ;;  %v11835_v60 = vld [vmem:[#allocation76_spill] sm:$0xff] }
 0x501   :  { %4616 = vmatprep.subr.mxu0 %v11531_v55  ;;  %4771 = vmatprep.subr.mxu1 %v11531_v55  ;;  %v11865_v41 = vld [vmem:[#allocation64_spill] sm:$0xff] }
 0x502   :  { %4618 = vmatpush1.msra.mxu0 %v8304_v28  ;;  %4777 = vmatpush1.msra.mxu1 %v11815_v8  ;;  %v4692_v58 = vand.u32 4294901760, %v4691_v47  ;;  %v11839_v47 = vld [vmem:[#allocation89_spill] sm:$0xff] }
 0x503   :  { %4619 = vmatprep.subr.mxu0 %v11531_v55  ;;  %4778 = vmatprep.subr.mxu1 %v11531_v55 }
 0x504   :  { %4621 = vmatpush1.msra.mxu0 %v8323_v35  ;;  %4784 = vmatpush1.msra.mxu1 %v11816_v23  ;;  %v11862_v23 = vld [vmem:[#allocation57_spill] sm:$0xff] }
 0x505   :  { %4622 = vmatprep.subr.mxu0 %v11531_v55  ;;  %4785 = vmatprep.subr.mxu1 %v11531_v55 }
 0x506   :  { %4624 = vmatpush1.msra.mxu0 %v8351_v45  ;;  %4791 = vmatpush1.msra.mxu1 %v11817_v26  ;;  %v11860_v26 = vld [vmem:[#allocation54_spill] sm:$0xff] }
 0x507   :  { %4625 = vmatprep.subr.mxu0 %v11531_v55  ;;  %4792 = vmatprep.subr.mxu1 %v11531_v55 }
 0x508   :  { %4627 = vmatpush1.msra.mxu0 %v8361_v48  ;;  %4798 = vmatpush1.msra.mxu1 %v11818_v32  ;;  %v11859_v32 = vld [vmem:[#allocation50_spill] sm:$0xff] }
 0x509   :  { %4628 = vmatprep.subr.mxu0 %v11531_v55  ;;  %4799 = vmatprep.subr.mxu1 %v11531_v55 }
 0x50a   :  { %4630 = vmatpush1.msra.mxu0 %v8389_v57  ;;  %4805 = vmatpush1.msra.mxu1 %v11819_v33 }
 0x50b   :  { %4631 = vmatprep.subr.mxu0 %v11531_v55  ;;  %4806 = vmatprep.subr.mxu1 %v11531_v55 }
 0x50c   :  { %4633 = vmatpush1.msra.mxu0 %v8402_v61  ;;  %4812 = vmatpush1.msra.mxu1 %v11820_v40 }
 0x50d   :  { %4634 = vmatprep.subr.mxu0 %v11531_v55  ;;  %4813 = vmatprep.subr.mxu1 %v11531_v55 }
 0x50e   :  { %4636 = vmatpush1.msra.mxu0 %v8421_v7  ;;  %4819 = vmatpush1.msra.mxu1 %v11821_v50 }
 0x50f   :  { %4637 = vmatprep.subr.mxu0 %v11531_v55  ;;  %4820 = vmatprep.subr.mxu1 %v11531_v55 }
 0x510   :  { %4639 = vmatpush1.msra.mxu0 %v8437_v19  ;;  %4826 = vmatpush1.msra.mxu1 %v11822_v51 }
 0x511   :  { %4652 = vmatprep.subr.mxu0 %v11531_v55  ;;  %4827 = vmatprep.subr.mxu1 %v11531_v55 }
 0x512   :  { %4654 = vmatpush2.msra.mxu0 %v11583_v54  ;;  %4833 = vmatpush1.msra.mxu1 %v11823_v39 }
 0x513   :  { %4655 = vmatprep.subr.mxu0 %v11531_v55  ;;  %4834 = vmatprep.subr.mxu1 %v11531_v55 }
 0x514   :  { %4657 = vmatpush2.msra.mxu0 %v11584_v62  ;;  %4840 = vmatpush1.msra.mxu1 %v11824_v1  ;;  %v11853_v1 = vld [vmem:[#allocation35_spill] sm:$0xff] }
 0x515   :  { %4658 = vmatprep.subr.mxu0 %v11531_v55  ;;  %4841 = vmatprep.subr.mxu1 %v11531_v55 }
 0x516   :  { %4660 = vmatpush2.msra.mxu0 %v11585_v20  ;;  %4847 = vmatpush1.msra.mxu1 %v11825_v44  ;;  %v11852_v44 = vld [vmem:[#allocation32_spill] sm:$0xff] }
 0x517   :  { %4661 = vmatprep.subr.mxu0 %v11531_v55  ;;  %4848 = vmatprep.subr.mxu1 %v11531_v55 }
 0x518   :  { %4663 = vmatpush2.msra.mxu0 %v11586_v36  ;;  %4854 = vmatpush1.msra.mxu1 %v11826_v43 }
 0x519   :  { %4664 = vmatprep.subr.mxu0 %v11531_v55  ;;  %4867 = vmatprep.subr.mxu1 %v11531_v55 }
 0x51a   :  { %4666 = vmatpush2.msra.mxu0 %v8540_v63  ;;  %4873 = vmatpush2.msra.mxu1 %v11827_v16  ;;  %v8158_v16 = vld [vmem:[%s11276_s3 + $0x38] sm:$0x3] }
 0x51b   :  { %4667 = vmatprep.subr.mxu0 %v11531_v55  ;;  %4874 = vmatprep.subr.mxu1 %v11531_v55  ;;  %v4579_v43 = vmul.f32 %v8158_v16, %v8158_v16 }
 0x51c   :  { %4669 = vmatpush2.msra.mxu0 %v11587_v29  ;;  %4880 = vmatpush2.msra.mxu1 %v11828_v24 }
 0x51d   :  { %4670 = vmatprep.subr.mxu0 %v11531_v55  ;;  %4881 = vmatprep.subr.mxu1 %v11531_v55 }
 0x51e   :  { %4672 = vmatpush2.msra.mxu0 %v11829_v18  ;;  %4887 = vmatpush2.msra.mxu1 %v11830_v56  ;;  %v11850_v56 = vld [vmem:[#allocation26_spill] sm:$0xff] }
 0x51f   :  { %4673 = vmatprep.subr.mxu0 %v11531_v55  ;;  %4888 = vmatprep.subr.mxu1 %v11531_v55 }
 0x520   :  { %4675 = vmatpush2.msra.mxu0 %v11831_v42  ;;  %4894 = vmatpush2.msra.mxu1 %v11832_v49  ;;  %v11838_v49 = vld [vmem:[#allocation5_spill] sm:$0xff] }
 0x521   :  { %4676 = vmatprep.subr.mxu0 %v11531_v55  ;;  %4895 = vmatprep.subr.mxu1 %v11531_v55 }
 0x522   :  { %4678 = vmatpush2.msra.mxu0 %v11833_v14  ;;  %4901 = vmatpush2.msra.mxu1 %v11834_v31  ;;  %v11840_v31 = vld [vmem:[#allocation6_spill] sm:$0xff] }
 0x523   :  { %4679 = vmatprep.subr.mxu0 %v11531_v55  ;;  %4902 = vmatprep.subr.mxu1 %v11531_v55 }
 0x524   :  { %4681 = vmatpush2.msra.mxu0 %v11835_v60  ;;  %4908 = vmatpush2.msra.mxu1 %v11836_v53  ;;  %v11842_v53 = vld [vmem:[#allocation7_spill] sm:$0xff] }
 0x525   :  { %4687 = vmatprep.mubr.f32.mxu0 %v4686_v3  ;;  %4909 = vmatprep.subr.mxu1 %v11531_v55  ;;  %v11841_v3 = vld [vmem:[#allocation90_spill] sm:$0xff] }
 0x526   :  { %4966 = vmatprep.subr.mxu0 %v11531_v55  ;;  %4693 = vmatmul.mubr.f32.vlgmr.msra.gmra.mxu0 %v4692_v58  ;;  %v11843_v58 = vld [vmem:[#allocation91_spill] sm:$0xff] }
 0x527   :  { %4915 = vmatpush2.msra.mxu1 %v11837_v34  ;;  %4969 = vmatpush1.msra.mxu0 %v11838_v49  ;;  %v11844_v49 = vld [vmem:[#allocation8_spill] sm:$0xff] }
 0x528   :  { %4916 = vmatprep.subr.mxu1 %v11531_v55  ;;  %4970 = vmatprep.subr.mxu0 %v11531_v55 }
 0x529   :  { %4922 = vmatpush2.msra.mxu1 %v11839_v47  ;;  %4973 = vmatpush1.msra.mxu0 %v11840_v31  ;;  %v11845_v31 = vld [vmem:[#allocation9_spill] sm:$0xff]  ;;  %v11849_v47 = vld [vmem:[#allocation23_spill] sm:$0xff] }
 0x52a   :  { %4923 = vmatprep.subr.mxu1 %v11531_v55  ;;  %4974 = vmatprep.subr.mxu0 %v11531_v55 }
 0x52b   :  { %4929 = vmatpush2.msra.mxu1 %v11841_v3  ;;  %4977 = vmatpush1.msra.mxu0 %v11842_v53  ;;  %v11846_v53 = vld [vmem:[#allocation15_spill] sm:$0xff] }
 0x52c   :  { %4930 = vmatprep.subr.mxu1 %v11531_v55  ;;  %4978 = vmatprep.subr.mxu0 %v11531_v55 }
 0x52d   :  { %4936 = vmatpush2.msra.mxu1 %v11843_v58  ;;  %4938 = vmatprep.mubr.f32.mxu1 %v10268_v59 }
 0x52e   :  { %4981 = vmatpush1.msra.mxu0 %v11844_v49  ;;  %4940 = vmatmul.mubr.f32.vlgmr.msra.gmra.mxu1 %v10272_v0  ;;  %v8154_v49 = vld [vmem:[%s11276_s3 + $0x18] sm:$0xff] }
 0x52f   :  { %4982 = vmatprep.subr.mxu0 %v11531_v55  ;;  %5119 = vmatprep.subr.mxu1 %v11531_v55  ;;  %v4575_v58 = vmul.f32 %v8154_v49, %v8154_v49  ;;  %v8155_v49 = vld [vmem:[%s11276_s3 + $0x10] sm:$0xff] }
 0x530   :  { %4985 = vmatpush1.msra.mxu0 %v11845_v31  ;;  %5121 = vmatpush1.msra.mxu1 %v8235_v4  ;;  %v11847_v31 = vld [vmem:[#allocation16_spill] sm:$0xff] }
 0x531   :  { %4986 = vmatprep.subr.mxu0 %v11531_v55  ;;  %5122 = vmatprep.subr.mxu1 %v11531_v55  ;;  %v4584_v3 = vsel %vm62_vm0, %v4575_v58, 0 }
 0x532   :  { %4989 = vmatpush1.msra.mxu0 %v11846_v53  ;;  %5124 = vmatpush1.msra.mxu1 %v8237_v5  ;;  %v11848_v53 = vld [vmem:[#allocation20_spill] sm:$0xff]  ;;  %v10376_v58 = vand.u32 4294901760, %v4584_v3 }
 0x533   :  { %4990 = vmatprep.subr.mxu0 %v11531_v55  ;;  %5125 = vmatprep.subr.mxu1 %v11531_v55 }
 0x534   :  { %4993 = vmatpush1.msra.mxu0 %v11847_v31  ;;  %5127 = vmatpush1.msra.mxu1 %v8239_v6  ;;  %v4574_v31 = vmul.f32 %v8155_v49, %v8155_v49 }
 0x535   :  { %4994 = vmatprep.subr.mxu0 %v11531_v55  ;;  %5128 = vmatprep.subr.mxu1 %v11531_v55 }
 0x536   :  { %4997 = vmatpush1.msra.mxu0 %v11848_v53  ;;  %5130 = vmatpush1.msra.mxu1 %v8251_v10  ;;  %v8156_v53 = vld [vmem:[%s11276_s3 + $0x28] sm:$0xff]  ;;  %v10380_v49 = vand.u32 4294901760, %v4574_v31 }
 0x537   :  { %4998 = vmatprep.subr.mxu0 %v11531_v55  ;;  %5131 = vmatprep.subr.mxu1 %v11531_v55  ;;  %v4577_v34 = vmul.f32 %v8156_v53, %v8156_v53 }
 0x538   :  { %5001 = vmatpush1.msra.mxu0 %v11849_v47  ;;  %5133 = vmatpush1.msra.mxu1 %v8253_v11  ;;  %v11851_v47 = vld [vmem:[#allocation29_spill] sm:$0xff] }
 0x539   :  { %5002 = vmatprep.subr.mxu0 %v11531_v55  ;;  %5134 = vmatprep.subr.mxu1 %v11531_v55  ;;  %v4587_v53 = vsel %vm62_vm0, %v4577_v34, 0  ;;  %v10396_v34 = vsub.f32 %v4584_v3, %v10376_v58  ;;  %v4590_v3 = vsel %vm62_vm0, %v4579_v43, 0  ;;  %v11855_v43 = vld [vmem:[#allocation39_spill] sm:$0xff] }
 0x53a   :  { %5005 = vmatpush1.msra.mxu0 %v11850_v56  ;;  %5136 = vmatpush1.msra.mxu1 %v8255_v12  ;;  %v8157_v56 = vld [vmem:[%s11276_s3 + $0x20] sm:$0xff] }
 0x53b   :  { %5006 = vmatprep.subr.mxu0 %v11531_v55  ;;  %5137 = vmatprep.subr.mxu1 %v11531_v55  ;;  %v4576_v24 = vmul.f32 %v8157_v56, %v8157_v56  ;;  %v10401_v56 = vsub.f32 %v4574_v31, %v10380_v49 }
 0x53c   :  { %5009 = vmatpush1.msra.mxu0 %v11851_v47  ;;  %5139 = vmatpush1.msra.mxu1 %v8270_v17  ;;  %v10403_v47 = vand.u32 4294901760, %v4587_v53 }
 0x53d   :  { %5010 = vmatprep.subr.mxu0 %v11531_v55  ;;  %5140 = vmatprep.subr.mxu1 %v11531_v55  ;;  %v10407_v16 = vand.u32 4294901760, %v4576_v24 }
 0x53e   :  { %5013 = vmatpush1.msra.mxu0 %v11852_v44  ;;  %5142 = vmatpush1.msra.mxu1 %v8295_v25  ;;  %v11854_v44 = vld [vmem:[#allocation38_spill] sm:$0xff]  ;;  %v10422_v50 = vsub.f32 %v4587_v53, %v10403_v47  ;;  %v11857_v53 = vand.u32 4294901760, %v10396_v34 }
 0x53f   :  { %5014 = vmatprep.subr.mxu0 %v11531_v55  ;;  %5143 = vmatprep.subr.mxu1 %v11531_v55  ;;  %v10427_v31 = vsub.f32 %v4576_v24, %v10407_v16  ;;  %v11858_v24 = vand.u32 4294901760, %v10401_v56 }
 0x540   :  { %5017 = vmatpush1.msra.mxu0 %v11853_v1  ;;  %5145 = vmatpush1.msra.mxu1 %v8304_v28  ;;  %v8159_v1 = vld [vmem:[%s11276_s3 + $0x30] sm:$0x3]  ;;  %v4700_v51 = vsub.f32 %v10396_v34, %v11857_v53 }
 0x541   :  { %5018 = vmatprep.subr.mxu0 %v11531_v55  ;;  %5146 = vmatprep.subr.mxu1 %v11531_v55  ;;  %v4578_v39 = vmul.f32 %v8159_v1, %v8159_v1  ;;  %v11856_v1 = vld [vmem:[#allocation46_spill] sm:$0xff]  ;;  %v4706_v40 = vsub.f32 %v10401_v56, %v11858_v24 }
 0x542   :  { %5021 = vmatpush1.msra.mxu0 %v11854_v44  ;;  %5148 = vmatpush1.msra.mxu1 %v8323_v35  ;;  %v10429_v44 = vand.u32 4294901760, %v4590_v3  ;;  %v4701_v24 = vand.u32 4294901760, %v4700_v51 }
 0x543   :  { %5022 = vmatprep.subr.mxu0 %v11531_v55  ;;  %5149 = vmatprep.subr.mxu1 %v11531_v55 }
 0x544   :  { %5025 = vmatpush1.msra.mxu0 %v11855_v43  ;;  %5151 = vmatpush1.msra.mxu1 %v8351_v45  ;;  %v10438_v43 = vand.u32 4294901760, %v4578_v39  ;;  %v10450_v53 = vsub.f32 %v4590_v3, %v10429_v44  ;;  %v11861_v3 = vand.u32 4294901760, %v10422_v50 }
 0x545   :  { %5026 = vmatprep.subr.mxu0 %v11531_v55  ;;  %5152 = vmatprep.subr.mxu1 %v11531_v55 }
 0x546   :  { %5029 = vmatpush1.msra.mxu0 %v11856_v1  ;;  %5154 = vmatpush1.msra.mxu1 %v8361_v48  ;;  %v10457_v33 = vsub.f32 %v4578_v39, %v10438_v43  ;;  %v4707_v1 = vand.u32 4294901760, %v4706_v40  ;;  %v11479_v39 = vand.u32 4294901760, %v10450_v53  ;;  %v11864_v40 = vld [vmem:[#allocation61_spill] sm:$0xff] }
 0x547   :  { %5042 = vmatprep.subr.mxu0 %v11531_v55  ;;  %5155 = vmatprep.subr.mxu1 %v11531_v55 }
 0x548   :  { %5045 = vmatpush2.msra.mxu0 %v11859_v32  ;;  %5157 = vmatpush1.msra.mxu1 %v8389_v57  ;;  %v4715_v32 = vsub.f32 %v10422_v50, %v11861_v3  ;;  %v11480_v8 = vand.u32 4294901760, %v10457_v33 }
 0x549   :  { %5046 = vmatprep.subr.mxu0 %v11531_v55  ;;  %5158 = vmatprep.subr.mxu1 %v11531_v55 }
 0x54a   :  { %5049 = vmatpush2.msra.mxu0 %v11860_v26  ;;  %5160 = vmatpush1.msra.mxu1 %v8402_v61  ;;  %v11863_v26 = vand.u32 4294901760, %v10427_v31  ;;  %v4716_v3 = vand.u32 4294901760, %v4715_v32  ;;  %v4736_v32 = vsub.f32 %v10457_v33, %v11480_v8  ;;  %v11874_v8 = vand.u32 4294901760, %v10281_v27 }
 0x54b   :  { %5050 = vmatprep.subr.mxu0 %v11531_v55  ;;  %5161 = vmatprep.subr.mxu1 %v11531_v55 }
 0x54c   :  { %5053 = vmatpush2.msra.mxu0 %v11862_v23  ;;  %5163 = vmatpush1.msra.mxu1 %v8421_v7  ;;  %v4721_v51 = vsub.f32 %v10427_v31, %v11863_v26  ;;  %v4730_v23 = vsub.f32 %v10450_v53, %v11479_v39  ;;  %v4737_v39 = vand.u32 4294901760, %v4736_v32  ;;  %v11872_v32 = vld [vmem:[#allocation11_spill] sm:$0xff] }
 0x54d   :  { %5054 = vmatprep.subr.mxu0 %v11531_v55  ;;  %5164 = vmatprep.subr.mxu1 %v11531_v55 }
 0x54e   :  { %4702 = vmatprep.mubr.f32.mxu0 %v4701_v24  ;;  %5057 = vmatpush2.msra.mxu0 %v11864_v40  ;;  %v4722_v26 = vand.u32 4294901760, %v4721_v51  ;;  %v4731_v24 = vand.u32 4294901760, %v4730_v23  ;;  %v11867_v51 = vld [vmem:[#allocation73_spill] sm:$0xff]  ;;  %v11869_v23 = vld [vmem:[#allocation80_spill] sm:$0xff] }
 0x54f   :  { %5166 = vmatpush1.msra.mxu1 %v8437_v19  ;;  %4708 = vmatmul.mubr.f32.gmra.mxu0 %v4707_v1  ;;  %v11866_v1 = vld [vmem:[#allocation68_spill] sm:$0xff] }
 0x550   :  { %5058 = vmatprep.subr.mxu0 %v11531_v55  ;;  %5179 = vmatprep.subr.mxu1 %v11531_v55 }
 0x551   :  { %5061 = vmatpush2.msra.mxu0 %v11865_v41  ;;  %5181 = vmatpush2.msra.mxu1 %v11583_v54 }
 0x552   :  { %5062 = vmatprep.subr.mxu0 %v11531_v55  ;;  %5182 = vmatprep.subr.mxu1 %v11531_v55 }
 0x553   :  { %4717 = vmatprep.mubr.f32.mxu0 %v4716_v3  ;;  %5065 = vmatpush2.msra.mxu0 %v11866_v1  ;;  %v11868_v3 = vld [vmem:[#allocation77_spill] sm:$0xff] }
 0x554   :  { %5184 = vmatpush2.msra.mxu1 %v11584_v62  ;;  %4723 = vmatmul.mubr.f32.gmra.mxu0 %v4722_v26  ;;  %v11870_v26 = vld [vmem:[#allocation83_spill] sm:$0xff] }
 0x555   :  { %5066 = vmatprep.subr.mxu0 %v11531_v55  ;;  %5185 = vmatprep.subr.mxu1 %v11531_v55 }
 0x556   :  { %5069 = vmatpush2.msra.mxu0 %v11867_v51  ;;  %5187 = vmatpush2.msra.mxu1 %v11585_v20 }
 0x557   :  { %4945 = vmatprep.mubr.f32.mxu1 %v10376_v58  ;;  %5070 = vmatprep.subr.mxu0 %v11531_v55 }
 0x558   :  { %5188 = vmatprep.subr.mxu1 %v11531_v55  ;;  %4732 = vmatprep.mubr.f32.mxu0 %v4731_v24  ;;  %v11873_v24 = vld [vmem:[#allocation12_spill] sm:$0xff] }
 0x559   :  { %4947 = vmatmul.mubr.f32.gmra.mxu1 %v10380_v49  ;;  %5073 = vmatpush2.msra.mxu0 %v11868_v3 }
 0x55a   :  { %5190 = vmatpush2.msra.mxu1 %v11586_v36  ;;  %4738 = vmatmul.mubr.f32.gmra.mxu0 %v4737_v39  ;;  %v11871_v39 = vld [vmem:[#allocation10_spill] sm:$0xff] }
 0x55b   :  { %5074 = vmatprep.subr.mxu0 %v11531_v55  ;;  %5191 = vmatprep.subr.mxu1 %v11531_v55 }
 0x55c   :  { %5077 = vmatpush2.msra.mxu0 %v11869_v23  ;;  %5193 = vmatpush2.msra.mxu1 %v8540_v63 }
 0x55d   :  { %4952 = vmatprep.mubr.f32.mxu1 %v10403_v47  ;;  %5078 = vmatprep.subr.mxu0 %v11531_v55 }
 0x55e   :  { %5194 = vmatprep.subr.mxu1 %v11531_v55  ;;  %4954 = vmatmul.mubr.f32.gmra.mxu1 %v10407_v16 }
 0x55f   :  { %5081 = vmatpush2.msra.mxu0 %v11870_v26  ;;  %5084 = vmatprep.mubr.f32.mxu0 %v10281_v27  ;;  %v11879_v27 = vld [vmem:[#allocation19_spill] sm:$0xff] }
 0x560   :  { %5196 = vmatpush2.msra.mxu1 %v11587_v29  ;;  %5087 = vmatmul.mubr.f32.vlgmr.msra.gmra.mxu0 %v10286_v38 }
 0x561   :  { %5197 = vmatprep.subr.mxu1 %v11531_v55  ;;  %5254 = vmatprep.subr.mxu0 %v11531_v55 }
 0x562   :  { %5199 = vmatpush2.msra.mxu1 %v11829_v18  ;;  %5258 = vmatpush1.msra.mxu0 %v11871_v39  ;;  %v11876_v39 = vand.u32 4294901760, %v10286_v38  ;;  %v11880_v38 = vand.u32 4294901760, %v10401_v56 }
 0x563   :  { %4959 = vmatprep.mubr.f32.mxu1 %v10429_v44  ;;  %5200 = vmatprep.subr.mxu1 %v11531_v55 }
 0x564   :  { %5259 = vmatprep.subr.mxu0 %v11531_v55  ;;  %4961 = vmatmul.mubr.f32.gmra.mxu1 %v10438_v43 }
 0x565   :  { %5093 = vmatprep.mubr.f32.mxu0 %v10396_v34  ;;  %5202 = vmatpush2.msra.mxu1 %v11831_v42 }
 0x566   :  { %5263 = vmatpush1.msra.mxu0 %v11872_v32  ;;  %5203 = vmatprep.subr.mxu1 %v11531_v55  ;;  %v11875_v32 = vld [vmem:[#allocation13_spill] sm:$0xff] }
 0x567   :  { %5096 = vmatmul.mubr.f32.gmra.mxu0 %v10401_v56  ;;  %5264 = vmatprep.subr.mxu0 %v11531_v55  ;;  %v11884_v56 = vand.u32 4294901760, %v10427_v31 }
 0x568   :  { %5205 = vmatpush2.msra.mxu1 %v11833_v14  ;;  %5268 = vmatpush1.msra.mxu0 %v11873_v24  ;;  %v11877_v24 = vld [vmem:[#allocation14_spill] sm:$0xff] }
 0x569   :  { %5206 = vmatprep.subr.mxu1 %v11531_v55  ;;  %5269 = vmatprep.subr.mxu0 %v11531_v55 }
 0x56a   :  { %5102 = vmatprep.mubr.f32.mxu0 %v10422_v50  ;;  %5208 = vmatpush2.msra.mxu1 %v11835_v60 }
 0x56b   :  { %5212 = vmatprep.mubr.f32.mxu1 %v11874_v8  ;;  %5273 = vmatpush1.msra.mxu0 %v11875_v32  ;;  %v11878_v8 = vand.u32 4294901760, %v10396_v34  ;;  %v11882_v34 = vand.u32 4294901760, %v10422_v50  ;;  %v11886_v50 = vand.u32 4294901760, %v10450_v53 }
 0x56c   :  { %5105 = vmatmul.mubr.f32.gmra.mxu0 %v10427_v31  ;;  %5216 = vmatmul.mubr.f32.vlgmr.msra.gmra.mxu1 %v11876_v39  ;;  %v11881_v39 = vld [vmem:[#allocation22_spill] sm:$0xff]  ;;  %v11888_v31 = vand.u32 4294901760, %v10457_v33 }
 0x56d   :  { %5274 = vmatprep.subr.mxu0 %v11531_v55  ;;  %5425 = vmatprep.subr.mxu1 %v11531_v55 }
 0x56e   :  { %5278 = vmatpush1.msra.mxu0 %v11877_v24  ;;  %5427 = vmatpush1.msra.mxu1 %v8235_v4 }
 0x56f   :  { %5279 = vmatprep.subr.mxu0 %v11531_v55  ;;  %5428 = vmatprep.subr.mxu1 %v11531_v55 }
 0x570   :  { %5111 = vmatprep.mubr.f32.mxu0 %v10450_v53  ;;  %5223 = vmatprep.mubr.f32.mxu1 %v11878_v8  ;;  %v11883_v8 = vld [vmem:[#allocation25_spill] sm:$0xff] }
 0x571   :  { %5283 = vmatpush1.msra.mxu0 %v11879_v27  ;;  %5430 = vmatpush1.msra.mxu1 %v8237_v5  ;;  %v11890_v53 = vld [vmem:[#allocation37_spill] sm:$0xff] }
 0x572   :  { %5114 = vmatmul.mubr.f32.gmra.mxu0 %v10457_v33  ;;  %5227 = vmatmul.mubr.f32.gmra.mxu1 %v11880_v38  ;;  %v11885_v38 = vld [vmem:[#allocation28_spill] sm:$0xff]  ;;  %v11891_v33 = vld [vmem:[#allocation42_spill] sm:$0xff]  ;;  %v11905_v27 = vld [vmem:[#allocation41_spill] sm:$0xff] }
 0x573   :  { %5284 = vmatprep.subr.mxu0 %v11531_v55  ;;  %5431 = vmatprep.subr.mxu1 %v11531_v55 }
 0x574   :  { %5288 = vmatpush1.msra.mxu0 %v11881_v39  ;;  %5433 = vmatpush1.msra.mxu1 %v8239_v6 }
 0x575   :  { %5289 = vmatprep.subr.mxu0 %v11531_v55  ;;  %5434 = vmatprep.subr.mxu1 %v11531_v55 }
 0x576   :  { %5234 = vmatprep.mubr.f32.mxu1 %v11882_v34  ;;  %5293 = vmatpush1.msra.mxu0 %v11883_v8  ;;  %v11887_v34 = vld [vmem:[#allocation31_spill] sm:$0xff] }
 0x577   :  { %5436 = vmatpush1.msra.mxu1 %v8251_v10  ;;  %5294 = vmatprep.subr.mxu0 %v11531_v55 }
 0x578   :  { %5238 = vmatmul.mubr.f32.gmra.mxu1 %v11884_v56  ;;  %5437 = vmatprep.subr.mxu1 %v11531_v55  ;;  %v11889_v56 = vld [vmem:[#allocation34_spill] sm:$0xff] }
 0x579   :  { %5298 = vmatpush1.msra.mxu0 %v11885_v38  ;;  %5439 = vmatpush1.msra.mxu1 %v8253_v11 }
 0x57a   :  { %5299 = vmatprep.subr.mxu0 %v11531_v55  ;;  %5440 = vmatprep.subr.mxu1 %v11531_v55 }
 0x57b   :  { %5245 = vmatprep.mubr.f32.mxu1 %v11886_v50  ;;  %5303 = vmatpush1.msra.mxu0 %v11887_v34  ;;  %v11892_v50 = vld [vmem:[#allocation45_spill] sm:$0xff] }
 0x57c   :  { %5442 = vmatpush1.msra.mxu1 %v8255_v12  ;;  %5304 = vmatprep.subr.mxu0 %v11531_v55 }
 0x57d   :  { %5249 = vmatmul.mubr.f32.gmra.mxu1 %v11888_v31  ;;  %5443 = vmatprep.subr.mxu1 %v11531_v55  ;;  %v11893_v31 = vld [vmem:[#allocation47_spill] sm:$0xff] }
 0x57e   :  { %5308 = vmatpush1.msra.mxu0 %v11889_v56  ;;  %5445 = vmatpush1.msra.mxu1 %v8270_v17 }
 0x57f   :  { %5309 = vmatprep.subr.mxu0 %v11531_v55  ;;  %5446 = vmatprep.subr.mxu1 %v11531_v55 }
 0x580   :  { %5313 = vmatpush1.msra.mxu0 %v11890_v53  ;;  %5448 = vmatpush1.msra.mxu1 %v8295_v25 }
 0x581   :  { %5314 = vmatprep.subr.mxu0 %v11531_v55  ;;  %5449 = vmatprep.subr.mxu1 %v11531_v55 }
 0x582   :  { %5318 = vmatpush1.msra.mxu0 %v11891_v33  ;;  %5451 = vmatpush1.msra.mxu1 %v8304_v28  ;;  %v11894_v33 = vld [vmem:[#allocation53_spill] sm:$0xff] }
 0x583   :  { %5319 = vmatprep.subr.mxu0 %v11531_v55  ;;  %5452 = vmatprep.subr.mxu1 %v11531_v55 }
 0x584   :  { %5323 = vmatpush1.msra.mxu0 %v11892_v50  ;;  %5454 = vmatpush1.msra.mxu1 %v8323_v35  ;;  %v11895_v50 = vld [vmem:[#allocation56_spill] sm:$0xff] }
 0x585   :  { %5324 = vmatprep.subr.mxu0 %v11531_v55  ;;  %5455 = vmatprep.subr.mxu1 %v11531_v55 }
 0x586   :  { %5328 = vmatpush1.msra.mxu0 %v11893_v31  ;;  %5457 = vmatpush1.msra.mxu1 %v8351_v45  ;;  %v11896_v31 = vld [vmem:[#allocation60_spill] sm:$0xff] }
 0x587   :  { %5329 = vmatprep.subr.mxu0 %v11531_v55  ;;  %5458 = vmatprep.subr.mxu1 %v11531_v55 }
 0x588   :  { %5333 = vmatpush1.msra.mxu0 %v11894_v33  ;;  %5460 = vmatpush1.msra.mxu1 %v8361_v48  ;;  %v11897_v33 = vld [vmem:[#allocation63_spill] sm:$0xff] }
 0x589   :  { %5346 = vmatprep.subr.mxu0 %v11531_v55  ;;  %5461 = vmatprep.subr.mxu1 %v11531_v55 }
 0x58a   :  { %5350 = vmatpush2.msra.mxu0 %v11895_v50  ;;  %5463 = vmatpush1.msra.mxu1 %v8389_v57  ;;  %v11898_v50 = vld [vmem:[#allocation67_spill] sm:$0xff] }
 0x58b   :  { %5351 = vmatprep.subr.mxu0 %v11531_v55  ;;  %5464 = vmatprep.subr.mxu1 %v11531_v55 }
 0x58c   :  { %5355 = vmatpush2.msra.mxu0 %v11896_v31  ;;  %5466 = vmatpush1.msra.mxu1 %v8402_v61  ;;  %v11899_v31 = vld [vmem:[#allocation71_spill] sm:$0xff] }
 0x58d   :  { %5356 = vmatprep.subr.mxu0 %v11531_v55  ;;  %5467 = vmatprep.subr.mxu1 %v11531_v55 }
 0x58e   :  { %5360 = vmatpush2.msra.mxu0 %v11897_v33  ;;  %5469 = vmatpush1.msra.mxu1 %v8421_v7  ;;  %v11900_v33 = vld [vmem:[#allocation75_spill] sm:$0xff] }
 0x58f   :  { %5361 = vmatprep.subr.mxu0 %v11531_v55  ;;  %5470 = vmatprep.subr.mxu1 %v11531_v55 }
 0x590   :  { %5365 = vmatpush2.msra.mxu0 %v11898_v50  ;;  %5472 = vmatpush1.msra.mxu1 %v8437_v19  ;;  %v11901_v50 = vld [vmem:[#allocation79_spill] sm:$0xff] }
 0x591   :  { %5366 = vmatprep.subr.mxu0 %v11531_v55  ;;  %5485 = vmatprep.subr.mxu1 %v11531_v55 }
 0x592   :  { %5370 = vmatpush2.msra.mxu0 %v11899_v31  ;;  %5487 = vmatpush2.msra.mxu1 %v11583_v54  ;;  %v11902_v31 = vld [vmem:[#allocation82_spill] sm:$0xff] }
 0x593   :  { %5371 = vmatprep.subr.mxu0 %v11531_v55  ;;  %5488 = vmatprep.subr.mxu1 %v11531_v55 }
 0x594   :  { %5375 = vmatpush2.msra.mxu0 %v11900_v33  ;;  %5490 = vmatpush2.msra.mxu1 %v11584_v62  ;;  %v11903_v33 = vld [vmem:[#allocation85_spill] sm:$0xff] }
 0x595   :  { %5376 = vmatprep.subr.mxu0 %v11531_v55  ;;  %5491 = vmatprep.subr.mxu1 %v11531_v55 }
 0x596   :  { %5380 = vmatpush2.msra.mxu0 %v11901_v50  ;;  %5493 = vmatpush2.msra.mxu1 %v11585_v20  ;;  %v11904_v50 = vld [vmem:[#allocation87_spill] sm:$0xff] }
 0x597   :  { %5381 = vmatprep.subr.mxu0 %v11531_v55  ;;  %5494 = vmatprep.subr.mxu1 %v11531_v55 }
 0x598   :  { %5385 = vmatpush2.msra.mxu0 %v11902_v31  ;;  %5496 = vmatpush2.msra.mxu1 %v11586_v36 }
 0x599   :  { %5386 = vmatprep.subr.mxu0 %v11531_v55  ;;  %5497 = vmatprep.subr.mxu1 %v11531_v55 }
 0x59a   :  { %5390 = vmatpush2.msra.mxu0 %v11903_v33  ;;  %5499 = vmatpush2.msra.mxu1 %v8540_v63 }
 0x59b   :  { %5391 = vmatprep.subr.mxu0 %v11531_v55  ;;  %5500 = vmatprep.subr.mxu1 %v11531_v55 }
 0x59c   :  { %5395 = vmatpush2.msra.mxu0 %v11904_v50  ;;  %5397 = vmatprep.mubr.f32.mxu0 %v10268_v59 }
 0x59d   :  { %5502 = vmatpush2.msra.mxu1 %v11587_v29  ;;  %5399 = vmatmul.mubr.f32.vlgmr.msra.gmra.mxu0 %v10272_v0  ;;  %v7950_v31 = vpop.f32.mrf.mxu0 }
 0x59e   :  { %5503 = vmatprep.subr.mxu1 %v11531_v55  ;;  %5404 = vmatprep.mubr.f32.mxu0 %v10376_v58 }
 0x59f   :  { %5505 = vmatpush2.msra.mxu1 %v11829_v18  ;;  %5516 = vmatprep.mubr.f32.mxu1 %v10268_v59  ;;  %v4117_v50 = vpop.f32.mrf.mxu0 }
 0x5a0   :  { %5506 = vmatprep.subr.mxu1 %v11531_v55 }
 0x5a1   :  { %5508 = vmatpush2.msra.mxu1 %v11831_v42  ;;  %5406 = vmatmul.mubr.f32.gmra.mxu0 %v10380_v49 }
 0x5a2   :  { %5509 = vmatprep.subr.mxu1 %v11531_v55  ;;  %5411 = vmatprep.mubr.f32.mxu0 %v10403_v47 }
 0x5a3   :  { %5511 = vmatpush2.msra.mxu1 %v11833_v14 }
 0x5a4   :  { %5512 = vmatprep.subr.mxu1 %v11531_v55  ;;  %v7961_v33 = vpop.f32.mrf.mxu1 }
 0x5a5   :  { %5514 = vmatpush2.msra.mxu1 %v11835_v60  ;;  %5413 = vmatmul.mubr.f32.gmra.mxu0 %v10407_v16  ;;  %v4225_v59 = vadd.f32 %v7961_v33, %v7950_v31 }
 0x5a6   :  { %5518 = vmatmul.mubr.f32.vlgmr.msra.gmra.mxu1 %v10272_v0  ;;  %5418 = vmatprep.mubr.f32.mxu0 %v10429_v44  ;;  %v4218_v53 = vpop.f32.mrf.mxu1  ;;  %v7972_v56 = vpop.f32.mrf.mxu0 }
 0x5a7   :  { %5523 = vmatprep.mubr.f32.mxu1 %v10376_v58  ;;  %v4219_v34 = vadd.f32 %v4218_v53, %v4117_v50  ;;  %v4312_v38 = vadd.f32 %v7972_v56, %v4225_v59 }
 0x5a8   :  { %v4304_v8 = vpop.f32.mrf.mxu0 }
 0x5a9   :  { %5420 = vmatmul.mubr.f32.gmra.mxu0 %v10438_v43  ;;  %v4305_v39 = vadd.f32 %v4304_v8, %v4219_v34 }
 0x5aa   :  { %5525 = vmatmul.mubr.f32.gmra.mxu1 %v10380_v49  ;;  %8014 = vmatprep.mubr.f32.mxu0 %v11905_v27 }
 0x5ab   :  { %5530 = vmatprep.mubr.f32.mxu1 %v10403_v47 }
 0x5ae   :  { %5532 = vmatmul.mubr.f32.gmra.mxu1 %v10407_v16  ;;  %v7983_v0 = vpop.f32.mrf.mxu1 }
 0x5af   :  { %5537 = vmatprep.mubr.f32.mxu1 %v10429_v44  ;;  %v4397_v33 = vadd.f32 %v7983_v0, %v4312_v38 }
 0x5b0   :  { %v4388_v31 = vpop.f32.mrf.mxu1  ;;  %v7994_v58 = vpop.f32.mrf.mxu0 }
 0x5b1   :  { %v4389_v53 = vadd.f32 %v4388_v31, %v4305_v39  ;;  %v4486_v56 = vadd.f32 %v7994_v58, %v4397_v33 }
 0x5b2   :  { %5539 = vmatmul.mubr.f32.gmra.mxu1 %v10438_v43  ;;  %v4479_v50 = vpop.f32.mrf.mxu0 }
 0x5b3   :  { %v4480_v8 = vadd.f32 %v4479_v50, %v4389_v53  ;;  %8025 = vmatprep.mubr.f32.mxu1 %v9079_v21 }
 0x5b8   :  { %v8005_v49 = vpop.f32.mrf.mxu1 }
 0x5b9   :  { %v10665_v34 = vadd.f32 %v8005_v49, %v4486_v56 }
 0x5ba   :  { %v4560_v47 = vpop.f32.mrf.mxu1 }
 0x5bb   :  { %11906 = vst [vmem:[#allocation96_spill] sm:$0xff] %v10665_v34  ;;  %v10669_v27 = vadd.f32 %v4560_v47, %v4480_v8 }
 0x5bd   :  { %11908 = vst [vmem:[#allocation97_spill] sm:$0xff] %v10669_v27 }
 0x5e6   :  { %v4694_v44 = vpop.f32.mrf.mxu0 }
 0x5e8   :  { %v4696_v38 = vpop.f32.mrf.mxu0 }
 0x5ee   :  { %v4941_v0 = vpop.f32.mrf.mxu1 }
 0x5ef   :  { %v4942_v39 = vadd.f32 %v4941_v0, %v4694_v44 }
 0x5f0   :  { %v4943_v33 = vpop.f32.mrf.mxu1 }
 0x60f   :  { %v4709_v31 = vpop.f32.mrf.mxu0 }
 0x611   :  { %v4711_v43 = vpop.f32.mrf.mxu0 }
 0x614   :  { %v4724_v58 = vpop.f32.mrf.mxu0 }
 0x616   :  { %v4726_v53 = vpop.f32.mrf.mxu0 }
 0x619   :  { %v4948_v50 = vpop.f32.mrf.mxu1 }
 0x61a   :  { %v4949_v24 = vadd.f32 %v4948_v50, %v4709_v31  ;;  %v4739_v32 = vpop.f32.mrf.mxu0 }
 0x61b   :  { %v4950_v56 = vpop.f32.mrf.mxu1 }
 0x61c   :  { %v4741_v49 = vpop.f32.mrf.mxu0 }
 0x61e   :  { %v4955_v26 = vpop.f32.mrf.mxu1 }
 0x61f   :  { %v4956_v23 = vadd.f32 %v4955_v26, %v4724_v58 }
 0x620   :  { %v5088_v3 = vpop.f32.mrf.mxu0  ;;  %v4957_v16 = vpop.f32.mrf.mxu1 }
 0x621   :  { %v5089_v8 = vadd.f32 %v5088_v3, %v4942_v39 }
 0x622   :  { %v5090_v47 = vpop.f32.mrf.mxu0 }
 0x624   :  { %v4962_v59 = vpop.f32.mrf.mxu1 }
 0x625   :  { %v4963_v38 = vadd.f32 %v4962_v59, %v4739_v32 }
 0x626   :  { %v4964_v34 = vpop.f32.mrf.mxu1 }
 0x627   :  { %v5097_v44 = vpop.f32.mrf.mxu0 }
 0x628   :  { %v5098_v0 = vadd.f32 %v5097_v44, %v4949_v24 }
 0x629   :  { %v5099_v33 = vpop.f32.mrf.mxu0 }
 0x62c   :  { %v5106_v43 = vpop.f32.mrf.mxu0  ;;  %v5217_v27 = vpop.f32.mrf.mxu1 }
 0x62d   :  { %v5107_v53 = vadd.f32 %v5106_v43, %v4956_v23  ;;  %v5218_v51 = vadd.f32 %v5217_v27, %v5089_v8 }
 0x62e   :  { %v5108_v31 = vpop.f32.mrf.mxu0  ;;  %v5219_v50 = vpop.f32.mrf.mxu1 }
 0x632   :  { %v5115_v56 = vpop.f32.mrf.mxu0  ;;  %v5228_v49 = vpop.f32.mrf.mxu1 }
 0x633   :  { %v5229_v1 = vadd.f32 %v5228_v49, %v5098_v0  ;;  %v5116_v49 = vadd.f32 %v5115_v56, %v4963_v38 }
 0x634   :  { %v5230_v26 = vpop.f32.mrf.mxu1  ;;  %v5117_v58 = vpop.f32.mrf.mxu0 }
 0x638   :  { %v5239_v16 = vpop.f32.mrf.mxu1 }
 0x639   :  { %v5240_v43 = vadd.f32 %v5239_v16, %v5107_v53 }
 0x63a   :  { %v5241_v3 = vpop.f32.mrf.mxu1 }
 0x63d   :  { %v5250_v39 = vpop.f32.mrf.mxu1 }
 0x63f   :  { %v5252_v47 = vpop.f32.mrf.mxu1 }
 0x640   :  { %v5251_v47 = vadd.f32 %v5250_v39, %v5116_v49  ;;  %v8160_v49 = vld [vmem:[%s11275_s2 + $0x8] sm:$0xff] }
 0x65d   :  { %v5400_v32 = vpop.f32.mrf.mxu0 }
 0x65e   :  { %v5401_v58 = vadd.f32 %v5400_v32, %v5218_v51 }
 0x65f   :  { %v5402_v34 = vpop.f32.mrf.mxu0 }
 0x661   :  { %v5407_v59 = vpop.f32.mrf.mxu0 }
 0x662   :  { %v5408_v50 = vadd.f32 %v5407_v59, %v5229_v1 }
 0x663   :  { %v5409_v24 = vpop.f32.mrf.mxu0 }
 0x665   :  { %v5414_v44 = vpop.f32.mrf.mxu0 }
 0x666   :  { %v5519_v33 = vpop.f32.mrf.mxu1  ;;  %v5415_v26 = vadd.f32 %v5414_v44, %v5240_v43 }
 0x667   :  { %v5416_v41 = vpop.f32.mrf.mxu0  ;;  %v5520_v34 = vadd.f32 %v5519_v33, %v5401_v58 }
 0x668   :  { %v5521_v23 = vpop.f32.mrf.mxu1 }
 0x669   :  { %v5421_v27 = vpop.f32.mrf.mxu0  ;;  %v10675_v53 = vand.u32 4294901760, %v5520_v34 }
 0x66a   :  { %v5526_v8 = vpop.f32.mrf.mxu1  ;;  %v5422_v24 = vadd.f32 %v5421_v27, %v5251_v47  ;;  %v11915_v47 = vld [vmem:[#allocation44_spill] sm:$0xff] }
 0x66b   :  { %v5423_v31 = vpop.f32.mrf.mxu0  ;;  %v5527_v3 = vadd.f32 %v5526_v8, %v5408_v50 }
 0x66c   :  { %v5528_v0 = vpop.f32.mrf.mxu1 }
 0x66d   :  { %v10673_v41 = vand.u32 4294901760, %v5527_v3  ;;  %v11913_v0 = vld [vmem:[#allocation36_spill] sm:$0xff] }
 0x66e   :  { %v5533_v40 = vpop.f32.mrf.mxu1 }
 0x66f   :  { %v5534_v60 = vadd.f32 %v5533_v40, %v5415_v26  ;;  %v5676_v56 = vsub.f32 %v5527_v3, %v10673_v41  ;;  %v8161_v26 = vld [vmem:[%s11276_s3 + $0x8] sm:$0xff]  ;;  %v11914_v3 = vld [vmem:[#allocation40_spill] sm:$0xff] }
 0x670   :  { %v5535_v14 = vpop.f32.mrf.mxu1  ;;  %v6078_v58 = vmul.f32 %v8161_v26, %v8160_v49  ;;  %v11931_v49 = vld [vmem:[#allocation86_spill] sm:$0xff]  ;;  %v11932_v26 = vld [vmem:[#allocation88_spill] sm:$0xff] }
 0x671   :  { %v10671_v42 = vand.u32 4294901760, %v5534_v60  ;;  %v5683_v14 = vsub.f32 %v5520_v34, %v10675_v53  ;;  %v11916_v34 = vld [vmem:[#allocation48_spill] sm:$0xff] }
 0x672   :  { %v5540_v23 = vpop.f32.mrf.mxu1 }
 0x673   :  { %v5541_v18 = vadd.f32 %v5540_v23, %v5422_v24  ;;  %v5669_v1 = vsub.f32 %v5534_v60, %v10671_v42  ;;  %v5677_v60 = vand.u32 4294901760, %v5676_v56  ;;  %v5684_v44 = vand.u32 4294901760, %v5683_v14  ;;  %v8163_v23 = vld [vmem:[%s11276_s3] sm:$0xff] }
 0x674   :  { %v5542_v38 = vpop.f32.mrf.mxu1  ;;  %v6086_v24 = vsel %vm62_vm0, %v6078_v58, 0  ;;  %v11933_v58 = vld [vmem:[#allocation5_spill] sm:$0xff] }
 0x675   :  { %v5545_v51 = vsel %vm1034_vm2, %v5541_v18, 0  ;;  %v5670_v39 = vand.u32 4294901760, %v5669_v1  ;;  %v5678_v27 = vsub.f32 %v5676_v56, %v5677_v60  ;;  %v5685_v43 = vsub.f32 %v5683_v14, %v5684_v44 }
 0x676   :  { %v10680_v16 = vand.u32 4294901760, %v5545_v51  ;;  %v10789_v38 = vand.u32 4294901760, %v6086_v24 }
 0x677   :  { %v5671_v59 = vsub.f32 %v5669_v1, %v5670_v39  ;;  %v5679_v31 = vand.u32 4294901760, %v5678_v27  ;;  %v5686_v50 = vand.u32 4294901760, %v5685_v43  ;;  %v11924_v27 = vld [vmem:[#allocation65_spill] sm:$0xff] }
 0x678   :  { %v5662_v40 = vsub.f32 %v5545_v51, %v10680_v16  ;;  %8006 = vmatprep.subr.mxu0 %v10680_v16  ;;  %v11918_v51 = vld [vmem:[#allocation55_spill] sm:$0xff] }
 0x679   :  { %8007 = vmatpush3.msra.mxu0 %v10680_v16  ;;  %v5672_v8 = vand.u32 4294901760, %v5671_v59 }
 0x67a   :  { %8008 = vmatprep.subr.mxu0 %v10671_v42  ;;  %v5663_v32 = vand.u32 4294901760, %v5662_v40 }
 0x67b   :  { %8009 = vmatpush3.msra.mxu0 %v10671_v42 }
 0x67c   :  { %8010 = vmatprep.subr.mxu0 %v10673_v41  ;;  %v5664_v18 = vsub.f32 %v5662_v40, %v5663_v32 }
 0x67d   :  { %8011 = vmatpush3.msra.mxu0 %v10673_v41 }
 0x67e   :  { %8012 = vmatprep.subr.mxu0 %v10675_v53  ;;  %v5665_v33 = vand.u32 4294901760, %v5664_v18  ;;  %v11922_v18 = vld [vmem:[#allocation70_spill] sm:$0xff] }
 0x67f   :  { %8013 = vmatpush3.msra.mxu0 %v10675_v53 }
 0x680   :  { %8017 = vmatprep.subr.mxu1 %v5665_v33  ;;  %8028 = vmatprep.subr.mxu0 %v5662_v40 }
 0x681   :  { %8015 = vmatmul.mubr.f32.vlgmr.msra.gmra.mxu0 %v9126_v52  ;;  %8018 = vmatpush3.msra.mxu1 %v5665_v33 }
 0x682   :  { %8029 = vmatpush3.msra.mxu0 %v5662_v40  ;;  %8019 = vmatprep.subr.mxu1 %v5672_v8  ;;  %v11920_v40 = vld [vmem:[#allocation62_spill] sm:$0xff] }
 0x683   :  { %8030 = vmatprep.subr.mxu0 %v5669_v1  ;;  %8020 = vmatpush3.msra.mxu1 %v5672_v8  ;;  %v11925_v8 = vld [vmem:[#allocation78_spill] sm:$0xff] }
 0x684   :  { %8031 = vmatpush3.msra.mxu0 %v5669_v1  ;;  %8021 = vmatprep.subr.mxu1 %v5679_v31  ;;  %v11917_v1 = vld [vmem:[#allocation52_spill] sm:$0xff] }
 0x685   :  { %8032 = vmatprep.subr.mxu0 %v5676_v56  ;;  %8022 = vmatpush3.msra.mxu1 %v5679_v31  ;;  %v11926_v31 = vld [vmem:[#allocation69_spill] sm:$0xff] }
 0x686   :  { %8033 = vmatpush3.msra.mxu0 %v5676_v56  ;;  %8023 = vmatprep.subr.mxu1 %v5686_v50 }
 0x687   :  { %8034 = vmatprep.subr.mxu0 %v5683_v14  ;;  %8024 = vmatpush3.msra.mxu1 %v5686_v50  ;;  %v11927_v50 = vld [vmem:[#allocation81_spill] sm:$0xff] }
 0x688   :  { %8035 = vmatpush3.msra.mxu0 %v5683_v14  ;;  %8026 = vmatmul.mubr.f32.vlgmr.msra.gmra.mxu1 %v9097_v9  ;;  %v10802_v14 = vsub.f32 %v6086_v24, %v10789_v38  ;;  %v11937_v24 = vld [vmem:[#allocation7_spill] sm:$0xff] }
 0x689   :  { %8036 = vmatprep.mubr.f32.mxu0 %v9082_v30  ;;  %8039 = vmatprep.subr.mxu1 %v10680_v16 }
 0x68a   :  { %8050 = vmatprep.subr.mxu0 %v5663_v32  ;;  %8037 = vmatmul.mubr.f32.vlgmr.msra.gmra.mxu0 %v9102_v37 }
 0x68b   :  { %8040 = vmatpush3.msra.mxu1 %v10680_v16  ;;  %8051 = vmatpush3.msra.mxu0 %v5663_v32  ;;  %v11921_v32 = vld [vmem:[#allocation66_spill] sm:$0xff] }
 0x68c   :  { %8041 = vmatprep.subr.mxu1 %v10671_v42  ;;  %8052 = vmatprep.subr.mxu0 %v5670_v39 }
 0x68d   :  { %8042 = vmatpush3.msra.mxu1 %v10671_v42  ;;  %8053 = vmatpush3.msra.mxu0 %v5670_v39 }
 0x68e   :  { %8043 = vmatprep.subr.mxu1 %v10673_v41  ;;  %8054 = vmatprep.subr.mxu0 %v5677_v60 }
 0x68f   :  { %8044 = vmatpush3.msra.mxu1 %v10673_v41  ;;  %8055 = vmatpush3.msra.mxu0 %v5677_v60  ;;  %v6189_v60 = vand.u32 4294901760, %v10802_v14 }
 0x690   :  { %8045 = vmatprep.subr.mxu1 %v10675_v53  ;;  %8056 = vmatprep.subr.mxu0 %v5684_v44 }
 0x691   :  { %8046 = vmatpush3.msra.mxu1 %v10675_v53  ;;  %8047 = vmatprep.mubr.f32.mxu1 %v9086_v2  ;;  %v6190_v33 = vsub.f32 %v10802_v14, %v6189_v60 }
 0x692   :  { %8057 = vmatpush3.msra.mxu0 %v5684_v44  ;;  %8048 = vmatmul.mubr.f32.vlgmr.msra.gmra.mxu1 %v9111_v22  ;;  %v11923_v44 = vld [vmem:[#allocation74_spill] sm:$0xff] }
 0x693   :  { %8058 = vmatprep.mubr.f32.mxu0 %v9079_v21  ;;  %8061 = vmatprep.subr.mxu1 %v10680_v16 }
 0x694   :  { %6097 = vmatprep.subr.mxu0 %v11531_v55  ;;  %8059 = vmatmul.mubr.f32.vlgmr.msra.gmra.mxu0 %v9097_v9 }
 0x695   :  { %8062 = vmatpush3.msra.mxu1 %v10680_v16  ;;  %6099 = vmatpush1.msra.mxu0 %v8235_v4  ;;  %v11919_v16 = vld [vmem:[#allocation59_spill] sm:$0xff] }
 0x696   :  { %8063 = vmatprep.subr.mxu1 %v10671_v42  ;;  %6100 = vmatprep.subr.mxu0 %v11531_v55 }
 0x697   :  { %8064 = vmatpush3.msra.mxu1 %v10671_v42  ;;  %6102 = vmatpush1.msra.mxu0 %v8237_v5  ;;  %v11912_v42 = vld [vmem:[#allocation33_spill] sm:$0xff] }
 0x698   :  { %8065 = vmatprep.subr.mxu1 %v10673_v41  ;;  %6103 = vmatprep.subr.mxu0 %v11531_v55 }
 0x699   :  { %8066 = vmatpush3.msra.mxu1 %v10673_v41  ;;  %6105 = vmatpush1.msra.mxu0 %v8239_v6  ;;  %v8162_v41 = vld [vmem:[%s11275_s2] sm:$0xff] }
 0x69a   :  { %8067 = vmatprep.subr.mxu1 %v10675_v53  ;;  %6106 = vmatprep.subr.mxu0 %v11531_v55 }
 0x69b   :  { %8068 = vmatpush3.msra.mxu1 %v10675_v53  ;;  %8069 = vmatprep.mubr.f32.mxu1 %v9079_v21  ;;  %v6077_v53 = vmul.f32 %v8163_v23, %v8162_v41  ;;  %v11938_v41 = vld [vmem:[#allocation91_spill] sm:$0xff]  ;;  %v11939_v23 = vld [vmem:[#allocation8_spill] sm:$0xff] }
 0x69c   :  { %6108 = vmatpush1.msra.mxu0 %v8251_v10  ;;  %8070 = vmatmul.mubr.f32.vlgmr.msra.gmra.mxu1 %v9097_v9 }
 0x69d   :  { %6109 = vmatprep.subr.mxu0 %v11531_v55  ;;  %6248 = vmatprep.subr.mxu1 %v11531_v55  ;;  %v10793_v56 = vand.u32 4294901760, %v6077_v53 }
 0x69e   :  { %6111 = vmatpush1.msra.mxu0 %v8253_v11  ;;  %6254 = vmatpush1.msra.mxu1 %v11621_v15  ;;  %v11909_v15 = vld [vmem:[#allocation24_spill] sm:$0xff] }
 0x69f   :  { %6112 = vmatprep.subr.mxu0 %v11531_v55  ;;  %6255 = vmatprep.subr.mxu1 %v11531_v55  ;;  %v10807_v39 = vsub.f32 %v6077_v53, %v10793_v56  ;;  %v11940_v53 = vld [vmem:[#allocation9_spill] sm:$0xff] }
 0x6a0   :  { %6114 = vmatpush1.msra.mxu0 %v8255_v12  ;;  %6261 = vmatpush1.msra.mxu1 %v11622_v46  ;;  %v11910_v46 = vld [vmem:[#allocation27_spill] sm:$0xff] }
 0x6a1   :  { %6115 = vmatprep.subr.mxu0 %v11531_v55  ;;  %6262 = vmatprep.subr.mxu1 %v11531_v55  ;;  %v6195_v59 = vand.u32 4294901760, %v10807_v39 }
 0x6a2   :  { %6117 = vmatpush1.msra.mxu0 %v8270_v17  ;;  %6268 = vmatpush1.msra.mxu1 %v11623_v13  ;;  %v11911_v13 = vld [vmem:[#allocation30_spill] sm:$0xff] }
 0x6a3   :  { %6118 = vmatprep.subr.mxu0 %v11531_v55  ;;  %6269 = vmatprep.subr.mxu1 %v11531_v55  ;;  %v6196_v43 = vsub.f32 %v10807_v39, %v6195_v59 }
 0x6a4   :  { %6120 = vmatpush1.msra.mxu0 %v8295_v25  ;;  %6275 = vmatpush1.msra.mxu1 %v11909_v15  ;;  %v6191_v15 = vand.u32 4294901760, %v6190_v33  ;;  %v8166_v33 = vld [vmem:[%s11275_s2 + $0x10] sm:$0xff] }
 0x6a5   :  { %6121 = vmatprep.subr.mxu0 %v11531_v55  ;;  %6276 = vmatprep.subr.mxu1 %v11531_v55 }
 0x6a6   :  { %6123 = vmatpush1.msra.mxu0 %v8304_v28  ;;  %6282 = vmatpush1.msra.mxu1 %v11910_v46  ;;  %v11928_v46 = vld [vmem:[#allocation72_spill] sm:$0xff] }
 0x6a7   :  { %6124 = vmatprep.subr.mxu0 %v11531_v55  ;;  %6283 = vmatprep.subr.mxu1 %v11531_v55 }
 0x6a8   :  { %6126 = vmatpush1.msra.mxu0 %v8323_v35  ;;  %6289 = vmatpush1.msra.mxu1 %v11911_v13  ;;  %v11929_v13 = vld [vmem:[#allocation84_spill] sm:$0xff] }
 0x6a9   :  { %6127 = vmatprep.subr.mxu0 %v11531_v55  ;;  %6290 = vmatprep.subr.mxu1 %v11531_v55 }
 0x6aa   :  { %6129 = vmatpush1.msra.mxu0 %v8351_v45  ;;  %6296 = vmatpush1.msra.mxu1 %v11912_v42  ;;  %v6197_v42 = vand.u32 4294901760, %v6196_v43 }
 0x6ab   :  { %6130 = vmatprep.subr.mxu0 %v11531_v55  ;;  %6297 = vmatprep.subr.mxu1 %v11531_v55 }
 0x6ac   :  { %6132 = vmatpush1.msra.mxu0 %v8361_v48  ;;  %6303 = vmatpush1.msra.mxu1 %v11913_v0  ;;  %v11930_v0 = vld [vmem:[#allocation76_spill] sm:$0xff] }
 0x6ad   :  { %6133 = vmatprep.subr.mxu0 %v11531_v55  ;;  %6304 = vmatprep.subr.mxu1 %v11531_v55 }
 0x6ae   :  { %6135 = vmatpush1.msra.mxu0 %v8389_v57  ;;  %6310 = vmatpush1.msra.mxu1 %v11914_v3  ;;  %v11934_v3 = vld [vmem:[#allocation89_spill] sm:$0xff] }
 0x6af   :  { %6136 = vmatprep.subr.mxu0 %v11531_v55  ;;  %6311 = vmatprep.subr.mxu1 %v11531_v55 }
 0x6b0   :  { %6138 = vmatpush1.msra.mxu0 %v8402_v61  ;;  %6317 = vmatpush1.msra.mxu1 %v11915_v47  ;;  %v11935_v47 = vld [vmem:[#allocation6_spill] sm:$0xff] }
 0x6b1   :  { %6139 = vmatprep.subr.mxu0 %v11531_v55  ;;  %6318 = vmatprep.subr.mxu1 %v11531_v55 }
 0x6b2   :  { %6141 = vmatpush1.msra.mxu0 %v8421_v7  ;;  %6324 = vmatpush1.msra.mxu1 %v11916_v34  ;;  %v11936_v34 = vld [vmem:[#allocation90_spill] sm:$0xff] }
 0x6b3   :  { %6142 = vmatprep.subr.mxu0 %v11531_v55  ;;  %6325 = vmatprep.subr.mxu1 %v11531_v55 }
 0x6b4   :  { %6144 = vmatpush1.msra.mxu0 %v8437_v19  ;;  %6331 = vmatpush1.msra.mxu1 %v11917_v1  ;;  %v11941_v1 = vld [vmem:[#allocation15_spill] sm:$0xff] }
 0x6b5   :  { %6157 = vmatprep.subr.mxu0 %v11531_v55  ;;  %6332 = vmatprep.subr.mxu1 %v11531_v55 }
 0x6b6   :  { %6159 = vmatpush2.msra.mxu0 %v11583_v54  ;;  %6338 = vmatpush1.msra.mxu1 %v11918_v51  ;;  %v8164_v51 = vld [vmem:[%s11275_s2 + $0x18] sm:$0xff] }
 0x6b7   :  { %6160 = vmatprep.subr.mxu0 %v11531_v55  ;;  %6339 = vmatprep.subr.mxu1 %v11531_v55 }
 0x6b8   :  { %6162 = vmatpush2.msra.mxu0 %v11584_v62  ;;  %6345 = vmatpush1.msra.mxu1 %v11919_v16  ;;  %v8165_v16 = vld [vmem:[%s11276_s3 + $0x18] sm:$0xff] }
 0x6b9   :  { %6163 = vmatprep.subr.mxu0 %v11531_v55  ;;  %6346 = vmatprep.subr.mxu1 %v11531_v55 }
 0x6ba   :  { %6165 = vmatpush2.msra.mxu0 %v11585_v20  ;;  %6352 = vmatpush1.msra.mxu1 %v11920_v40  ;;  %v6080_v40 = vmul.f32 %v8165_v16, %v8164_v51  ;;  %v11947_v51 = vld [vmem:[#allocation32_spill] sm:$0xff] }
 0x6bb   :  { %6166 = vmatprep.subr.mxu0 %v11531_v55  ;;  %6353 = vmatprep.subr.mxu1 %v11531_v55 }
 0x6bc   :  { %6168 = vmatpush2.msra.mxu0 %v11586_v36  ;;  %6359 = vmatpush1.msra.mxu1 %v11921_v32  ;;  %v11942_v32 = vld [vmem:[#allocation16_spill] sm:$0xff] }
 0x6bd   :  { %6169 = vmatprep.subr.mxu0 %v11531_v55  ;;  %6372 = vmatprep.subr.mxu1 %v11531_v55 }
 0x6be   :  { %6171 = vmatpush2.msra.mxu0 %v8540_v63  ;;  %6378 = vmatpush2.msra.mxu1 %v11922_v18  ;;  %v11943_v18 = vld [vmem:[#allocation20_spill] sm:$0xff] }
 0x6bf   :  { %6172 = vmatprep.subr.mxu0 %v11531_v55  ;;  %6379 = vmatprep.subr.mxu1 %v11531_v55 }
 0x6c0   :  { %6174 = vmatpush2.msra.mxu0 %v11587_v29  ;;  %6385 = vmatpush2.msra.mxu1 %v11923_v44  ;;  %v6089_v44 = vsel %vm62_vm0, %v6080_v40, 0 }
 0x6c1   :  { %6175 = vmatprep.subr.mxu0 %v11531_v55  ;;  %6386 = vmatprep.subr.mxu1 %v11531_v55 }
 0x6c2   :  { %6177 = vmatpush2.msra.mxu0 %v11924_v27  ;;  %6392 = vmatpush2.msra.mxu1 %v11925_v8  ;;  %v8167_v8 = vld [vmem:[%s11276_s3 + $0x10] sm:$0xff] }
 0x6c3   :  { %6178 = vmatprep.subr.mxu0 %v11531_v55  ;;  %6393 = vmatprep.subr.mxu1 %v11531_v55  ;;  %v6079_v43 = vmul.f32 %v8167_v8, %v8166_v33  ;;  %v11949_v8 = vld [vmem:[#allocation38_spill] sm:$0xff] }
 0x6c4   :  { %6180 = vmatpush2.msra.mxu0 %v11926_v31  ;;  %6399 = vmatpush2.msra.mxu1 %v11927_v50  ;;  %v11944_v50 = vld [vmem:[#allocation23_spill] sm:$0xff] }
 0x6c5   :  { %6181 = vmatprep.subr.mxu0 %v11531_v55  ;;  %6400 = vmatprep.subr.mxu1 %v11531_v55 }
 0x6c6   :  { %6183 = vmatpush2.msra.mxu0 %v11928_v46  ;;  %6406 = vmatpush2.msra.mxu1 %v11929_v13  ;;  %v8169_v13 = vld [vmem:[%s11276_s3 + $0x28] sm:$0xff] }
 0x6c7   :  { %6184 = vmatprep.subr.mxu0 %v11531_v55  ;;  %6407 = vmatprep.subr.mxu1 %v11531_v55 }
 0x6c8   :  { %6186 = vmatpush2.msra.mxu0 %v11930_v0  ;;  %6413 = vmatpush2.msra.mxu1 %v11931_v49  ;;  %v11945_v49 = vld [vmem:[#allocation26_spill] sm:$0xff] }
 0x6c9   :  { %6192 = vmatprep.mubr.f32.mxu0 %v6191_v15  ;;  %6414 = vmatprep.subr.mxu1 %v11531_v55  ;;  %v8168_v15 = vld [vmem:[%s11275_s2 + $0x28] sm:$0xff] }
 0x6ca   :  { %6471 = vmatprep.subr.mxu0 %v11531_v55  ;;  %6198 = vmatmul.mubr.f32.vlgmr.msra.gmra.mxu0 %v6197_v42  ;;  %v6082_v42 = vmul.f32 %v8169_v13, %v8168_v15  ;;  %v8175_v15 = vld [vmem:[%s11276_s3 + $0x30] sm:$0x3] }
 0x6cb   :  { %6420 = vmatpush2.msra.mxu1 %v11932_v26  ;;  %6474 = vmatpush1.msra.mxu0 %v11933_v58  ;;  %v10906_v26 = vand.u32 4294901760, %v6089_v44  ;;  %v10910_v58 = vand.u32 4294901760, %v6079_v43 }
 0x6cc   :  { %6421 = vmatprep.subr.mxu1 %v11531_v55  ;;  %6475 = vmatprep.subr.mxu0 %v11531_v55 }
 0x6cd   :  { %6427 = vmatpush2.msra.mxu1 %v11934_v3  ;;  %6478 = vmatpush1.msra.mxu0 %v11935_v47  ;;  %v11946_v3 = vld [vmem:[#allocation29_spill] sm:$0xff]  ;;  %v6092_v47 = vsel %vm62_vm0, %v6082_v42, 0  ;;  %v10932_v16 = vsub.f32 %v6089_v44, %v10906_v26  ;;  %v10937_v40 = vsub.f32 %v6079_v43, %v10910_v58 }
 0x6ce   :  { %6428 = vmatprep.subr.mxu1 %v11531_v55  ;;  %6479 = vmatprep.subr.mxu0 %v11531_v55 }
 0x6cf   :  { %6434 = vmatpush2.msra.mxu1 %v11936_v34  ;;  %6482 = vmatpush1.msra.mxu0 %v11937_v24  ;;  %v8170_v34 = vld [vmem:[%s11275_s2 + $0x20] sm:$0xff]  ;;  %v6204_v43 = vand.u32 4294901760, %v10932_v16  ;;  %v11488_v42 = vand.u32 4294901760, %v10937_v40 }
 0x6d0   :  { %6435 = vmatprep.subr.mxu1 %v11531_v55  ;;  %6483 = vmatprep.subr.mxu0 %v11531_v55  ;;  %v8171_v24 = vld [vmem:[%s11276_s3 + $0x20] sm:$0xff] }
 0x6d1   :  { %6441 = vmatpush2.msra.mxu1 %v11938_v41  ;;  %6443 = vmatprep.mubr.f32.mxu1 %v10789_v38  ;;  %v6081_v41 = vmul.f32 %v8171_v24, %v8170_v34 }
 0x6d2   :  { %6486 = vmatpush1.msra.mxu0 %v11939_v23  ;;  %6445 = vmatmul.mubr.f32.vlgmr.msra.gmra.mxu1 %v10793_v56  ;;  %v8172_v23 = vld [vmem:[%s11275_s2 + $0x38] sm:$0x3] }
 0x6d3   :  { %6487 = vmatprep.subr.mxu0 %v11531_v55  ;;  %6624 = vmatprep.subr.mxu1 %v11531_v55  ;;  %v10943_v33 = vand.u32 4294901760, %v6081_v41 }
 0x6d4   :  { %6490 = vmatpush1.msra.mxu0 %v11940_v53  ;;  %6626 = vmatpush1.msra.mxu1 %v8235_v4  ;;  %v8173_v53 = vld [vmem:[%s11276_s3 + $0x38] sm:$0x3] }
 0x6d5   :  { %6491 = vmatprep.subr.mxu0 %v11531_v55  ;;  %6627 = vmatprep.subr.mxu1 %v11531_v55  ;;  %v10966_v34 = vsub.f32 %v6081_v41, %v10943_v33  ;;  %v6211_v41 = vsub.f32 %v10937_v40, %v11488_v42  ;;  %v11956_v42 = vld [vmem:[#allocation64_spill] sm:$0xff] }
 0x6d6   :  { %6494 = vmatpush1.msra.mxu0 %v11941_v1  ;;  %6629 = vmatpush1.msra.mxu1 %v8237_v5  ;;  %v6084_v1 = vmul.f32 %v8173_v53, %v8172_v23  ;;  %v11951_v23 = vld [vmem:[#allocation46_spill] sm:$0xff] }
 0x6d7   :  { %6495 = vmatprep.subr.mxu0 %v11531_v55  ;;  %6630 = vmatprep.subr.mxu1 %v11531_v55 }
 0x6d8   :  { %6498 = vmatpush1.msra.mxu0 %v11942_v32  ;;  %6632 = vmatpush1.msra.mxu1 %v8239_v6  ;;  %v10939_v32 = vand.u32 4294901760, %v6092_v47  ;;  %v6095_v44 = vsel %vm62_vm0, %v6084_v1, 0 }
 0x6d9   :  { %6499 = vmatprep.subr.mxu0 %v11531_v55  ;;  %6633 = vmatprep.subr.mxu1 %v11531_v55  ;;  %v10968_v24 = vand.u32 4294901760, %v6095_v44 }
 0x6da   :  { %6502 = vmatpush1.msra.mxu0 %v11943_v18  ;;  %6635 = vmatpush1.msra.mxu1 %v8251_v10  ;;  %v11948_v18 = vld [vmem:[#allocation35_spill] sm:$0xff] }
 0x6db   :  { %6503 = vmatprep.subr.mxu0 %v11531_v55  ;;  %6636 = vmatprep.subr.mxu1 %v11531_v55 }
 0x6dc   :  { %6506 = vmatpush1.msra.mxu0 %v11944_v50  ;;  %6638 = vmatpush1.msra.mxu1 %v8253_v11  ;;  %v8174_v50 = vld [vmem:[%s11275_s2 + $0x30] sm:$0x3]  ;;  %s8199_s2 = smov [#allocation2]  }
 0x6dd   :  { %6507 = vmatprep.subr.mxu0 %v11531_v55  ;;  %6639 = vmatprep.subr.mxu1 %v11531_v55  ;;  %v6083_v13 = vmul.f32 %v8175_v15, %v8174_v50  ;;  %v11953_v50 = vld [vmem:[#allocation54_spill] sm:$0xff]  ;;  %s7620_s3 = sshll.u32 %s8199_s2, 4  ;;  %s7621_s3 = int_to_ptr.vmem [resolvable:$true] %s7620_s3 }
 0x6de   :  { %6510 = vmatpush1.msra.mxu0 %v11945_v49  ;;  %6641 = vmatpush1.msra.mxu1 %v8255_v12  ;;  %v10961_v49 = vsub.f32 %v6092_v47, %v10939_v32  ;;  %v6205_v47 = vsub.f32 %v10932_v16, %v6204_v43  ;;  %s8176_s30 = scalar_lea.vmem %s7621_s3, 16  ;;  %s8180_s5 = scalar_lea.vmem %s7621_s3, 32 }
 0x6df   :  { %6511 = vmatprep.subr.mxu0 %v11531_v55  ;;  %6642 = vmatprep.subr.mxu1 %v11531_v55  ;;  %v10977_v53 = vand.u32 4294901760, %v6083_v13  ;;  %p8177_p0 = scmp.ne.s32.totalorder %s7621_s3, %s8176_s30  ;;  %p8181_p1 = scmp.lt.s32.totalorder %s7621_s3, %s7621_s3 }
 0x6e0   :  { %6514 = vmatpush1.msra.mxu0 %v11946_v3  ;;  %6644 = vmatpush1.msra.mxu1 %v8270_v17  ;;  %v11950_v3 = vld [vmem:[#allocation39_spill] sm:$0xff]  ;;  %v11487_v1 = vand.u32 4294901760, %v10961_v49  ;;  %v6206_v15 = vand.u32 4294901760, %v6205_v47  ;;  %p8182_p2 = scmp.lt.s32.totalorder %s8180_s5, %s8176_s30 }
 0x6e1   :  { %6515 = vmatprep.subr.mxu0 %v11531_v55  ;;  %6645 = vmatprep.subr.mxu1 %v11531_v55 }
 0x6e2   :  { %6518 = vmatpush1.msra.mxu0 %v11947_v51  ;;  %6647 = vmatpush1.msra.mxu1 %v8295_v25  ;;  %v11952_v51 = vld [vmem:[#allocation50_spill] sm:$0xff]  ;;  %p8183_p3 = por %p8182_p2, %p8181_p1 }
 0x6e3   :  { %6519 = vmatprep.subr.mxu0 %v11531_v55  ;;  %6648 = vmatprep.subr.mxu1 %v11531_v55 }
 0x6e4   :  { %6522 = vmatpush1.msra.mxu0 %v11948_v18  ;;  %6650 = vmatpush1.msra.mxu1 %v8304_v28  ;;  %v11486_v18 = vand.u32 4294901760, %v10966_v34  ;;  %p8184_p4 = pnand %p8183_p3, %p8177_p0 }
 0x6e5   :  { %6523 = vmatprep.subr.mxu0 %v11531_v55  ;;  %6651 = vmatprep.subr.mxu1 %v11531_v55 }
 0x6e6   :  { %6526 = vmatpush1.msra.mxu0 %v11949_v8  ;;  %6653 = vmatpush1.msra.mxu1 %v8323_v35  ;;  %v10989_v8 = vsub.f32 %v6095_v44, %v10968_v24  ;;  %v6220_v44 = vsub.f32 %v10961_v49, %v11487_v1  ;;  %v6226_v47 = vsub.f32 %v10966_v34, %v11486_v18 }
 0x6e7   :  { %6527 = vmatprep.subr.mxu0 %v11531_v55  ;;  %6654 = vmatprep.subr.mxu1 %v11531_v55 }
 0x6e8   :  { %6530 = vmatpush1.msra.mxu0 %v11950_v3  ;;  %6656 = vmatpush1.msra.mxu1 %v8351_v45  ;;  %v10996_v3 = vsub.f32 %v6083_v13, %v10977_v53  ;;  %v6234_v13 = vand.u32 4294901760, %v10989_v8  ;;  %v6227_v18 = vand.u32 4294901760, %v6226_v47 }
 0x6e9   :  { %6531 = vmatprep.subr.mxu0 %v11531_v55  ;;  %6657 = vmatprep.subr.mxu1 %v11531_v55 }
 0x6ea   :  { %6534 = vmatpush1.msra.mxu0 %v11951_v23  ;;  %6659 = vmatpush1.msra.mxu1 %v8361_v48  ;;  %v6212_v23 = vand.u32 4294901760, %v6211_v41  ;;  %v11955_v41 = vld [vmem:[#allocation61_spill] sm:$0xff]  ;;  %v6235_v1 = vsub.f32 %v10989_v8, %v6234_v13 }
 0x6eb   :  { %6547 = vmatprep.subr.mxu0 %v11531_v55  ;;  %6660 = vmatprep.subr.mxu1 %v11531_v55 }
 0x6ec   :  { %6550 = vmatpush2.msra.mxu0 %v11952_v51  ;;  %6662 = vmatpush1.msra.mxu1 %v8389_v57  ;;  %v11954_v51 = vld [vmem:[#allocation57_spill] sm:$0xff] }
 0x6ed   :  { %6551 = vmatprep.subr.mxu0 %v11531_v55  ;;  %6663 = vmatprep.subr.mxu1 %v11531_v55 }
 0x6ee   :  { %6554 = vmatpush2.msra.mxu0 %v11953_v50  ;;  %6665 = vmatpush1.msra.mxu1 %v8402_v61  ;;  %v6240_v50 = vand.u32 4294901760, %v10996_v3 }
 0x6ef   :  { %6555 = vmatprep.subr.mxu0 %v11531_v55  ;;  %6666 = vmatprep.subr.mxu1 %v11531_v55 }
 0x6f0   :  { %6558 = vmatpush2.msra.mxu0 %v11954_v51  ;;  %6668 = vmatpush1.msra.mxu1 %v8421_v7  ;;  %v6221_v51 = vand.u32 4294901760, %v6220_v44  ;;  %v6236_v44 = vand.u32 4294901760, %v6235_v1  ;;  %v11960_v1 = vld [vmem:[#allocation80_spill] sm:$0xff] }
 0x6f1   :  { %6559 = vmatprep.subr.mxu0 %v11531_v55  ;;  %6669 = vmatprep.subr.mxu1 %v11531_v55 }
 0x6f2   :  { %6207 = vmatprep.mubr.f32.mxu0 %v6206_v15  ;;  %6562 = vmatpush2.msra.mxu0 %v11955_v41  ;;  %v6241_v15 = vsub.f32 %v10996_v3, %v6240_v50  ;;  %v11961_v41 = vld [vmem:[#allocation83_spill] sm:$0xff] }
 0x6f3   :  { %6671 = vmatpush1.msra.mxu1 %v8437_v19  ;;  %6213 = vmatmul.mubr.f32.gmra.mxu0 %v6212_v23  ;;  %v11957_v23 = vld [vmem:[#allocation68_spill] sm:$0xff] }
 0x6f4   :  { %6563 = vmatprep.subr.mxu0 %v11531_v55  ;;  %6684 = vmatprep.subr.mxu1 %v11531_v55  ;;  %v6242_v47 = vand.u32 4294901760, %v6241_v15  ;;  %v11963_v15 = vld [vmem:[#allocation11_spill] sm:$0xff] }
 0x6f5   :  { %6566 = vmatpush2.msra.mxu0 %v11956_v42  ;;  %6686 = vmatpush2.msra.mxu1 %v11583_v54  ;;  %v11958_v42 = vld [vmem:[#allocation73_spill] sm:$0xff] }
 0x6f6   :  { %6567 = vmatprep.subr.mxu0 %v11531_v55  ;;  %6687 = vmatprep.subr.mxu1 %v11531_v55 }
 0x6f7   :  { %6222 = vmatprep.mubr.f32.mxu0 %v6221_v51  ;;  %6570 = vmatpush2.msra.mxu0 %v11957_v23  ;;  %v11962_v51 = vld [vmem:[#allocation10_spill] sm:$0xff]  ;;  %v11964_v23 = vld [vmem:[#allocation12_spill] sm:$0xff] }
 0x6f8   :  { %6689 = vmatpush2.msra.mxu1 %v11584_v62  ;;  %6228 = vmatmul.mubr.f32.gmra.mxu0 %v6227_v18  ;;  %v11959_v18 = vld [vmem:[#allocation77_spill] sm:$0xff] }
 0x6f9   :  { %6571 = vmatprep.subr.mxu0 %v11531_v55  ;;  %6690 = vmatprep.subr.mxu1 %v11531_v55 }
 0x6fa   :  { %6574 = vmatpush2.msra.mxu0 %v11958_v42  ;;  %6692 = vmatpush2.msra.mxu1 %v11585_v20  ;;  %v11966_v42 = vld [vmem:[#allocation14_spill] sm:$0xff] }
 0x6fb   :  { %6450 = vmatprep.mubr.f32.mxu1 %v10906_v26  ;;  %6575 = vmatprep.subr.mxu0 %v11531_v55 }
 0x6fc   :  { %6693 = vmatprep.subr.mxu1 %v11531_v55  ;;  %6237 = vmatprep.mubr.f32.mxu0 %v6236_v44  ;;  %v11965_v44 = vld [vmem:[#allocation13_spill] sm:$0xff] }
 0x6fd   :  { %6452 = vmatmul.mubr.f32.gmra.mxu1 %v10910_v58  ;;  %6578 = vmatpush2.msra.mxu0 %v11959_v18  ;;  %v11995_v18 = vld [vmem:[#allocation58_spill] sm:$0xff] }
 0x6fe   :  { %6695 = vmatpush2.msra.mxu1 %v11586_v36  ;;  %6243 = vmatmul.mubr.f32.gmra.mxu0 %v6242_v47 }
 0x6ff   :  { %6579 = vmatprep.subr.mxu0 %v11531_v55  ;;  %6696 = vmatprep.subr.mxu1 %v11531_v55 }
 0x700   :  { %6582 = vmatpush2.msra.mxu0 %v11960_v1  ;;  %6698 = vmatpush2.msra.mxu1 %v8540_v63 }
 0x701   :  { %6457 = vmatprep.mubr.f32.mxu1 %v10939_v32  ;;  %6583 = vmatprep.subr.mxu0 %v11531_v55 }
 0x702   :  { %6699 = vmatprep.subr.mxu1 %v11531_v55  ;;  %6459 = vmatmul.mubr.f32.gmra.mxu1 %v10943_v33 }
 0x703   :  { %6586 = vmatpush2.msra.mxu0 %v11961_v41  ;;  %6589 = vmatprep.mubr.f32.mxu0 %v10802_v14  ;;  %v11967_v14 = vld [vmem:[#allocation19_spill] sm:$0xff] }
 0x704   :  { %6701 = vmatpush2.msra.mxu1 %v11587_v29  ;;  %6592 = vmatmul.mubr.f32.vlgmr.msra.gmra.mxu0 %v10807_v39  ;;  %v11968_v39 = vand.u32 4294901760, %v10937_v40 }
 0x705   :  { %6702 = vmatprep.subr.mxu1 %v11531_v55  ;;  %6759 = vmatprep.subr.mxu0 %v11531_v55 }
 0x706   :  { %6704 = vmatpush2.msra.mxu1 %v11924_v27  ;;  %6763 = vmatpush1.msra.mxu0 %v11962_v51 }
 0x707   :  { %6464 = vmatprep.mubr.f32.mxu1 %v10968_v24  ;;  %6705 = vmatprep.subr.mxu1 %v11531_v55 }
 0x708   :  { %6764 = vmatprep.subr.mxu0 %v11531_v55  ;;  %6466 = vmatmul.mubr.f32.gmra.mxu1 %v10977_v53 }
 0x709   :  { %6598 = vmatprep.mubr.f32.mxu0 %v10932_v16  ;;  %6707 = vmatpush2.msra.mxu1 %v11926_v31  ;;  %v11973_v16 = vld [vmem:[#allocation28_spill] sm:$0xff] }
 0x70a   :  { %6768 = vmatpush1.msra.mxu0 %v11963_v15  ;;  %6708 = vmatprep.subr.mxu1 %v11531_v55 }
 0x70b   :  { %6601 = vmatmul.mubr.f32.gmra.mxu0 %v10937_v40  ;;  %6769 = vmatprep.subr.mxu0 %v11531_v55 }
 0x70c   :  { %6710 = vmatpush2.msra.mxu1 %v11928_v46  ;;  %6773 = vmatpush1.msra.mxu0 %v11964_v23  ;;  %v11997_v23 = vld [vmem:[#allocation21_spill] sm:$0xff] }
 0x70d   :  { %6711 = vmatprep.subr.mxu1 %v11531_v55  ;;  %6774 = vmatprep.subr.mxu0 %v11531_v55 }
 0x70e   :  { %6607 = vmatprep.mubr.f32.mxu0 %v10961_v49  ;;  %6713 = vmatpush2.msra.mxu1 %v11930_v0 }
 0x70f   :  { %6717 = vmatprep.mubr.f32.mxu1 %v6189_v60  ;;  %6778 = vmatpush1.msra.mxu0 %v11965_v44  ;;  %v11970_v60 = vand.u32 4294901760, %v10961_v49 }
 0x710   :  { %6610 = vmatmul.mubr.f32.gmra.mxu0 %v10966_v34  ;;  %6721 = vmatmul.mubr.f32.vlgmr.msra.gmra.mxu1 %v6195_v59  ;;  %v11972_v59 = vand.u32 4294901760, %v10966_v34  ;;  %v11993_v34 = vld [vmem:[#allocation49_spill] sm:$0xff] }
 0x711   :  { %6779 = vmatprep.subr.mxu0 %v11531_v55  ;;  %6930 = vmatprep.subr.mxu1 %v11531_v55 }
 0x712   :  { %6783 = vmatpush1.msra.mxu0 %v11966_v42  ;;  %6932 = vmatpush1.msra.mxu1 %v8235_v4  ;;  %v11969_v4 = vld [vmem:[#allocation22_spill] sm:$0xff] }
 0x713   :  { %6784 = vmatprep.subr.mxu0 %v11531_v55  ;;  %6933 = vmatprep.subr.mxu1 %v11531_v55 }
 0x714   :  { %6616 = vmatprep.mubr.f32.mxu0 %v10989_v8  ;;  %6728 = vmatprep.mubr.f32.mxu1 %v6204_v43 }
 0x715   :  { %6788 = vmatpush1.msra.mxu0 %v11967_v14  ;;  %6935 = vmatpush1.msra.mxu1 %v8237_v5  ;;  %v11971_v5 = vld [vmem:[#allocation25_spill] sm:$0xff] }
 0x716   :  { %6619 = vmatmul.mubr.f32.gmra.mxu0 %v10996_v3  ;;  %6732 = vmatmul.mubr.f32.gmra.mxu1 %v11968_v39  ;;  %v11994_v3 = vld [vmem:[#allocation51_spill] sm:$0xff] }
 0x717   :  { %6789 = vmatprep.subr.mxu0 %v11531_v55  ;;  %6936 = vmatprep.subr.mxu1 %v11531_v55 }
 0x718   :  { %6793 = vmatpush1.msra.mxu0 %v11969_v4  ;;  %6938 = vmatpush1.msra.mxu1 %v8239_v6  ;;  %v11974_v6 = vld [vmem:[#allocation31_spill] sm:$0xff] }
 0x719   :  { %6794 = vmatprep.subr.mxu0 %v11531_v55  ;;  %6939 = vmatprep.subr.mxu1 %v11531_v55 }
 0x71a   :  { %6739 = vmatprep.mubr.f32.mxu1 %v11970_v60  ;;  %6798 = vmatpush1.msra.mxu0 %v11971_v5  ;;  %v11999_v5 = vld [vmem:[#allocation92_spill] sm:$0xff] }
 0x71b   :  { %6941 = vmatpush1.msra.mxu1 %v8251_v10  ;;  %6799 = vmatprep.subr.mxu0 %v11531_v55  ;;  %v11975_v10 = vld [vmem:[#allocation34_spill] sm:$0xff] }
 0x71c   :  { %6743 = vmatmul.mubr.f32.gmra.mxu1 %v11972_v59  ;;  %6942 = vmatprep.subr.mxu1 %v11531_v55 }
 0x71d   :  { %6803 = vmatpush1.msra.mxu0 %v11973_v16  ;;  %6944 = vmatpush1.msra.mxu1 %v8253_v11  ;;  %v11976_v11 = vld [vmem:[#allocation37_spill] sm:$0xff] }
 0x71e   :  { %6804 = vmatprep.subr.mxu0 %v11531_v55  ;;  %6945 = vmatprep.subr.mxu1 %v11531_v55 }
 0x71f   :  { %6750 = vmatprep.mubr.f32.mxu1 %v6234_v13  ;;  %6808 = vmatpush1.msra.mxu0 %v11974_v6  ;;  %v12000_v6 = vld [vmem:[#allocation97_spill] sm:$0xff] }
 0x720   :  { %6947 = vmatpush1.msra.mxu1 %v8255_v12  ;;  %6809 = vmatprep.subr.mxu0 %v11531_v55  ;;  %v11977_v12 = vld [vmem:[#allocation42_spill] sm:$0xff] }
 0x721   :  { %6754 = vmatmul.mubr.f32.gmra.mxu1 %v6240_v50  ;;  %6948 = vmatprep.subr.mxu1 %v11531_v55 }
 0x722   :  { %6813 = vmatpush1.msra.mxu0 %v11975_v10  ;;  %6950 = vmatpush1.msra.mxu1 %v8270_v17  ;;  %v11978_v17 = vld [vmem:[#allocation45_spill] sm:$0xff] }
 0x723   :  { %6814 = vmatprep.subr.mxu0 %v11531_v55  ;;  %6951 = vmatprep.subr.mxu1 %v11531_v55 }
 0x724   :  { %6818 = vmatpush1.msra.mxu0 %v11976_v11  ;;  %6953 = vmatpush1.msra.mxu1 %v8295_v25  ;;  %v11979_v25 = vld [vmem:[#allocation47_spill] sm:$0xff]  ;;  %v12001_v11 = vld [vmem:[#allocation96_spill] sm:$0xff] }
 0x725   :  { %6819 = vmatprep.subr.mxu0 %v11531_v55  ;;  %6954 = vmatprep.subr.mxu1 %v11531_v55 }
 0x726   :  { %6823 = vmatpush1.msra.mxu0 %v11977_v12  ;;  %6956 = vmatpush1.msra.mxu1 %v8304_v28  ;;  %v11980_v28 = vld [vmem:[#allocation53_spill] sm:$0xff] }
 0x727   :  { %6824 = vmatprep.subr.mxu0 %v11531_v55  ;;  %6957 = vmatprep.subr.mxu1 %v11531_v55  ;;  %v12002_v12 = vld [vmem:[#allocation17_spill] sm:$0xff] }
 0x728   :  { %6828 = vmatpush1.msra.mxu0 %v11978_v17  ;;  %6959 = vmatpush1.msra.mxu1 %v8323_v35  ;;  %v11981_v35 = vld [vmem:[#allocation56_spill] sm:$0xff]  ;;  %v12003_v17 = vsub.f32 %v12001_v11, %v12002_v12 }
 0x729   :  { %6829 = vmatprep.subr.mxu0 %v11531_v55  ;;  %6960 = vmatprep.subr.mxu1 %v11531_v55 }
 0x72a   :  { %6833 = vmatpush1.msra.mxu0 %v11979_v25  ;;  %6962 = vmatpush1.msra.mxu1 %v8351_v45  ;;  %v11982_v45 = vld [vmem:[#allocation60_spill] sm:$0xff] }
 0x72b   :  { %6834 = vmatprep.subr.mxu0 %v11531_v55  ;;  %6963 = vmatprep.subr.mxu1 %v11531_v55 }
 0x72c   :  { %6838 = vmatpush1.msra.mxu0 %v11980_v28  ;;  %6965 = vmatpush1.msra.mxu1 %v8361_v48  ;;  %v11983_v48 = vld [vmem:[#allocation63_spill] sm:$0xff] }
 0x72d   :  { %6851 = vmatprep.subr.mxu0 %v11531_v55  ;;  %6966 = vmatprep.subr.mxu1 %v11531_v55 }
 0x72e   :  { %6855 = vmatpush2.msra.mxu0 %v11981_v35  ;;  %6968 = vmatpush1.msra.mxu1 %v8389_v57  ;;  %v11984_v57 = vld [vmem:[#allocation67_spill] sm:$0xff] }
 0x72f   :  { %6856 = vmatprep.subr.mxu0 %v11531_v55  ;;  %6969 = vmatprep.subr.mxu1 %v11531_v55  ;;  %v12004_v35 = vld [vmem:[#allocation95_spill] sm:$0xff] }
 0x730   :  { %6860 = vmatpush2.msra.mxu0 %v11982_v45  ;;  %6971 = vmatpush1.msra.mxu1 %v8402_v61  ;;  %v11985_v61 = vld [vmem:[#allocation71_spill] sm:$0xff]  ;;  %v7595_v45 = vadd.f32 0.0001, %v12004_v35 }
 0x731   :  { %6861 = vmatprep.subr.mxu0 %v11531_v55  ;;  %6972 = vmatprep.subr.mxu1 %v11531_v55 }
 0x732   :  { %6865 = vmatpush2.msra.mxu0 %v11983_v48  ;;  %6974 = vmatpush1.msra.mxu1 %v8421_v7  ;;  %v11986_v7 = vld [vmem:[#allocation75_spill] sm:$0xff] }
 0x733   :  { %6866 = vmatprep.subr.mxu0 %v11531_v55  ;;  %6975 = vmatprep.subr.mxu1 %v11531_v55 }
 0x734   :  { %6870 = vmatpush2.msra.mxu0 %v11984_v57  ;;  %6977 = vmatpush1.msra.mxu1 %v8437_v19  ;;  %v11987_v19 = vld [vmem:[#allocation79_spill] sm:$0xff] }
 0x735   :  { %6871 = vmatprep.subr.mxu0 %v11531_v55  ;;  %6990 = vmatprep.subr.mxu1 %v11531_v55 }
 0x736   :  { %6875 = vmatpush2.msra.mxu0 %v11985_v61  ;;  %6992 = vmatpush2.msra.mxu1 %v11583_v54  ;;  %v11988_v54 = vld [vmem:[#allocation82_spill] sm:$0xff] }
 0x737   :  { %6876 = vmatprep.subr.mxu0 %v11531_v55  ;;  %6993 = vmatprep.subr.mxu1 %v11531_v55 }
 0x738   :  { %6880 = vmatpush2.msra.mxu0 %v11986_v7  ;;  %6995 = vmatpush2.msra.mxu1 %v11584_v62  ;;  %v11989_v62 = vld [vmem:[#allocation85_spill] sm:$0xff] }
 0x739   :  { %6881 = vmatprep.subr.mxu0 %v11531_v55  ;;  %6996 = vmatprep.subr.mxu1 %v11531_v55 }
 0x73a   :  { %6885 = vmatpush2.msra.mxu0 %v11987_v19  ;;  %6998 = vmatpush2.msra.mxu1 %v11585_v20  ;;  %v11990_v20 = vld [vmem:[#allocation87_spill] sm:$0xff] }
 0x73b   :  { %6886 = vmatprep.subr.mxu0 %v11531_v55  ;;  %6999 = vmatprep.subr.mxu1 %v11531_v55 }
 0x73c   :  { %6890 = vmatpush2.msra.mxu0 %v11988_v54  ;;  %7001 = vmatpush2.msra.mxu1 %v11586_v36 }
 0x73d   :  { %6891 = vmatprep.subr.mxu0 %v11531_v55  ;;  %7002 = vmatprep.subr.mxu1 %v11531_v55 }
 0x73e   :  { %6895 = vmatpush2.msra.mxu0 %v11989_v62  ;;  %7004 = vmatpush2.msra.mxu1 %v8540_v63 }
 0x73f   :  { %6896 = vmatprep.subr.mxu0 %v11531_v55  ;;  %7005 = vmatprep.subr.mxu1 %v11531_v55 }
 0x740   :  { %6900 = vmatpush2.msra.mxu0 %v11990_v20  ;;  %6902 = vmatprep.mubr.f32.mxu0 %v10789_v38 }
 0x741   :  { %7007 = vmatpush2.msra.mxu1 %v11587_v29  ;;  %6904 = vmatmul.mubr.f32.vlgmr.msra.gmra.mxu0 %v10793_v56  ;;  %v8016_v36 = vpop.f32.mrf.mxu0 }
 0x742   :  { %7008 = vmatprep.subr.mxu1 %v11531_v55  ;;  %6909 = vmatprep.mubr.f32.mxu0 %v10906_v26 }
 0x743   :  { %7010 = vmatpush2.msra.mxu1 %v11924_v27  ;;  %7021 = vmatprep.mubr.f32.mxu1 %v10789_v38  ;;  %v5622_v63 = vpop.f32.mrf.mxu0 }
 0x744   :  { %7011 = vmatprep.subr.mxu1 %v11531_v55 }
 0x745   :  { %7013 = vmatpush2.msra.mxu1 %v11926_v31  ;;  %6911 = vmatmul.mubr.f32.gmra.mxu0 %v10910_v58 }
 0x746   :  { %7014 = vmatprep.subr.mxu1 %v11531_v55  ;;  %6916 = vmatprep.mubr.f32.mxu0 %v10939_v32 }
 0x747   :  { %7016 = vmatpush2.msra.mxu1 %v11928_v46  ;;  %v11991_v46 = vld [vmem:[#allocation41_spill] sm:$0xff] }
 0x748   :  { %7017 = vmatprep.subr.mxu1 %v11531_v55  ;;  %v8027_v29 = vpop.f32.mrf.mxu1 }
 0x749   :  { %7019 = vmatpush2.msra.mxu1 %v11930_v0  ;;  %6918 = vmatmul.mubr.f32.gmra.mxu0 %v10943_v33  ;;  %v5730_v38 = vadd.f32 %v8027_v29, %v8016_v36  ;;  %v11992_v0 = vld [vmem:[#allocation43_spill] sm:$0xff] }
 0x74a   :  { %7023 = vmatmul.mubr.f32.vlgmr.msra.gmra.mxu1 %v10793_v56  ;;  %6923 = vmatprep.mubr.f32.mxu0 %v10968_v24  ;;  %v5723_v27 = vpop.f32.mrf.mxu1  ;;  %v8038_v31 = vpop.f32.mrf.mxu0  ;;  %v1215_v8 = vadd.f32 %v11993_v34, %v11992_v0 }
 0x74b   :  { %7028 = vmatprep.mubr.f32.mxu1 %v10906_v26  ;;  %v5724_v40 = vadd.f32 %v5723_v27, %v5622_v63  ;;  %v5817_v43 = vadd.f32 %v8038_v31, %v5730_v38 }
 0x74c   :  { %v5809_v49 = vpop.f32.mrf.mxu0  ;;  %v1301_v26 = vadd.f32 %v11994_v3, %v1215_v8 }
 0x74d   :  { %6925 = vmatmul.mubr.f32.gmra.mxu0 %v10977_v53  ;;  %v5810_v55 = vadd.f32 %v5809_v49, %v5724_v40 }
 0x74e   :  { %7030 = vmatmul.mubr.f32.gmra.mxu1 %v10910_v58  ;;  %8080 = vmatprep.mubr.f32.mxu0 %v11991_v46  ;;  %v1385_v1 = vadd.f32 %v11995_v18, %v1301_v26 }
 0x74f   :  { %7035 = vmatprep.mubr.f32.mxu1 %v10939_v32  ;;  %v11996_v32 = vld [vmem:[#allocation18_spill] sm:$0xff] }
 0x752   :  { %7037 = vmatmul.mubr.f32.gmra.mxu1 %v10943_v33  ;;  %v8049_v56 = vpop.f32.mrf.mxu1  ;;  %v1476_v33 = vadd.f32 %v11996_v32, %v1385_v1 }
 0x753   :  { %7042 = vmatprep.mubr.f32.mxu1 %v10968_v24  ;;  %v5902_v13 = vadd.f32 %v8049_v56, %v5817_v43  ;;  %v11998_v24 = vld [vmem:[#allocation94_spill] sm:$0xff] }
 0x754   :  { %v5893_v50 = vpop.f32.mrf.mxu1  ;;  %v8060_v47 = vpop.f32.mrf.mxu0  ;;  %v11210_v44 = vadd.f32 %v11997_v23, %v1476_v33  ;;  %v3063_v14 = vmul.f32 %v11998_v24, %v11998_v24 }
 0x755   :  { %v5894_v58 = vadd.f32 %v5893_v50, %v5810_v55  ;;  %v5991_v41 = vadd.f32 %v8060_v47, %v5902_v13 }
 0x756   :  { %7044 = vmatmul.mubr.f32.gmra.mxu1 %v10977_v53  ;;  %v5984_v51 = vpop.f32.mrf.mxu0  ;;  %v3061_v60 = vmul.f32 %v11210_v44, %v11210_v44 }
 0x757   :  { %v5985_v15 = vadd.f32 %v5984_v51, %v5894_v58  ;;  %8091 = vmatprep.mubr.f32.mxu1 %v9079_v21 }
 0x758   :  { %v7592_v16 = vadd.f32 %v3063_v14, %v3061_v60  ;;  %v4570_v10 = vsub.f32 %v12000_v6, %v3061_v60 }
 0x75a   :  { %v7594_v61 = vadd.f32 0.0001, %v7592_v16 }
 0x75c   :  { %v8071_v42 = vpop.f32.mrf.mxu1 }
 0x75d   :  { %v6072_v39 = vadd.f32 %v8071_v42, %v5991_v41 }
 0x75e   :  { %v6065_v4 = vpop.f32.mrf.mxu1 }
 0x75f   :  { %v6076_v53 = vsub.f32 %v6072_v39, %v11999_v5  ;;  %v6066_v59 = vadd.f32 %v6065_v4, %v5985_v15 }
 0x761   :  { %v7597_v25 = vadd.f32 %v6076_v53, %v12003_v17  ;;  %v6075_v28 = vsub.f32 %v6066_v59, %v3063_v14 }
 0x763   :  { %v7599_v48 = vadd.f32 0.0009, %v7597_v25  ;;  %v7596_v57 = vadd.f32 %v6075_v28, %v4570_v10 }
 0x765   :  { %v11222_v7 = vmul.f32 %v7599_v48, %v7595_v45  ;;  %v7598_v19 = vadd.f32 0.0009, %v7596_v57 }
 0x767   :  { %v11224_v54 = vmul.f32 %v7598_v19, %v7594_v61  ;;  %8140 = vrcp.f32 %v11222_v7 }
 0x769   :  { %8142 = vrcp.f32 %v11224_v54 }
 0x78a   :  { %v6199_v62 = vpop.f32.mrf.mxu0 }
 0x78c   :  { %v6201_v20 = vpop.f32.mrf.mxu0 }
 0x792   :  { %v6446_v36 = vpop.f32.mrf.mxu1 }
 0x793   :  { %v6447_v63 = vadd.f32 %v6446_v36, %v6199_v62 }
 0x794   :  { %v6448_v29 = vpop.f32.mrf.mxu1 }
 0x7b3   :  { %v6214_v38 = vpop.f32.mrf.mxu0 }
 0x7b5   :  { %v6216_v27 = vpop.f32.mrf.mxu0 }
 0x7b8   :  { %v6229_v31 = vpop.f32.mrf.mxu0 }
 0x7ba   :  { %v6231_v40 = vpop.f32.mrf.mxu0 }
 0x7bd   :  { %v6453_v43 = vpop.f32.mrf.mxu1 }
 0x7be   :  { %v6454_v49 = vadd.f32 %v6453_v43, %v6214_v38  ;;  %v6244_v55 = vpop.f32.mrf.mxu0 }
 0x7bf   :  { %v6455_v46 = vpop.f32.mrf.mxu1 }
 0x7c0   :  { %v6246_v0 = vpop.f32.mrf.mxu0 }
 0x7c2   :  { %v6460_v34 = vpop.f32.mrf.mxu1 }
 0x7c3   :  { %v6461_v8 = vadd.f32 %v6460_v34, %v6229_v31 }
 0x7c4   :  { %v6593_v56 = vpop.f32.mrf.mxu0  ;;  %v6462_v3 = vpop.f32.mrf.mxu1 }
 0x7c5   :  { %v6594_v26 = vadd.f32 %v6593_v56, %v6447_v63 }
 0x7c6   :  { %v6595_v13 = vpop.f32.mrf.mxu0 }
 0x7c8   :  { %v6467_v50 = vpop.f32.mrf.mxu1 }
 0x7c9   :  { %v6468_v47 = vadd.f32 %v6467_v50, %v6244_v55 }
 0x7ca   :  { %v6469_v18 = vpop.f32.mrf.mxu1 }
 0x7cb   :  { %v6602_v1 = vpop.f32.mrf.mxu0 }
 0x7cc   :  { %v6603_v58 = vadd.f32 %v6602_v1, %v6454_v49 }
 0x7cd   :  { %v6604_v41 = vpop.f32.mrf.mxu0 }
 0x7d0   :  { %v6611_v51 = vpop.f32.mrf.mxu0  ;;  %v6722_v15 = vpop.f32.mrf.mxu1 }
 0x7d1   :  { %v6612_v32 = vadd.f32 %v6611_v51, %v6461_v8  ;;  %v6723_v33 = vadd.f32 %v6722_v15, %v6594_v26 }
 0x7d2   :  { %v6613_v23 = vpop.f32.mrf.mxu0  ;;  %v6724_v42 = vpop.f32.mrf.mxu1 }
 0x7d6   :  { %v6620_v14 = vpop.f32.mrf.mxu0  ;;  %v6733_v39 = vpop.f32.mrf.mxu1 }
 0x7d7   :  { %v6734_v4 = vadd.f32 %v6733_v39, %v6603_v58  ;;  %v6621_v36 = vadd.f32 %v6620_v14, %v6468_v47 }
 0x7d8   :  { %v6735_v60 = vpop.f32.mrf.mxu1  ;;  %v6622_v5 = vpop.f32.mrf.mxu0 }
 0x7dc   :  { %v6744_v53 = vpop.f32.mrf.mxu1 }
 0x7dd   :  { %v6745_v61 = vadd.f32 %v6744_v53, %v6612_v32 }
 0x7de   :  { %v6746_v59 = vpop.f32.mrf.mxu1 }
 0x7e1   :  { %v6755_v16 = vpop.f32.mrf.mxu1 }
 0x7e2   :  { %v6756_v31 = vadd.f32 %v6755_v16, %v6621_v36 }
 0x7e3   :  { %v6757_v6 = vpop.f32.mrf.mxu1 }
 0x801   :  { %v6905_v10 = vpop.f32.mrf.mxu0 }
 0x802   :  { %v6906_v29 = vadd.f32 %v6905_v10, %v6723_v33 }
 0x803   :  { %v6907_v11 = vpop.f32.mrf.mxu0 }
 0x805   :  { %v6912_v12 = vpop.f32.mrf.mxu0 }
 0x806   :  { %v6913_v62 = vadd.f32 %v6912_v12, %v6734_v4 }
 0x807   :  { %v6914_v17 = vpop.f32.mrf.mxu0 }
 0x809   :  { %v6919_v25 = vpop.f32.mrf.mxu0 }
 0x80a   :  { %v7024_v28 = vpop.f32.mrf.mxu1  ;;  %v6920_v63 = vadd.f32 %v6919_v25, %v6745_v61  ;;  %v12005_v61 = vld [vmem:[#allocation93_spill] sm:$0xff] }
 0x80b   :  { %v6921_v35 = vpop.f32.mrf.mxu0  ;;  %v7025_v43 = vadd.f32 %v7024_v28, %v6906_v29 }
 0x80c   :  { %v7026_v45 = vpop.f32.mrf.mxu1  ;;  %v3065_v35 = vmul.f32 %v11998_v24, %v11210_v44 }
 0x80d   :  { %v6926_v48 = vpop.f32.mrf.mxu0  ;;  %v11230_v56 = vand.u32 4294901760, %v7025_v43 }
 0x80e   :  { %v7031_v57 = vpop.f32.mrf.mxu1  ;;  %v6927_v55 = vadd.f32 %v6926_v48, %v6756_v31  ;;  %v7582_v36 = vmul.f32 2.0, %v3065_v35 }
 0x80f   :  { %v6928_v19 = vpop.f32.mrf.mxu0  ;;  %v7032_v38 = vadd.f32 %v7031_v57, %v6913_v62  ;;  %v7188_v18 = vsub.f32 %v7025_v43, %v11230_v56  ;;  %v8141_v43 = vpop.eup %8140 }
 0x810   :  { %v7033_v20 = vpop.f32.mrf.mxu1  ;;  %v7583_v19 = vmul.f32 2.0, %v12005_v61  ;;  %v7584_v54 = vadd.f32 0.0001, %v7582_v36  ;;  %v8143_v24 = vpop.eup %8142 }
 0x811   :  { %v11228_v0 = vand.u32 4294901760, %v7032_v38  ;;  %v7189_v33 = vand.u32 4294901760, %v7188_v18 }
 0x812   :  { %v7038_v27 = vpop.f32.mrf.mxu1  ;;  %v7585_v29 = vadd.f32 0.0001, %v7583_v19 }
 0x813   :  { %v7039_v40 = vadd.f32 %v7038_v27, %v6920_v63  ;;  %v7181_v50 = vsub.f32 %v7032_v38, %v11228_v0  ;;  %v7190_v39 = vsub.f32 %v7188_v18, %v7189_v33 }
 0x814   :  { %v7040_v49 = vpop.f32.mrf.mxu1 }
 0x815   :  { %v11226_v46 = vand.u32 4294901760, %v7039_v40  ;;  %v7182_v51 = vand.u32 4294901760, %v7181_v50  ;;  %v7191_v60 = vand.u32 4294901760, %v7190_v39 }
 0x816   :  { %v7045_v34 = vpop.f32.mrf.mxu1 }
 0x817   :  { %v7046_v8 = vadd.f32 %v7045_v34, %v6927_v55  ;;  %v7174_v3 = vsub.f32 %v7039_v40, %v11226_v46  ;;  %v7183_v42 = vsub.f32 %v7181_v50, %v7182_v51 }
 0x818   :  { %v7047_v26 = vpop.f32.mrf.mxu1 }
 0x819   :  { %v7050_v13 = vsel %vm1034_vm2, %v7046_v8, 0  ;;  %v7175_v58 = vand.u32 4294901760, %v7174_v3  ;;  %v7184_v4 = vand.u32 4294901760, %v7183_v42 }
 0x81a   :  { %v7077_v47 = vand.u32 4294901760, %v7050_v13 }
 0x81b   :  { %v7176_v32 = vsub.f32 %v7174_v3, %v7175_v58 }
 0x81c   :  { %v7167_v1 = vsub.f32 %v7050_v13, %v7077_v47  ;;  %8072 = vmatprep.subr.mxu0 %v7077_v47 }
 0x81d   :  { %8073 = vmatpush3.msra.mxu0 %v7077_v47  ;;  %v7177_v14 = vand.u32 4294901760, %v7176_v32 }
 0x81e   :  { %8074 = vmatprep.subr.mxu0 %v11226_v46  ;;  %v7168_v41 = vand.u32 4294901760, %v7167_v1 }
 0x81f   :  { %8075 = vmatpush3.msra.mxu0 %v11226_v46 }
 0x820   :  { %8076 = vmatprep.subr.mxu0 %v11228_v0  ;;  %v7169_v15 = vsub.f32 %v7167_v1, %v7168_v41 }
 0x821   :  { %8077 = vmatpush3.msra.mxu0 %v11228_v0 }
 0x822   :  { %8078 = vmatprep.subr.mxu0 %v11230_v56  ;;  %v7170_v23 = vand.u32 4294901760, %v7169_v15 }
 0x823   :  { %8079 = vmatpush3.msra.mxu0 %v11230_v56 }
 0x824   :  { %8083 = vmatprep.subr.mxu1 %v7170_v23  ;;  %8094 = vmatprep.subr.mxu0 %v7167_v1 }
 0x825   :  { %8081 = vmatmul.mubr.f32.vlgmr.msra.gmra.mxu0 %v9126_v52  ;;  %8084 = vmatpush3.msra.mxu1 %v7170_v23 }
 0x826   :  { %8095 = vmatpush3.msra.mxu0 %v7167_v1  ;;  %8085 = vmatprep.subr.mxu1 %v7177_v14 }
 0x827   :  { %8096 = vmatprep.subr.mxu0 %v7174_v3  ;;  %8086 = vmatpush3.msra.mxu1 %v7177_v14 }
 0x828   :  { %8097 = vmatpush3.msra.mxu0 %v7174_v3  ;;  %8087 = vmatprep.subr.mxu1 %v7184_v4 }
 0x829   :  { %8098 = vmatprep.subr.mxu0 %v7181_v50  ;;  %8088 = vmatpush3.msra.mxu1 %v7184_v4 }
 0x82a   :  { %8099 = vmatpush3.msra.mxu0 %v7181_v50  ;;  %8089 = vmatprep.subr.mxu1 %v7191_v60 }
 0x82b   :  { %8100 = vmatprep.subr.mxu0 %v7188_v18  ;;  %8090 = vmatpush3.msra.mxu1 %v7191_v60 }
 0x82c   :  { %8101 = vmatpush3.msra.mxu0 %v7188_v18  ;;  %8102 = vmatprep.mubr.f32.mxu0 %v9082_v30 }
 0x82d   :  { %8105 = vmatprep.subr.mxu1 %v7077_v47  ;;  %8116 = vmatprep.subr.mxu0 %v7168_v41 }
 0x82e   :  { %8092 = vmatmul.mubr.f32.vlgmr.msra.gmra.mxu1 %v9097_v9  ;;  %8103 = vmatmul.mubr.f32.vlgmr.msra.gmra.mxu0 %v9102_v37 }
 0x82f   :  { %8106 = vmatpush3.msra.mxu1 %v7077_v47  ;;  %8117 = vmatpush3.msra.mxu0 %v7168_v41 }
 0x830   :  { %8107 = vmatprep.subr.mxu1 %v11226_v46  ;;  %8118 = vmatprep.subr.mxu0 %v7175_v58 }
 0x831   :  { %8108 = vmatpush3.msra.mxu1 %v11226_v46  ;;  %8119 = vmatpush3.msra.mxu0 %v7175_v58 }
 0x832   :  { %8109 = vmatprep.subr.mxu1 %v11228_v0  ;;  %8120 = vmatprep.subr.mxu0 %v7182_v51 }
 0x833   :  { %8110 = vmatpush3.msra.mxu1 %v11228_v0  ;;  %8121 = vmatpush3.msra.mxu0 %v7182_v51 }
 0x834   :  { %8111 = vmatprep.subr.mxu1 %v11230_v56  ;;  %8122 = vmatprep.subr.mxu0 %v7189_v33 }
 0x835   :  { %8112 = vmatpush3.msra.mxu1 %v11230_v56  ;;  %8123 = vmatpush3.msra.mxu0 %v7189_v33 }
 0x836   :  { %8113 = vmatprep.mubr.f32.mxu1 %v9086_v2  ;;  %8127 = vmatprep.subr.mxu1 %v7077_v47 }
 0x837   :  { %8114 = vmatmul.mubr.f32.vlgmr.msra.gmra.mxu1 %v9111_v22  ;;  %8124 = vmatprep.mubr.f32.mxu0 %v9079_v21 }
 0x838   :  { %8128 = vmatpush3.msra.mxu1 %v7077_v47  ;;  %8125 = vmatmul.mubr.f32.vlgmr.msra.gmra.mxu0 %v9097_v9 }
 0x839   :  { %8129 = vmatprep.subr.mxu1 %v11226_v46  ;;  %8135 = vmatprep.mubr.f32.mxu1 %v9079_v21 }
 0x83a   :  { %8130 = vmatpush3.msra.mxu1 %v11226_v46 }
 0x83b   :  { %8131 = vmatprep.subr.mxu1 %v11228_v0 }
 0x83c   :  { %8132 = vmatpush3.msra.mxu1 %v11228_v0 }
 0x83d   :  { %8133 = vmatprep.subr.mxu1 %v11230_v56 }
 0x83e   :  { %8134 = vmatpush3.msra.mxu1 %v11230_v56 }
 0x83f   :  { %8136 = vmatmul.mubr.f32.vlgmr.msra.gmra.mxu1 %v9097_v9 }
 0x8e5   :  { %v8082_v30 = vpop.f32.mrf.mxu0 }
 0x8e7   :  { %v7127_v2 = vpop.f32.mrf.mxu0 }
 0x8ee   :  { %v8093_v37 = vpop.f32.mrf.mxu1  ;;  %v8104_v52 = vpop.f32.mrf.mxu0 }
 0x8ef   :  { %v7235_v5 = vadd.f32 %v8093_v37, %v8082_v30 }
 0x8f0   :  { %v7228_v22 = vpop.f32.mrf.mxu1  ;;  %v7314_v21 = vpop.f32.mrf.mxu0 }
 0x8f1   :  { %v7229_v53 = vadd.f32 %v7228_v22, %v7127_v2  ;;  %v7322_v16 = vadd.f32 %v8104_v52, %v7235_v5 }
 0x8f3   :  { %v7315_v11 = vadd.f32 %v7314_v21, %v7229_v53 }
 0x8f7   :  { %v8115_v59 = vpop.f32.mrf.mxu1 }
 0x8f8   :  { %v8126_v10 = vpop.f32.mrf.mxu0  ;;  %v7407_v12 = vadd.f32 %v8115_v59, %v7322_v16 }
 0x8f9   :  { %v7398_v6 = vpop.f32.mrf.mxu1 }
 0x8fa   :  { %v7399_v17 = vadd.f32 %v7398_v6, %v7315_v11  ;;  %v7489_v25 = vpop.f32.mrf.mxu0  ;;  %v7496_v9 = vadd.f32 %v8126_v10, %v7407_v12 }
 0x8fc   :  { %v7490_v45 = vadd.f32 %v7489_v25, %v7399_v17 }
 0x8ff   :  { %v8137_v28 = vpop.f32.mrf.mxu1 }
 0x900   :  { %v7577_v48 = vadd.f32 %v8137_v28, %v7496_v9 }
 0x901   :  { %v7570_v57 = vpop.f32.mrf.mxu1 }
 0x902   :  { %v7581_v62 = vsub.f32 %v7577_v48, %v12005_v61  ;;  %v7571_v20 = vadd.f32 %v7570_v57, %v7490_v45 }
 0x904   :  { %v7587_v63 = vmul.f32 2.0, %v7581_v62  ;;  %v7580_v7 = vsub.f32 %v7571_v20, %v3065_v35 }
 0x906   :  { %v7589_v38 = vadd.f32 0.0009, %v7587_v63  ;;  %v7586_v27 = vmul.f32 2.0, %v7580_v7 }
 0x908   :  { %v7591_v31 = vmul.f32 %v7589_v38, %v7585_v29  ;;  %v7588_v40 = vadd.f32 0.0009, %v7586_v27 }
 0x90a   :  { %v7605_v49 = vmul.f32 %v8141_v43, %v7591_v31  ;;  %v7590_v44 = vmul.f32 %v7588_v40, %v7584_v54 }
 0x90c   :  { %v7604_v55 = vmul.f32 %v8143_v24, %v7590_v44 }
 0x90e   :  { %v7606_v46 = vadd.f32 %v7605_v49, %v7604_v55 }
 0x910   :  { %v7607_v0 = vrot.slane %v7606_v46, 4 }
 0x912   :  { %v7608_v34 = vadd.f32 %v7607_v0, %v7606_v46 }
 0x914   :  { %v7609_v8 = vrot.slane %v7608_v34, 2 }
 0x916   :  { %v7610_v56 = vadd.f32 %v7609_v8, %v7608_v34 }
 0x918   :  { %v7611_v3 = vrot.slane %v7610_v56, 1 }
 0x91a   :  { %v7612_v26 = vadd.f32 %v7611_v3, %v7610_v56 }
 0x91c   :  { %7613 = vst [vmem:[#allocation2] sm:$0x1] %v7612_v26 }
 0x91d   :  { %8187 = shalt.err (!%p8184_p4)
}
 0x91e   :  { %7623 = dma.vmem_to_hbm [thread:$0]  %s7621_s3, 16, %s11277_s4, [#allocation3]  }
 0x91f   :  { %8196 = dma.done.wait [#allocation3], 16  }
 0x920   :  { %8197 = vsyncadd [#allocation3], 4294967280 }
 0x921   :  { %7627 = vsyncpa [#allocation3], 1 }

</bundles_post_ra>
